<compile_context>
chip_gen: v7x
topology: tpu7x:2x2x1
jax: 0.10.0
libtpu: 0.0.40
codegen_flags: <defaults>
</compile_context>

<pallas_src>
import functools
import math

import jax
import jax.numpy as jnp
from jax import lax
from jax.experimental import pallas as pl
from jax.experimental.pallas import tpu as pltpu

RMS_EPS = 1e-5
SCAN_CHUNK = 8   # sublane-aligned scan chunk: batched exp + unrolled recurrence + block store
CONV_PAD = 8     # sublane-aligned prefix of the conv staging buffer


def _silu(x):
    return x * jax.nn.sigmoid(x)


def _softplus(x):
    return jnp.logaddexp(x, 0.0)


def _rmsnorm(x, w, eps=RMS_EPS):
    var = jnp.mean(x * x, axis=-1, keepdims=True)
    return x * jax.lax.rsqrt(var + eps) * w


# ----------------------------------------------------------------------------
# Pallas kernel: one (batch, L-tile) step of the MambaBlock forward.
# ----------------------------------------------------------------------------
def mamba_block_kernel(
    x_ref,
    w_in_t_ref,                       # (d_model, 2*d_inner) bf16, fused in_proj
    conv_w_t_ref, conv_b_ref,         # (d_conv, d_inner) f32, (1, d_inner) f32
    w_x_t_ref,                        # (d_inner, nw_pad) bf16, fused + lane-padded x_proj
    w_dt_t_ref, b_dt_ref,             # (nw_pad, d_inner) bf16 (zero-padded rows), (1, d_inner) f32
    A_neg_t_ref, D_ref,               # (d_state, d_inner) f32 == -exp(A_log).T, (1, d_inner) f32
    w_out_t_ref,                      # (d_inner, d_model) bf16
    norm1_w_ref,                      # (1, d_model) f32
    w_fc1_t_ref, w_fc2_t_ref,         # (d_model, 2*hidden) bf16, (hidden, d_model) bf16
    norm2_w_ref,                      # (1, d_model) f32
    o_ref,
    # VMEM scratch
    conv_buf, conv_state, h_state, dt_s, u_s, b_s, c_s, y_s,
    *, l_tile, d_conv, d_inner, d_state, dt_rank,
):
    f32 = jnp.float32
    lt = pl.program_id(1)

    def mm(a, w_ref):
        # bf16 MXU matmul, f32 accumulation; weights are pre-transposed on host.
        # TODO(synk): activations cast to bf16 (as in the in-file reference); an f32
        # torch module will diverge slightly at large shapes.
        return jnp.dot(a.astype(jnp.bfloat16), w_ref[...], preferred_element_type=f32)

    # ---- reset carried state (SSM h + conv halo) at the start of each sequence ----
    @pl.when(lt == 0)
    def _():
        conv_state[...] = jnp.zeros_like(conv_state)
        h_state[...] = jnp.zeros_like(h_state)

    x = x_ref[0]                                          # (l_tile, d_model) f32
    residual = x

    # ---- fused input projection -> [x | z] halves ----
    xz = mm(x, w_in_t_ref)                                # (l_tile, 2*d_inner)
    xin = xz[:, :d_inner]
    z = xz[:, d_inner:]

    # ---- causal depthwise conv1d with carried (d_conv-1)-row halo ----
    # xin is stored at sublane offset CONV_PAD so the big store is aligned; halo rows
    # from the previous tile (zeros for the first tile) sit directly below it.
    base_off = CONV_PAD - (d_conv - 1)
    conv_buf[base_off:CONV_PAD, :] = conv_state[...]
    conv_buf[CONV_PAD:CONV_PAD + l_tile, :] = xin
    u_pre = conv_b_ref[...] + conv_buf[pl.ds(base_off, l_tile), :] * conv_w_t_ref[0:1, :]
    for k in range(1, d_conv):                            # d_conv is tiny & static
        u_pre = u_pre + conv_buf[pl.ds(base_off + k, l_tile), :] * conv_w_t_ref[k:k + 1, :]
    u = _silu(u_pre)                                      # (l_tile, d_inner)
    # carry the last d_conv-1 rows of xin into the next tile
    conv_state[...] = xin[l_tile - (d_conv - 1):, :]

    # ---- fused, lane-padded x_proj -> [dt_lowrank | B | C | 0...] ----
    dbc = mm(u, w_x_t_ref)                                # (l_tile, nw_pad)
    # dt_proj against the zero-padded weight: identical math, no narrow lane slice.
    dt = _softplus(mm(dbc, w_dt_t_ref) + b_dt_ref[...])   # (l_tile, d_inner)

    # ---- stage scan inputs in VMEM scratch (aligned chunk reads inside the loop) ----
    dt_s[...] = dt
    u_s[...] = u
    b_s[...] = dbc[:, dt_rank:dt_rank + d_state]          # (l_tile, d_state)
    c_s[...] = dbc[:, dt_rank + d_state:dt_rank + 2 * d_state]

    a_t = A_neg_t_ref[...]                                # (d_state, d_inner), = -exp(A_log)
    n_chunks = l_tile // SCAN_CHUNK

    def chunk_body(c, h):
        base = pl.multiple_of(c * SCAN_CHUNK, SCAN_CHUNK)
        dt_c = dt_s[pl.ds(base, SCAN_CHUNK), :]           # (T, d_inner)
        u_c = u_s[pl.ds(base, SCAN_CHUNK), :]
        # one batched exp per chunk keeps the EUP ahead of the serial recurrence
        dA = jnp.exp(dt_c[:, None, :] * a_t[None, :, :])  # (T, d_state, d_inner)
        dBu = dt_c * u_c                                  # (T, d_inner)
        bT = b_s[pl.ds(base, SCAN_CHUNK), :].T            # (d_state, T) one tiny transpose
        cT = c_s[pl.ds(base, SCAN_CHUNK), :].T
        rows = []
        for t in range(SCAN_CHUNK):                       # fully unrolled recurrence
            h = h * dA[t] + bT[:, t:t + 1] * dBu[t:t + 1, :]
            rows.append(jnp.sum(h * cT[:, t:t + 1], axis=0, keepdims=True))
        # one aligned (T, d_inner) store instead of T masked single-row stores
        y_s[pl.ds(base, SCAN_CHUNK), :] = jnp.concatenate(rows, axis=0)
        return h

    h_final = lax.fori_loop(0, n_chunks, chunk_body, h_state[...])
    h_state[...] = h_final

    y = (y_s[...] + u_s[...] * D_ref[...]) * _silu(z)     # (l_tile, d_inner)
    out = mm(y, w_out_t_ref)                              # (l_tile, d_model)

    # ---- residual + RMSNorm ----
    x1 = _rmsnorm(out + residual, norm1_w_ref[...])

    # ---- GatedMLP (fused fc1 -> [value | gate]) + residual + RMSNorm ----
    h12 = mm(x1, w_fc1_t_ref)                             # (l_tile, 2*hidden)
    hid = h12.shape[1] // 2
    mlp = h12[:, :hid] * _silu(h12[:, hid:])
    y2 = mm(mlp, w_fc2_t_ref)                             # (l_tile, d_model)
    x2 = _rmsnorm(y2 + x1, norm2_w_ref[...])

    # TODO(synk): nn.Dropout is identity in eval mode; train-mode RNG masking not reproduced.
    o_ref[0] = x2.astype(o_ref.dtype)


# ----------------------------------------------------------------------------
# Parameters: PyTorch-layout init + host-side preparation (transpose/fuse/pad/cast).
# ----------------------------------------------------------------------------
def make_params(key, d_model, d_state, d_conv, expand):
    d_inner = expand * d_model
    dt_rank = math.ceil(d_model / 16)
    hidden = ((int(8 * d_model / 3) + 127) // 128) * 128

    keys = jax.random.split(key, 9)

    def nrm(k, shape, scale=0.05):
        return (scale * jax.random.normal(k, shape)).astype(jnp.float32)

    return {
        "w_in": nrm(keys[0], (2 * d_inner, d_model)),            # in_proj.weight
        "conv_w": nrm(keys[1], (d_inner, d_conv), scale=0.3),    # conv1d.weight.squeeze(1)
        "conv_b": nrm(keys[2], (d_inner,), scale=0.1),
        "w_x": nrm(keys[3], (dt_rank + 2 * d_state, d_inner)),   # x_proj.weight
        "w_dt": nrm(keys[4], (d_inner, dt_rank), scale=0.5),
        "b_dt": nrm(keys[5], (d_inner,), scale=0.5),
        # S4D-real style init: A_log[d, n] = log(n + 1)
        "A_log": jnp.tile(
            jnp.log(jnp.arange(1, d_state + 1, dtype=jnp.float32))[None, :],
            (d_inner, 1)),
        "D": jnp.ones((d_inner,), jnp.float32),
        "w_out": nrm(keys[6], (d_model, d_inner)),
        "norm1_w": jnp.ones((d_model,), jnp.float32),
        "w_fc1": nrm(keys[7], (2 * hidden, d_model)),
        "w_fc2": nrm(keys[8], (d_model, hidden)),
        "norm2_w": jnp.ones((d_model,), jnp.float32),
    }


def prepare_params(p):
    """Host-side prep: transpose, fuse, lane-pad x_proj/dt_proj, cast matmul weights to bf16."""
    bf16 = jnp.bfloat16
    f32 = jnp.float32
    d_inner, d_conv = p["conv_w"].shape
    dt_rank = p["w_dt"].shape[1]
    d_state = p["A_log"].shape[1]
    hidden = p["w_fc2"].shape[1]
    d_model = p["w_in"].shape[1]

    nw = dt_rank + 2 * d_state
    nw_pad = ((nw + 127) // 128) * 128
    w_x_t = jnp.zeros((d_inner, nw_pad), bf16).at[:, :nw].set(p["w_x"].T.astype(bf16))
    w_dt_t = jnp.zeros((nw_pad, d_inner), bf16).at[:dt_rank, :].set(p["w_dt"].T.astype(bf16))

    pp = {
        "w_in_t": p["w_in"].T.astype(bf16),          # (d_model, 2*d_inner)
        "conv_w_t": p["conv_w"].T.astype(f32),       # (d_conv, d_inner)
        "conv_b": p["conv_b"].reshape(1, -1).astype(f32),
        "w_x_t": w_x_t,                              # (d_inner, nw_pad)
        "w_dt_t": w_dt_t,                            # (nw_pad, d_inner), rows >= dt_rank are 0
        "b_dt": p["b_dt"].reshape(1, -1).astype(f32),
        "A_neg_t": (-jnp.exp(p["A_log"])).T.astype(f32),   # (d_state, d_inner)
        "D": p["D"].reshape(1, -1).astype(f32),
        "w_out_t": p["w_out"].T.astype(bf16),        # (d_inner, d_model)
        "norm1_w": p["norm1_w"].reshape(1, -1).astype(f32),
        "w_fc1_t": p["w_fc1"].T.astype(bf16),        # (d_model, 2*hidden)
        "w_fc2_t": p["w_fc2"].T.astype(bf16),        # (hidden, d_model)
        "norm2_w": p["norm2_w"].reshape(1, -1).astype(f32),
    }
    dims = dict(d_model=d_model, d_inner=d_inner, d_state=d_state, d_conv=d_conv,
                dt_rank=dt_rank, hidden=hidden, nw_pad=nw_pad)
    return pp, dims


PARAM_ORDER = [
    "w_in_t", "conv_w_t", "conv_b",
    "w_x_t", "w_dt_t", "b_dt",
    "A_neg_t", "D",
    "w_out_t", "norm1_w",
    "w_fc1_t", "w_fc2_t", "norm2_w",
]


# ----------------------------------------------------------------------------
# Wrapper: grid = (batch "parallel", L-tiles "arbitrary"); weights as full VMEM blocks.
# ----------------------------------------------------------------------------
def _pick_l_tile(L):
    for cand in (128, 64, 32, 16, 8):
        if cand <= L and L % cand == 0:
            return cand
    return L


def _vmem_limit_bytes():
    # Generation-aware scoped-VMEM limit: ~48 MiB on v7x (64 MiB/TC), ~96 MiB on v5e/v6e.
    try:
        cap = int(pltpu.get_tpu_info().vmem_capacity_bytes)
    except Exception:
        cap = 128 * 1024 * 1024
    return int(min((cap * 3) // 4, 100 * 1024 * 1024))


def _forward(x, pp, dims, single_buffer_weights):
    B, L, D = x.shape
    d_inner, d_state = dims["d_inner"], dims["d_state"]
    d_conv, dt_rank = dims["d_conv"], dims["dt_rank"]
    hidden, nw_pad = dims["hidden"], dims["nw_pad"]

    assert L % SCAN_CHUNK == 0, "seq_len must be a multiple of 8"
    assert 2 <= d_conv <= CONV_PAD + 1

    l_tile = _pick_l_tile(L)
    n_lt = L // l_tile

    kern = functools.partial(
        mamba_block_kernel, l_tile=l_tile, d_conv=d_conv,
        d_inner=d_inner, d_state=d_state, dt_rank=dt_rank)

    def weight_spec(arr):
        n = arr.ndim
        idx = lambda b, lt, _n=n: (0,) * _n
        if single_buffer_weights:
            # constant index_map -> fetched once; single buffering halves weight VMEM (v7x)
            return pl.BlockSpec(arr.shape, idx, pipeline_mode=pl.Buffered(buffer_count=1))
        return pl.BlockSpec(arr.shape, idx)

    in_specs = [pl.BlockSpec((1, l_tile, D), lambda b, lt: (b, lt, 0))]
    in_specs += [weight_spec(pp[k]) for k in PARAM_ORDER]
    out_spec = pl.BlockSpec((1, l_tile, D), lambda b, lt: (b, lt, 0))

    flops = 2 * B * L * (
        D * 2 * d_inner                      # in_proj
        + d_inner * nw_pad                   # x_proj (padded)
        + nw_pad * d_inner                   # dt_proj (padded)
        + d_inner * D                        # out_proj
        + D * 2 * hidden                     # fc1
        + hidden * D                         # fc2
    ) + 6 * B * L * d_state * d_inner        # selective scan elementwise
    transcendentals = B * L * (d_state * d_inner + 3 * d_inner + hidden)
    weight_bytes = sum(int(pp[k].size) * pp[k].dtype.itemsize for k in PARAM_ORDER)
    # weights are DMA'd once (constant index_map), x read + output written once
    bytes_accessed = 2 * x.size * x.dtype.itemsize + weight_bytes

    return pl.pallas_call(
        kern,
        out_shape=jax.ShapeDtypeStruct((B, L, D), x.dtype),
        grid=(B, n_lt),
        in_specs=in_specs,
        out_specs=out_spec,
        scratch_shapes=[
            pltpu.VMEM((CONV_PAD + l_tile, d_inner), jnp.float32),  # conv staging (aligned)
            pltpu.VMEM((d_conv - 1, d_inner), jnp.float32),         # conv halo carry
            pltpu.VMEM((d_state, d_inner), jnp.float32),            # SSM state carry
            pltpu.VMEM((l_tile, d_inner), jnp.float32),             # dt
            pltpu.VMEM((l_tile, d_inner), jnp.float32),             # u
            pltpu.VMEM((l_tile, d_state), jnp.float32),             # B
            pltpu.VMEM((l_tile, d_state), jnp.float32),             # C
            pltpu.VMEM((l_tile, d_inner), jnp.float32),             # y (scan output)
        ],
        compiler_params=pltpu.CompilerParams(
            dimension_semantics=("parallel", "arbitrary"),
            vmem_limit_bytes=_vmem_limit_bytes(),
        ),
        cost_estimate=pl.CostEstimate(
            flops=int(flops),
            transcendentals=int(transcendentals),
            bytes_accessed=int(bytes_accessed)),
    )(x, *[pp[k] for k in PARAM_ORDER])


def mamba_block(x, pp, dims):
    # TODO(synk): with B == 1 the "parallel" batch axis leaves one v7x TensorCore idle;
    # an extra parallel axis can't be added because h carries across L tiles.
    try:
        return _forward(x, pp, dims, single_buffer_weights=True)
    except Exception:
        # Fallback if this JAX build rejects single-buffered (pl.Buffered(1)) BlockSpecs.
        return _forward(x, pp, dims, single_buffer_weights=False)


# ----------------------------------------------------------------------------
# Pure-JAX reference (same math / same prepared params, for correctness check).
# ----------------------------------------------------------------------------
def ref_forward(x, pp, dims):
    L = x.shape[1]
    d_inner, d_state = dims["d_inner"], dims["d_state"]
    d_conv, dt_rank = dims["d_conv"], dims["dt_rank"]

    def mm(a, w):
        return jnp.dot(a.astype(jnp.bfloat16), w, preferred_element_type=jnp.float32)

    def one(xb):
        residual = xb
        xz = mm(xb, pp["w_in_t"])
        xin, z = xz[:, :d_inner], xz[:, d_inner:]
        xpad = jnp.concatenate(
            [jnp.zeros((d_conv - 1, d_inner), jnp.float32), xin], axis=0)
        u = _silu(pp["conv_b"] + sum(
            xpad[k:k + L] * pp["conv_w_t"][k] for k in range(d_conv)))
        dbc = mm(u, pp["w_x_t"])
        dt = _softplus(mm(dbc[:, :dt_rank], pp["w_dt_t"][:dt_rank]) + pp["b_dt"])
        Bm = dbc[:, dt_rank:dt_rank + d_state]
        Cm = dbc[:, dt_rank + d_state:dt_rank + 2 * d_state]
        a_t = pp["A_neg_t"]                                 # (d_state, d_inner)

        def step(h, inp):
            dt_l, dbu_l, B_l, C_l = inp
            dA = jnp.exp(dt_l[None, :] * a_t)
            h = h * dA + B_l[:, None] * dbu_l[None, :]
            return h, (h * C_l[:, None]).sum(axis=0)

        _, ys = lax.scan(step, jnp.zeros((d_state, d_inner), jnp.float32),
                         (dt, dt * u, Bm, Cm))
        y = (ys + u * pp["D"]) * _silu(z)
        out = mm(y, pp["w_out_t"])
        x1 = _rmsnorm(out + residual, pp["norm1_w"])
        h12 = mm(x1, pp["w_fc1_t"])
        hid = h12.shape[1] // 2
        mlp = h12[:, :hid] * _silu(h12[:, hid:])
        y2 = mm(mlp, pp["w_fc2_t"])
        return _rmsnorm(y2 + x1, pp["norm2_w"])

    return jax.vmap(one)(x)


if __name__ == "__main__":
    # Small shapes consistent with MambaBlock(d_model, d_state, d_conv, expand, d_intermediate).
    B, L = 2, 8
    d_model, d_state, d_conv, expand = 32, 8, 4, 2

    key = jax.random.PRNGKey(0)
    kx, kp = jax.random.split(key)
    x = jax.random.normal(kx, (B, L, d_model), dtype=jnp.float32)
    params = make_params(kp, d_model, d_state, d_conv, expand)
    pp, dims = prepare_params(params)

    out = jax.block_until_ready(mamba_block(x, pp, dims))
    ref = jax.block_until_ready(ref_forward(x, pp, dims))

    assert out.shape == (B, L, d_model)
    assert bool(jnp.all(jnp.isfinite(out)))
    max_err = float(jnp.max(jnp.abs(out - ref)))
    assert jnp.allclose(out, ref, atol=2e-2, rtol=2e-2), max_err

    print("KERNEL_OK")
</pallas_src>

<mosaic_0001>
module attributes {stable_mosaic.version = 11 : i64} {
  func.func @mamba_block_kernel(%arg0: i32, %arg1: i32, %arg2: memref<1x8x32xf32, #tpu.memory_space<vmem>>, %arg3: memref<32x128xbf16, #tpu.memory_space<vmem>>, %arg4: memref<4x64xf32, #tpu.memory_space<vmem>>, %arg5: memref<1x64xf32, #tpu.memory_space<vmem>>, %arg6: memref<64x128xbf16, #tpu.memory_space<vmem>>, %arg7: memref<128x64xbf16, #tpu.memory_space<vmem>>, %arg8: memref<1x64xf32, #tpu.memory_space<vmem>>, %arg9: memref<8x64xf32, #tpu.memory_space<vmem>>, %arg10: memref<1x64xf32, #tpu.memory_space<vmem>>, %arg11: memref<64x32xbf16, #tpu.memory_space<vmem>>, %arg12: memref<1x32xf32, #tpu.memory_space<vmem>>, %arg13: memref<32x256xbf16, #tpu.memory_space<vmem>>, %arg14: memref<128x32xbf16, #tpu.memory_space<vmem>>, %arg15: memref<1x32xf32, #tpu.memory_space<vmem>>, %arg16: memref<1x8x32xf32, #tpu.memory_space<vmem>>, %arg17: memref<16x64xf32, #tpu.memory_space<vmem>>, %arg18: memref<3x64xf32, #tpu.memory_space<vmem>>, %arg19: memref<8x64xf32, #tpu.memory_space<vmem>>, %arg20: memref<8x64xf32, #tpu.memory_space<vmem>>, %arg21: memref<8x64xf32, #tpu.memory_space<vmem>>, %arg22: memref<8x8xf32, #tpu.memory_space<vmem>>, %arg23: memref<8x8xf32, #tpu.memory_space<vmem>>, %arg24: memref<8x64xf32, #tpu.memory_space<vmem>>) attributes {dimension_semantics = [#tpu.dimension_semantics<parallel>, #tpu.dimension_semantics<arbitrary>], iteration_bounds = array<i64: 2, 1>, scalar_prefetch = 0 : i64, scratch_operands = 8 : i64, tpu.core_type = #tpu.core_type<tc>, window_params = [{transform_indices = @transform_0, window_bounds = array<i64: 1, 8, 32>}, {pipeline_mode = #tpu.pipeline_mode<synchronous>, transform_indices = @transform_1, window_bounds = array<i64: 32, 128>}, {pipeline_mode = #tpu.pipeline_mode<synchronous>, transform_indices = @transform_2, window_bounds = array<i64: 4, 64>}, {pipeline_mode = #tpu.pipeline_mode<synchronous>, transform_indices = @transform_3, window_bounds = array<i64: 1, 64>}, {pipeline_mode = #tpu.pipeline_mode<synchronous>, transform_indices = @transform_4, window_bounds = array<i64: 64, 128>}, {pipeline_mode = #tpu.pipeline_mode<synchronous>, transform_indices = @transform_5, window_bounds = array<i64: 128, 64>}, {pipeline_mode = #tpu.pipeline_mode<synchronous>, transform_indices = @transform_6, window_bounds = array<i64: 1, 64>}, {pipeline_mode = #tpu.pipeline_mode<synchronous>, transform_indices = @transform_7, window_bounds = array<i64: 8, 64>}, {pipeline_mode = #tpu.pipeline_mode<synchronous>, transform_indices = @transform_8, window_bounds = array<i64: 1, 64>}, {pipeline_mode = #tpu.pipeline_mode<synchronous>, transform_indices = @transform_9, window_bounds = array<i64: 64, 32>}, {pipeline_mode = #tpu.pipeline_mode<synchronous>, transform_indices = @transform_10, window_bounds = array<i64: 1, 32>}, {pipeline_mode = #tpu.pipeline_mode<synchronous>, transform_indices = @transform_11, window_bounds = array<i64: 32, 256>}, {pipeline_mode = #tpu.pipeline_mode<synchronous>, transform_indices = @transform_12, window_bounds = array<i64: 128, 32>}, {pipeline_mode = #tpu.pipeline_mode<synchronous>, transform_indices = @transform_13, window_bounds = array<i64: 1, 32>}, {transform_indices = @transform_14, window_bounds = array<i64: 1, 8, 32>}]} {
    %c0_i32 = arith.constant 0 : i32
    %0 = arith.cmpi eq, %arg1, %c0_i32 : i32
    %1 = arith.extui %0 : i1 to i32
    %c0_i32_0 = arith.constant 0 : i32
    %2 = arith.cmpi ne, %1, %c0_i32_0 : i32
    scf.if %2 {
      %cst_93 = arith.constant 0.000000e+00 : f32
      %271 = vector.broadcast %cst_93 : f32 to vector<3x64xf32>
      %c0_94 = arith.constant 0 : index
      %c0_95 = arith.constant 0 : index
      %272 = vector.load %arg18[%c0_94, %c0_95] : memref<3x64xf32, #tpu.memory_space<vmem>>, vector<3x64xf32>
      tpu.vector_store %arg18[%c0_94, %c0_95], %271 {strides = array<i32>} : memref<3x64xf32, #tpu.memory_space<vmem>>, vector<3x64xf32>,
      %cst_96 = arith.constant 0.000000e+00 : f32
      %273 = vector.broadcast %cst_96 : f32 to vector<8x64xf32>
      %c0_97 = arith.constant 0 : index
      %c0_98 = arith.constant 0 : index
      %274 = vector.load %arg19[%c0_97, %c0_98] : memref<8x64xf32, #tpu.memory_space<vmem>>, vector<8x64xf32>
      tpu.vector_store %arg19[%c0_97, %c0_98], %273 {strides = array<i32>} : memref<8x64xf32, #tpu.memory_space<vmem>>, vector<8x64xf32>,
    } else {
    }
    %c0 = arith.constant 0 : index
    %c0_1 = arith.constant 0 : index
    %c0_2 = arith.constant 0 : index
    %3 = vector.load %arg2[%c0, %c0_1, %c0_2] : memref<1x8x32xf32, #tpu.memory_space<vmem>>, vector<1x8x32xf32>
    %4 = vector.shape_cast %3 : vector<1x8x32xf32> to vector<8x32xf32>
    %5 = arith.truncf %4 : vector<8x32xf32> to vector<8x32xbf16>
    %c0_3 = arith.constant 0 : index
    %c0_4 = arith.constant 0 : index
    %6 = vector.load %arg3[%c0_3, %c0_4] : memref<32x128xbf16, #tpu.memory_space<vmem>>, vector<32x128xbf16>
    %cst = arith.constant dense<0.000000e+00> : vector<8x128xf32>
    %7 = tpu.matmul %5, %6, %cst {dimension_numbers = #tpu.dot_dimension_numbers<[1], [0], [0], [1], [0, 0, 1, 1], [], []>} : vector<8x32xbf16>, vector<32x128xbf16>, vector<8x128xf32> -> vector<8x128xf32>
    %8 = vector.extract_strided_slice %7 {offsets = [0, 0], sizes = [8, 64], strides = [1, 1]} : vector<8x128xf32> to vector<8x64xf32>
    %9 = vector.extract_strided_slice %7 {offsets = [0, 64], sizes = [8, 64], strides = [1, 1]} : vector<8x128xf32> to vector<8x64xf32>
    %c0_5 = arith.constant 0 : index
    %c0_6 = arith.constant 0 : index
    %10 = vector.load %arg18[%c0_5, %c0_6] : memref<3x64xf32, #tpu.memory_space<vmem>>, vector<3x64xf32>
    %c5 = arith.constant 5 : index
    %c0_7 = arith.constant 0 : index
    %11 = vector.load %arg17[%c5, %c0_7] : memref<16x64xf32, #tpu.memory_space<vmem>>, vector<3x64xf32>
    tpu.vector_store %arg17[%c5, %c0_7], %10 {strides = array<i32>} : memref<16x64xf32, #tpu.memory_space<vmem>>, vector<3x64xf32>,
    %c8 = arith.constant 8 : index
    %c0_8 = arith.constant 0 : index
    %12 = vector.load %arg17[%c8, %c0_8] : memref<16x64xf32, #tpu.memory_space<vmem>>, vector<8x64xf32>
    tpu.vector_store %arg17[%c8, %c0_8], %8 {strides = array<i32>} : memref<16x64xf32, #tpu.memory_space<vmem>>, vector<8x64xf32>,
    %c0_9 = arith.constant 0 : index
    %c0_10 = arith.constant 0 : index
    %13 = vector.load %arg5[%c0_9, %c0_10] : memref<1x64xf32, #tpu.memory_space<vmem>>, vector<1x64xf32>
    %c5_11 = arith.constant 5 : index
    %c0_12 = arith.constant 0 : index
    %14 = vector.load %arg17[%c5_11, %c0_12] : memref<16x64xf32, #tpu.memory_space<vmem>>, vector<8x64xf32>
    %c0_13 = arith.constant 0 : index
    %c0_14 = arith.constant 0 : index
    %15 = vector.load %arg4[%c0_13, %c0_14] : memref<4x64xf32, #tpu.memory_space<vmem>>, vector<1x64xf32>
    %16 = vector.broadcast %15 : vector<1x64xf32> to vector<8x64xf32>
    %17 = arith.mulf %14, %16 : vector<8x64xf32>
    %18 = vector.broadcast %13 : vector<1x64xf32> to vector<8x64xf32>
    %19 = arith.addf %18, %17 : vector<8x64xf32>
    %c6 = arith.constant 6 : index
    %c0_15 = arith.constant 0 : index
    %20 = vector.load %arg17[%c6, %c0_15] : memref<16x64xf32, #tpu.memory_space<vmem>>, vector<8x64xf32>
    %c1 = arith.constant 1 : index
    %c0_16 = arith.constant 0 : index
    %21 = vector.load %arg4[%c1, %c0_16] : memref<4x64xf32, #tpu.memory_space<vmem>>, vector<1x64xf32>
    %22 = vector.broadcast %21 : vector<1x64xf32> to vector<8x64xf32>
    %23 = arith.mulf %20, %22 : vector<8x64xf32>
    %24 = arith.addf %19, %23 : vector<8x64xf32>
    %c7 = arith.constant 7 : index
    %c0_17 = arith.constant 0 : index
    %25 = vector.load %arg17[%c7, %c0_17] : memref<16x64xf32, #tpu.memory_space<vmem>>, vector<8x64xf32>
    %c2 = arith.constant 2 : index
    %c0_18 = arith.constant 0 : index
    %26 = vector.load %arg4[%c2, %c0_18] : memref<4x64xf32, #tpu.memory_space<vmem>>, vector<1x64xf32>
    %27 = vector.broadcast %26 : vector<1x64xf32> to vector<8x64xf32>
    %28 = arith.mulf %25, %27 : vector<8x64xf32>
    %29 = arith.addf %24, %28 : vector<8x64xf32>
    %c8_19 = arith.constant 8 : index
    %c0_20 = arith.constant 0 : index
    %30 = vector.load %arg17[%c8_19, %c0_20] : memref<16x64xf32, #tpu.memory_space<vmem>>, vector<8x64xf32>
    %c3 = arith.constant 3 : index
    %c0_21 = arith.constant 0 : index
    %31 = vector.load %arg4[%c3, %c0_21] : memref<4x64xf32, #tpu.memory_space<vmem>>, vector<1x64xf32>
    %32 = vector.broadcast %31 : vector<1x64xf32> to vector<8x64xf32>
    %33 = arith.mulf %30, %32 : vector<8x64xf32>
    %34 = arith.addf %29, %33 : vector<8x64xf32>
    %35 = arith.negf %34 : vector<8x64xf32>
    %36 = math.exp %35 : vector<8x64xf32>
    %cst_22 = arith.constant 1.000000e+00 : f32
    %37 = vector.broadcast %cst_22 : f32 to vector<8x64xf32>
    %38 = arith.addf %37, %36 : vector<8x64xf32>
    %39 = arith.divf %37, %38 : vector<8x64xf32>
    %40 = arith.mulf %34, %39 : vector<8x64xf32>
    %41 = vector.extract_strided_slice %8 {offsets = [5, 0], sizes = [3, 64], strides = [1, 1]} : vector<8x64xf32> to vector<3x64xf32>
    %c0_23 = arith.constant 0 : index
    %c0_24 = arith.constant 0 : index
    %42 = vector.load %arg18[%c0_23, %c0_24] : memref<3x64xf32, #tpu.memory_space<vmem>>, vector<3x64xf32>
    tpu.vector_store %arg18[%c0_23, %c0_24], %41 {strides = array<i32>} : memref<3x64xf32, #tpu.memory_space<vmem>>, vector<3x64xf32>,
    %43 = arith.truncf %40 : vector<8x64xf32> to vector<8x64xbf16>
    %c0_25 = arith.constant 0 : index
    %c0_26 = arith.constant 0 : index
    %44 = vector.load %arg6[%c0_25, %c0_26] : memref<64x128xbf16, #tpu.memory_space<vmem>>, vector<64x128xbf16>
    %cst_27 = arith.constant dense<0.000000e+00> : vector<8x128xf32>
    %45 = tpu.matmul %43, %44, %cst_27 {dimension_numbers = #tpu.dot_dimension_numbers<[1], [0], [0], [1], [0, 0, 1, 1], [], []>} : vector<8x64xbf16>, vector<64x128xbf16>, vector<8x128xf32> -> vector<8x128xf32>
    %46 = arith.truncf %45 : vector<8x128xf32> to vector<8x128xbf16>
    %c0_28 = arith.constant 0 : index
    %c0_29 = arith.constant 0 : index
    %47 = vector.load %arg7[%c0_28, %c0_29] : memref<128x64xbf16, #tpu.memory_space<vmem>>, vector<128x64xbf16>
    %cst_30 = arith.constant dense<0.000000e+00> : vector<8x64xf32>
    %48 = tpu.matmul %46, %47, %cst_30 {dimension_numbers = #tpu.dot_dimension_numbers<[1], [0], [0], [1], [0, 0, 1, 1], [], []>} : vector<8x128xbf16>, vector<128x64xbf16>, vector<8x64xf32> -> vector<8x64xf32>
    %c0_31 = arith.constant 0 : index
    %c0_32 = arith.constant 0 : index
    %49 = vector.load %arg8[%c0_31, %c0_32] : memref<1x64xf32, #tpu.memory_space<vmem>>, vector<1x64xf32>
    %50 = vector.broadcast %49 : vector<1x64xf32> to vector<8x64xf32>
    %51 = arith.addf %48, %50 : vector<8x64xf32>
    %cst_33 = arith.constant 0.000000e+00 : f32
    %52 = vector.broadcast %cst_33 : f32 to vector<8x64xf32>
    %53 = arith.maximumf %51, %52 : vector<8x64xf32>
    %54 = vector.broadcast %cst_33 : f32 to vector<8x64xf32>
    %55 = arith.subf %51, %54 : vector<8x64xf32>
    %56 = arith.cmpf one, %55, %55 : vector<8x64xf32>
    %57 = vector.broadcast %cst_33 : f32 to vector<8x64xf32>
    %58 = arith.addf %51, %57 : vector<8x64xf32>
    %59 = math.absf %55 : vector<8x64xf32>
    %cst_34 = arith.constant 0.000000e+00 : f32
    %60 = vector.broadcast %cst_34 : f32 to vector<8x64xf32>
    %61 = arith.subf %60, %59 : vector<8x64xf32>
    %62 = math.exp %61 : vector<8x64xf32>
    %63 = math.log1p %62 : vector<8x64xf32>
    %64 = arith.addf %53, %63 : vector<8x64xf32>
    %65 = arith.select %56, %58, %64 : vector<8x64xi1>, vector<8x64xf32>
    %c0_35 = arith.constant 0 : index
    %c0_36 = arith.constant 0 : index
    %66 = vector.load %arg20[%c0_35, %c0_36] : memref<8x64xf32, #tpu.memory_space<vmem>>, vector<8x64xf32>
    tpu.vector_store %arg20[%c0_35, %c0_36], %65 {strides = array<i32>} : memref<8x64xf32, #tpu.memory_space<vmem>>, vector<8x64xf32>,
    %c0_37 = arith.constant 0 : index
    %c0_38 = arith.constant 0 : index
    %67 = vector.load %arg21[%c0_37, %c0_38] : memref<8x64xf32, #tpu.memory_space<vmem>>, vector<8x64xf32>
    tpu.vector_store %arg21[%c0_37, %c0_38], %40 {strides = array<i32>} : memref<8x64xf32, #tpu.memory_space<vmem>>, vector<8x64xf32>,
    %68 = vector.extract_strided_slice %45 {offsets = [0, 2], sizes = [8, 8], strides = [1, 1]} : vector<8x128xf32> to vector<8x8xf32>
    %c0_39 = arith.constant 0 : index
    %c0_40 = arith.constant 0 : index
    %69 = vector.load %arg22[%c0_39, %c0_40] : memref<8x8xf32, #tpu.memory_space<vmem>>, vector<8x8xf32>
    tpu.vector_store %arg22[%c0_39, %c0_40], %68 {strides = array<i32>} : memref<8x8xf32, #tpu.memory_space<vmem>>, vector<8x8xf32>,
    %70 = vector.extract_strided_slice %45 {offsets = [0, 10], sizes = [8, 8], strides = [1, 1]} : vector<8x128xf32> to vector<8x8xf32>
    %c0_41 = arith.constant 0 : index
    %c0_42 = arith.constant 0 : index
    %71 = vector.load %arg23[%c0_41, %c0_42] : memref<8x8xf32, #tpu.memory_space<vmem>>, vector<8x8xf32>
    tpu.vector_store %arg23[%c0_41, %c0_42], %70 {strides = array<i32>} : memref<8x8xf32, #tpu.memory_space<vmem>>, vector<8x8xf32>,
    %c0_43 = arith.constant 0 : index
    %c0_44 = arith.constant 0 : index
    %72 = vector.load %arg9[%c0_43, %c0_44] : memref<8x64xf32, #tpu.memory_space<vmem>>, vector<8x64xf32>
    %c0_45 = arith.constant 0 : index
    %c0_46 = arith.constant 0 : index
    %73 = vector.load %arg19[%c0_45, %c0_46] : memref<8x64xf32, #tpu.memory_space<vmem>>, vector<8x64xf32>
    %c0_i32_47 = arith.constant 0 : i32
    %c8_i32 = arith.constant 8 : i32
    %74 = arith.muli %c0_i32_47, %c8_i32 : i32
    %75 = tpu.assume_multiple %74, 8 : i32
    %76 = arith.index_cast %75 : i32 to index
    %c0_48 = arith.constant 0 : index
    %77 = vector.load %arg20[%76, %c0_48] : memref<8x64xf32, #tpu.memory_space<vmem>>, vector<8x64xf32>
    %78 = arith.index_cast %75 : i32 to index
    %c0_49 = arith.constant 0 : index
    %79 = vector.load %arg21[%78, %c0_49] : memref<8x64xf32, #tpu.memory_space<vmem>>, vector<8x64xf32>
    %80 = vector.shape_cast %77 : vector<8x64xf32> to vector<8x1x64xf32>
    %81 = vector.shape_cast %72 : vector<8x64xf32> to vector<1x8x64xf32>
    %82 = vector.broadcast %80 : vector<8x1x64xf32> to vector<8x8x64xf32>
    %83 = vector.broadcast %81 : vector<1x8x64xf32> to vector<8x8x64xf32>
    %84 = arith.mulf %82, %83 : vector<8x8x64xf32>
    %85 = math.exp %84 : vector<8x8x64xf32>
    %86 = arith.mulf %77, %79 : vector<8x64xf32>
    %87 = arith.index_cast %75 : i32 to index
    %c0_50 = arith.constant 0 : index
    %88 = vector.load %arg22[%87, %c0_50] : memref<8x8xf32, #tpu.memory_space<vmem>>, vector<8x8xf32>
    %89 = tpu.transpose %88, [1, 0] : vector<8x8xf32> -> vector<8x8xf32>
    %90 = arith.index_cast %75 : i32 to index
    %c0_51 = arith.constant 0 : index
    %91 = vector.load %arg23[%90, %c0_51] : memref<8x8xf32, #tpu.memory_space<vmem>>, vector<8x8xf32>
    %92 = tpu.transpose %91, [1, 0] : vector<8x8xf32> -> vector<8x8xf32>
    %93 = vector.extract_strided_slice %85 {offsets = [0, 0, 0], sizes = [1, 8, 64], strides = [1, 1, 1]} : vector<8x8x64xf32> to vector<1x8x64xf32>
    %94 = vector.shape_cast %93 : vector<1x8x64xf32> to vector<8x64xf32>
    %95 = arith.mulf %73, %94 : vector<8x64xf32>
    %96 = vector.extract_strided_slice %89 {offsets = [0, 0], sizes = [8, 1], strides = [1, 1]} : vector<8x8xf32> to vector<8x1xf32>
    %97 = vector.extract_strided_slice %86 {offsets = [0, 0], sizes = [1, 64], strides = [1, 1]} : vector<8x64xf32> to vector<1x64xf32>
    %98 = vector.broadcast %96 : vector<8x1xf32> to vector<8x64xf32>
    %99 = vector.broadcast %97 : vector<1x64xf32> to vector<8x64xf32>
    %100 = arith.mulf %98, %99 : vector<8x64xf32>
    %101 = arith.addf %95, %100 : vector<8x64xf32>
    %102 = vector.extract_strided_slice %92 {offsets = [0, 0], sizes = [8, 1], strides = [1, 1]} : vector<8x8xf32> to vector<8x1xf32>
    %103 = vector.broadcast %102 : vector<8x1xf32> to vector<8x64xf32>
    %104 = arith.mulf %101, %103 : vector<8x64xf32>
    %cst_52 = arith.constant dense<0.000000e+00> : vector<64xf32>
    %105 = vector.multi_reduction <add>, %104, %cst_52 [0] : vector<8x64xf32> to vector<64xf32>
    %106 = vector.shape_cast %105 : vector<64xf32> to vector<1x64xf32>
    %107 = vector.extract_strided_slice %85 {offsets = [1, 0, 0], sizes = [1, 8, 64], strides = [1, 1, 1]} : vector<8x8x64xf32> to vector<1x8x64xf32>
    %108 = vector.shape_cast %107 : vector<1x8x64xf32> to vector<8x64xf32>
    %109 = arith.mulf %101, %108 : vector<8x64xf32>
    %110 = vector.extract_strided_slice %89 {offsets = [0, 1], sizes = [8, 1], strides = [1, 1]} : vector<8x8xf32> to vector<8x1xf32>
    %111 = vector.extract_strided_slice %86 {offsets = [1, 0], sizes = [1, 64], strides = [1, 1]} : vector<8x64xf32> to vector<1x64xf32>
    %112 = vector.broadcast %110 : vector<8x1xf32> to vector<8x64xf32>
    %113 = vector.broadcast %111 : vector<1x64xf32> to vector<8x64xf32>
    %114 = arith.mulf %112, %113 : vector<8x64xf32>
    %115 = arith.addf %109, %114 : vector<8x64xf32>
    %116 = vector.extract_strided_slice %92 {offsets = [0, 1], sizes = [8, 1], strides = [1, 1]} : vector<8x8xf32> to vector<8x1xf32>
    %117 = vector.broadcast %116 : vector<8x1xf32> to vector<8x64xf32>
    %118 = arith.mulf %115, %117 : vector<8x64xf32>
    %cst_53 = arith.constant dense<0.000000e+00> : vector<64xf32>
    %119 = vector.multi_reduction <add>, %118, %cst_53 [0] : vector<8x64xf32> to vector<64xf32>
    %120 = vector.shape_cast %119 : vector<64xf32> to vector<1x64xf32>
    %121 = vector.extract_strided_slice %85 {offsets = [2, 0, 0], sizes = [1, 8, 64], strides = [1, 1, 1]} : vector<8x8x64xf32> to vector<1x8x64xf32>
    %122 = vector.shape_cast %121 : vector<1x8x64xf32> to vector<8x64xf32>
    %123 = arith.mulf %115, %122 : vector<8x64xf32>
    %124 = vector.extract_strided_slice %89 {offsets = [0, 2], sizes = [8, 1], strides = [1, 1]} : vector<8x8xf32> to vector<8x1xf32>
    %125 = vector.extract_strided_slice %86 {offsets = [2, 0], sizes = [1, 64], strides = [1, 1]} : vector<8x64xf32> to vector<1x64xf32>
    %126 = vector.broadcast %124 : vector<8x1xf32> to vector<8x64xf32>
    %127 = vector.broadcast %125 : vector<1x64xf32> to vector<8x64xf32>
    %128 = arith.mulf %126, %127 : vector<8x64xf32>
    %129 = arith.addf %123, %128 : vector<8x64xf32>
    %130 = vector.extract_strided_slice %92 {offsets = [0, 2], sizes = [8, 1], strides = [1, 1]} : vector<8x8xf32> to vector<8x1xf32>
    %131 = vector.broadcast %130 : vector<8x1xf32> to vector<8x64xf32>
    %132 = arith.mulf %129, %131 : vector<8x64xf32>
    %cst_54 = arith.constant dense<0.000000e+00> : vector<64xf32>
    %133 = vector.multi_reduction <add>, %132, %cst_54 [0] : vector<8x64xf32> to vector<64xf32>
    %134 = vector.shape_cast %133 : vector<64xf32> to vector<1x64xf32>
    %135 = vector.extract_strided_slice %85 {offsets = [3, 0, 0], sizes = [1, 8, 64], strides = [1, 1, 1]} : vector<8x8x64xf32> to vector<1x8x64xf32>
    %136 = vector.shape_cast %135 : vector<1x8x64xf32> to vector<8x64xf32>
    %137 = arith.mulf %129, %136 : vector<8x64xf32>
    %138 = vector.extract_strided_slice %89 {offsets = [0, 3], sizes = [8, 1], strides = [1, 1]} : vector<8x8xf32> to vector<8x1xf32>
    %139 = vector.extract_strided_slice %86 {offsets = [3, 0], sizes = [1, 64], strides = [1, 1]} : vector<8x64xf32> to vector<1x64xf32>
    %140 = vector.broadcast %138 : vector<8x1xf32> to vector<8x64xf32>
    %141 = vector.broadcast %139 : vector<1x64xf32> to vector<8x64xf32>
    %142 = arith.mulf %140, %141 : vector<8x64xf32>
    %143 = arith.addf %137, %142 : vector<8x64xf32>
    %144 = vector.extract_strided_slice %92 {offsets = [0, 3], sizes = [8, 1], strides = [1, 1]} : vector<8x8xf32> to vector<8x1xf32>
    %145 = vector.broadcast %144 : vector<8x1xf32> to vector<8x64xf32>
    %146 = arith.mulf %143, %145 : vector<8x64xf32>
    %cst_55 = arith.constant dense<0.000000e+00> : vector<64xf32>
    %147 = vector.multi_reduction <add>, %146, %cst_55 [0] : vector<8x64xf32> to vector<64xf32>
    %148 = vector.shape_cast %147 : vector<64xf32> to vector<1x64xf32>
    %149 = vector.extract_strided_slice %85 {offsets = [4, 0, 0], sizes = [1, 8, 64], strides = [1, 1, 1]} : vector<8x8x64xf32> to vector<1x8x64xf32>
    %150 = vector.shape_cast %149 : vector<1x8x64xf32> to vector<8x64xf32>
    %151 = arith.mulf %143, %150 : vector<8x64xf32>
    %152 = vector.extract_strided_slice %89 {offsets = [0, 4], sizes = [8, 1], strides = [1, 1]} : vector<8x8xf32> to vector<8x1xf32>
    %153 = vector.extract_strided_slice %86 {offsets = [4, 0], sizes = [1, 64], strides = [1, 1]} : vector<8x64xf32> to vector<1x64xf32>
    %154 = vector.broadcast %152 : vector<8x1xf32> to vector<8x64xf32>
    %155 = vector.broadcast %153 : vector<1x64xf32> to vector<8x64xf32>
    %156 = arith.mulf %154, %155 : vector<8x64xf32>
    %157 = arith.addf %151, %156 : vector<8x64xf32>
    %158 = vector.extract_strided_slice %92 {offsets = [0, 4], sizes = [8, 1], strides = [1, 1]} : vector<8x8xf32> to vector<8x1xf32>
    %159 = vector.broadcast %158 : vector<8x1xf32> to vector<8x64xf32>
    %160 = arith.mulf %157, %159 : vector<8x64xf32>
    %cst_56 = arith.constant dense<0.000000e+00> : vector<64xf32>
    %161 = vector.multi_reduction <add>, %160, %cst_56 [0] : vector<8x64xf32> to vector<64xf32>
    %162 = vector.shape_cast %161 : vector<64xf32> to vector<1x64xf32>
    %163 = vector.extract_strided_slice %85 {offsets = [5, 0, 0], sizes = [1, 8, 64], strides = [1, 1, 1]} : vector<8x8x64xf32> to vector<1x8x64xf32>
    %164 = vector.shape_cast %163 : vector<1x8x64xf32> to vector<8x64xf32>
    %165 = arith.mulf %157, %164 : vector<8x64xf32>
    %166 = vector.extract_strided_slice %89 {offsets = [0, 5], sizes = [8, 1], strides = [1, 1]} : vector<8x8xf32> to vector<8x1xf32>
    %167 = vector.extract_strided_slice %86 {offsets = [5, 0], sizes = [1, 64], strides = [1, 1]} : vector<8x64xf32> to vector<1x64xf32>
    %168 = vector.broadcast %166 : vector<8x1xf32> to vector<8x64xf32>
    %169 = vector.broadcast %167 : vector<1x64xf32> to vector<8x64xf32>
    %170 = arith.mulf %168, %169 : vector<8x64xf32>
    %171 = arith.addf %165, %170 : vector<8x64xf32>
    %172 = vector.extract_strided_slice %92 {offsets = [0, 5], sizes = [8, 1], strides = [1, 1]} : vector<8x8xf32> to vector<8x1xf32>
    %173 = vector.broadcast %172 : vector<8x1xf32> to vector<8x64xf32>
    %174 = arith.mulf %171, %173 : vector<8x64xf32>
    %cst_57 = arith.constant dense<0.000000e+00> : vector<64xf32>
    %175 = vector.multi_reduction <add>, %174, %cst_57 [0] : vector<8x64xf32> to vector<64xf32>
    %176 = vector.shape_cast %175 : vector<64xf32> to vector<1x64xf32>
    %177 = vector.extract_strided_slice %85 {offsets = [6, 0, 0], sizes = [1, 8, 64], strides = [1, 1, 1]} : vector<8x8x64xf32> to vector<1x8x64xf32>
    %178 = vector.shape_cast %177 : vector<1x8x64xf32> to vector<8x64xf32>
    %179 = arith.mulf %171, %178 : vector<8x64xf32>
    %180 = vector.extract_strided_slice %89 {offsets = [0, 6], sizes = [8, 1], strides = [1, 1]} : vector<8x8xf32> to vector<8x1xf32>
    %181 = vector.extract_strided_slice %86 {offsets = [6, 0], sizes = [1, 64], strides = [1, 1]} : vector<8x64xf32> to vector<1x64xf32>
    %182 = vector.broadcast %180 : vector<8x1xf32> to vector<8x64xf32>
    %183 = vector.broadcast %181 : vector<1x64xf32> to vector<8x64xf32>
    %184 = arith.mulf %182, %183 : vector<8x64xf32>
    %185 = arith.addf %179, %184 : vector<8x64xf32>
    %186 = vector.extract_strided_slice %92 {offsets = [0, 6], sizes = [8, 1], strides = [1, 1]} : vector<8x8xf32> to vector<8x1xf32>
    %187 = vector.broadcast %186 : vector<8x1xf32> to vector<8x64xf32>
    %188 = arith.mulf %185, %187 : vector<8x64xf32>
    %cst_58 = arith.constant dense<0.000000e+00> : vector<64xf32>
    %189 = vector.multi_reduction <add>, %188, %cst_58 [0] : vector<8x64xf32> to vector<64xf32>
    %190 = vector.shape_cast %189 : vector<64xf32> to vector<1x64xf32>
    %191 = vector.extract_strided_slice %85 {offsets = [7, 0, 0], sizes = [1, 8, 64], strides = [1, 1, 1]} : vector<8x8x64xf32> to vector<1x8x64xf32>
    %192 = vector.shape_cast %191 : vector<1x8x64xf32> to vector<8x64xf32>
    %193 = arith.mulf %185, %192 : vector<8x64xf32>
    %194 = vector.extract_strided_slice %89 {offsets = [0, 7], sizes = [8, 1], strides = [1, 1]} : vector<8x8xf32> to vector<8x1xf32>
    %195 = vector.extract_strided_slice %86 {offsets = [7, 0], sizes = [1, 64], strides = [1, 1]} : vector<8x64xf32> to vector<1x64xf32>
    %196 = vector.broadcast %194 : vector<8x1xf32> to vector<8x64xf32>
    %197 = vector.broadcast %195 : vector<1x64xf32> to vector<8x64xf32>
    %198 = arith.mulf %196, %197 : vector<8x64xf32>
    %199 = arith.addf %193, %198 : vector<8x64xf32>
    %200 = vector.extract_strided_slice %92 {offsets = [0, 7], sizes = [8, 1], strides = [1, 1]} : vector<8x8xf32> to vector<8x1xf32>
    %201 = vector.broadcast %200 : vector<8x1xf32> to vector<8x64xf32>
    %202 = arith.mulf %199, %201 : vector<8x64xf32>
    %cst_59 = arith.constant dense<0.000000e+00> : vector<64xf32>
    %203 = vector.multi_reduction <add>, %202, %cst_59 [0] : vector<8x64xf32> to vector<64xf32>
    %204 = vector.shape_cast %203 : vector<64xf32> to vector<1x64xf32>
    %205 = tpu.concatenate %106, %120, %134, %148, %162, %176, %190, %204 in 0 : vector<1x64xf32>, vector<1x64xf32>, vector<1x64xf32>, vector<1x64xf32>, vector<1x64xf32>, vector<1x64xf32>, vector<1x64xf32>, vector<1x64xf32> -> vector<8x64xf32>
    %206 = arith.index_cast %75 : i32 to index
    %c0_60 = arith.constant 0 : index
    %207 = vector.load %arg24[%206, %c0_60] : memref<8x64xf32, #tpu.memory_space<vmem>>, vector<8x64xf32>
    tpu.vector_store %arg24[%206, %c0_60], %205 {strides = array<i32>} : memref<8x64xf32, #tpu.memory_space<vmem>>, vector<8x64xf32>,
    %c1_i32 = arith.constant 1 : i32
    %c0_61 = arith.constant 0 : index
    %c0_62 = arith.constant 0 : index
    %208 = vector.load %arg19[%c0_61, %c0_62] : memref<8x64xf32, #tpu.memory_space<vmem>>, vector<8x64xf32>
    tpu.vector_store %arg19[%c0_61, %c0_62], %199 {strides = array<i32>} : memref<8x64xf32, #tpu.memory_space<vmem>>, vector<8x64xf32>,
    %c0_63 = arith.constant 0 : index
    %c0_64 = arith.constant 0 : index
    %209 = vector.load %arg24[%c0_63, %c0_64] : memref<8x64xf32, #tpu.memory_space<vmem>>, vector<8x64xf32>
    %c0_65 = arith.constant 0 : index
    %c0_66 = arith.constant 0 : index
    %210 = vector.load %arg21[%c0_65, %c0_66] : memref<8x64xf32, #tpu.memory_space<vmem>>, vector<8x64xf32>
    %c0_67 = arith.constant 0 : index
    %c0_68 = arith.constant 0 : index
    %211 = vector.load %arg10[%c0_67, %c0_68] : memref<1x64xf32, #tpu.memory_space<vmem>>, vector<1x64xf32>
    %212 = vector.broadcast %211 : vector<1x64xf32> to vector<8x64xf32>
    %213 = arith.mulf %210, %212 : vector<8x64xf32>
    %214 = arith.addf %209, %213 : vector<8x64xf32>
    %215 = arith.negf %9 : vector<8x64xf32>
    %216 = math.exp %215 : vector<8x64xf32>
    %cst_69 = arith.constant 1.000000e+00 : f32
    %217 = vector.broadcast %cst_69 : f32 to vector<8x64xf32>
    %218 = arith.addf %217, %216 : vector<8x64xf32>
    %219 = arith.divf %217, %218 : vector<8x64xf32>
    %220 = arith.mulf %9, %219 : vector<8x64xf32>
    %221 = arith.mulf %214, %220 : vector<8x64xf32>
    %222 = arith.truncf %221 : vector<8x64xf32> to vector<8x64xbf16>
    %c0_70 = arith.constant 0 : index
    %c0_71 = arith.constant 0 : index
    %223 = vector.load %arg11[%c0_70, %c0_71] : memref<64x32xbf16, #tpu.memory_space<vmem>>, vector<64x32xbf16>
    %cst_72 = arith.constant dense<0.000000e+00> : vector<8x32xf32>
    %224 = tpu.matmul %222, %223, %cst_72 {dimension_numbers = #tpu.dot_dimension_numbers<[1], [0], [0], [1], [0, 0, 1, 1], [], []>} : vector<8x64xbf16>, vector<64x32xbf16>, vector<8x32xf32> -> vector<8x32xf32>
    %225 = arith.addf %224, %4 : vector<8x32xf32>
    %c0_73 = arith.constant 0 : index
    %c0_74 = arith.constant 0 : index
    %226 = vector.load %arg12[%c0_73, %c0_74] : memref<1x32xf32, #tpu.memory_space<vmem>>, vector<1x32xf32>
    %227 = arith.mulf %225, %225 : vector<8x32xf32>
    %cst_75 = arith.constant dense<0.000000e+00> : vector<8xf32>
    %228 = vector.multi_reduction <add>, %227, %cst_75 [1] : vector<8x32xf32> to vector<8xf32>
    %229 = vector.shape_cast %228 : vector<8xf32> to vector<8x1xf32>
    %cst_76 = arith.constant 3.200000e+01 : f32
    %230 = vector.broadcast %cst_76 : f32 to vector<8x1xf32>
    %231 = arith.divf %229, %230 : vector<8x1xf32>
    %cst_77 = arith.constant 9.99999974E-6 : f32
    %232 = vector.broadcast %cst_77 : f32 to vector<8x1xf32>
    %233 = arith.addf %231, %232 : vector<8x1xf32>
    %234 = math.rsqrt %233 : vector<8x1xf32>
    %235 = vector.broadcast %234 : vector<8x1xf32> to vector<8x32xf32>
    %236 = arith.mulf %225, %235 : vector<8x32xf32>
    %237 = vector.broadcast %226 : vector<1x32xf32> to vector<8x32xf32>
    %238 = arith.mulf %236, %237 : vector<8x32xf32>
    %239 = arith.truncf %238 : vector<8x32xf32> to vector<8x32xbf16>
    %c0_78 = arith.constant 0 : index
    %c0_79 = arith.constant 0 : index
    %240 = vector.load %arg13[%c0_78, %c0_79] : memref<32x256xbf16, #tpu.memory_space<vmem>>, vector<32x256xbf16>
    %cst_80 = arith.constant dense<0.000000e+00> : vector<8x256xf32>
    %241 = tpu.matmul %239, %240, %cst_80 {dimension_numbers = #tpu.dot_dimension_numbers<[1], [0], [0], [1], [0, 0, 1, 1], [], []>} : vector<8x32xbf16>, vector<32x256xbf16>, vector<8x256xf32> -> vector<8x256xf32>
    %242 = vector.extract_strided_slice %241 {offsets = [0, 0], sizes = [8, 128], strides = [1, 1]} : vector<8x256xf32> to vector<8x128xf32>
    %243 = vector.extract_strided_slice %241 {offsets = [0, 128], sizes = [8, 128], strides = [1, 1]} : vector<8x256xf32> to vector<8x128xf32>
    %244 = arith.negf %243 : vector<8x128xf32>
    %245 = math.exp %244 : vector<8x128xf32>
    %cst_81 = arith.constant 1.000000e+00 : f32
    %246 = vector.broadcast %cst_81 : f32 to vector<8x128xf32>
    %247 = arith.addf %246, %245 : vector<8x128xf32>
    %248 = arith.divf %246, %247 : vector<8x128xf32>
    %249 = arith.mulf %243, %248 : vector<8x128xf32>
    %250 = arith.mulf %242, %249 : vector<8x128xf32>
    %251 = arith.truncf %250 : vector<8x128xf32> to vector<8x128xbf16>
    %c0_82 = arith.constant 0 : index
    %c0_83 = arith.constant 0 : index
    %252 = vector.load %arg14[%c0_82, %c0_83] : memref<128x32xbf16, #tpu.memory_space<vmem>>, vector<128x32xbf16>
    %cst_84 = arith.constant dense<0.000000e+00> : vector<8x32xf32>
    %253 = tpu.matmul %251, %252, %cst_84 {dimension_numbers = #tpu.dot_dimension_numbers<[1], [0], [0], [1], [0, 0, 1, 1], [], []>} : vector<8x128xbf16>, vector<128x32xbf16>, vector<8x32xf32> -> vector<8x32xf32>
    %254 = arith.addf %253, %238 : vector<8x32xf32>
    %c0_85 = arith.constant 0 : index
    %c0_86 = arith.constant 0 : index
    %255 = vector.load %arg15[%c0_85, %c0_86] : memref<1x32xf32, #tpu.memory_space<vmem>>, vector<1x32xf32>
    %256 = arith.mulf %254, %254 : vector<8x32xf32>
    %cst_87 = arith.constant dense<0.000000e+00> : vector<8xf32>
    %257 = vector.multi_reduction <add>, %256, %cst_87 [1] : vector<8x32xf32> to vector<8xf32>
    %258 = vector.shape_cast %257 : vector<8xf32> to vector<8x1xf32>
    %cst_88 = arith.constant 3.200000e+01 : f32
    %259 = vector.broadcast %cst_88 : f32 to vector<8x1xf32>
    %260 = arith.divf %258, %259 : vector<8x1xf32>
    %cst_89 = arith.constant 9.99999974E-6 : f32
    %261 = vector.broadcast %cst_89 : f32 to vector<8x1xf32>
    %262 = arith.addf %260, %261 : vector<8x1xf32>
    %263 = math.rsqrt %262 : vector<8x1xf32>
    %264 = vector.broadcast %263 : vector<8x1xf32> to vector<8x32xf32>
    %265 = arith.mulf %254, %264 : vector<8x32xf32>
    %266 = vector.broadcast %255 : vector<1x32xf32> to vector<8x32xf32>
    %267 = arith.mulf %265, %266 : vector<8x32xf32>
    %c0_90 = arith.constant 0 : index
    %c0_91 = arith.constant 0 : index
    %c0_92 = arith.constant 0 : index
    %268 = vector.load %arg16[%c0_90, %c0_91, %c0_92] : memref<1x8x32xf32, #tpu.memory_space<vmem>>, vector<1x8x32xf32>
    %269 = vector.shape_cast %268 : vector<1x8x32xf32> to vector<8x32xf32>
    %270 = vector.shape_cast %267 : vector<8x32xf32> to vector<1x8x32xf32>
    tpu.vector_store %arg16[%c0_90, %c0_91, %c0_92], %270 {strides = array<i32>} : memref<1x8x32xf32, #tpu.memory_space<vmem>>, vector<1x8x32xf32>,
    return
  }
  func.func @transform_0(%arg0: i32, %arg1: i32) -> (i32, i32, i32) {
    %c0_i32 = arith.constant 0 : i32
    %c0_i32_0 = arith.constant 0 : i32
    return %arg0, %arg1, %c0_i32 : i32, i32, i32
  }
  func.func @transform_1(%arg0: i32, %arg1: i32) -> (i32, i32) {
    %c0_i32 = arith.constant 0 : i32
    %c0_i32_0 = arith.constant 0 : i32
    %c0_i32_1 = arith.constant 0 : i32
    return %c0_i32, %c0_i32_0 : i32, i32
  }
  func.func @transform_2(%arg0: i32, %arg1: i32) -> (i32, i32) {
    %c0_i32 = arith.constant 0 : i32
    %c0_i32_0 = arith.constant 0 : i32
    %c0_i32_1 = arith.constant 0 : i32
    return %c0_i32, %c0_i32_0 : i32, i32
  }
  func.func @transform_3(%arg0: i32, %arg1: i32) -> (i32, i32) {
    %c0_i32 = arith.constant 0 : i32
    %c0_i32_0 = arith.constant 0 : i32
    %c0_i32_1 = arith.constant 0 : i32
    return %c0_i32, %c0_i32_0 : i32, i32
  }
  func.func @transform_4(%arg0: i32, %arg1: i32) -> (i32, i32) {
    %c0_i32 = arith.constant 0 : i32
    %c0_i32_0 = arith.constant 0 : i32
    %c0_i32_1 = arith.constant 0 : i32
    return %c0_i32, %c0_i32_0 : i32, i32
  }
  func.func @transform_5(%arg0: i32, %arg1: i32) -> (i32, i32) {
    %c0_i32 = arith.constant 0 : i32
    %c0_i32_0 = arith.constant 0 : i32
    %c0_i32_1 = arith.constant 0 : i32
    return %c0_i32, %c0_i32_0 : i32, i32
  }
  func.func @transform_6(%arg0: i32, %arg1: i32) -> (i32, i32) {
    %c0_i32 = arith.constant 0 : i32
    %c0_i32_0 = arith.constant 0 : i32
    %c0_i32_1 = arith.constant 0 : i32
    return %c0_i32, %c0_i32_0 : i32, i32
  }
  func.func @transform_7(%arg0: i32, %arg1: i32) -> (i32, i32) {
    %c0_i32 = arith.constant 0 : i32
    %c0_i32_0 = arith.constant 0 : i32
    %c0_i32_1 = arith.constant 0 : i32
    return %c0_i32, %c0_i32_0 : i32, i32
  }
  func.func @transform_8(%arg0: i32, %arg1: i32) -> (i32, i32) {
    %c0_i32 = arith.constant 0 : i32
    %c0_i32_0 = arith.constant 0 : i32
    %c0_i32_1 = arith.constant 0 : i32
    return %c0_i32, %c0_i32_0 : i32, i32
  }
  func.func @transform_9(%arg0: i32, %arg1: i32) -> (i32, i32) {
    %c0_i32 = arith.constant 0 : i32
    %c0_i32_0 = arith.constant 0 : i32
    %c0_i32_1 = arith.constant 0 : i32
    return %c0_i32, %c0_i32_0 : i32, i32
  }
  func.func @transform_10(%arg0: i32, %arg1: i32) -> (i32, i32) {
    %c0_i32 = arith.constant 0 : i32
    %c0_i32_0 = arith.constant 0 : i32
    %c0_i32_1 = arith.constant 0 : i32
    return %c0_i32, %c0_i32_0 : i32, i32
  }
  func.func @transform_11(%arg0: i32, %arg1: i32) -> (i32, i32) {
    %c0_i32 = arith.constant 0 : i32
    %c0_i32_0 = arith.constant 0 : i32
    %c0_i32_1 = arith.constant 0 : i32
    return %c0_i32, %c0_i32_0 : i32, i32
  }
  func.func @transform_12(%arg0: i32, %arg1: i32) -> (i32, i32) {
    %c0_i32 = arith.constant 0 : i32
    %c0_i32_0 = arith.constant 0 : i32
    %c0_i32_1 = arith.constant 0 : i32
    return %c0_i32, %c0_i32_0 : i32, i32
  }
  func.func @transform_13(%arg0: i32, %arg1: i32) -> (i32, i32) {
    %c0_i32 = arith.constant 0 : i32
    %c0_i32_0 = arith.constant 0 : i32
    %c0_i32_1 = arith.constant 0 : i32
    return %c0_i32, %c0_i32_0 : i32, i32
  }
  func.func @transform_14(%arg0: i32, %arg1: i32) -> (i32, i32, i32) {
    %c0_i32 = arith.constant 0 : i32
    %c0_i32_0 = arith.constant 0 : i32
    return %arg0, %arg1, %c0_i32 : i32, i32, i32
  }
}

module attributes {stable_mosaic.version = 11 : i64} {
  func.func @mamba_block_kernel(%arg0: i32, %arg1: i32, %arg2: memref<1x8x32xf32, #tpu.memory_space<vmem>>, %arg3: memref<32x128xbf16, #tpu.memory_space<vmem>>, %arg4: memref<4x64xf32, #tpu.memory_space<vmem>>, %arg5: memref<1x64xf32, #tpu.memory_space<vmem>>, %arg6: memref<64x128xbf16, #tpu.memory_space<vmem>>, %arg7: memref<128x64xbf16, #tpu.memory_space<vmem>>, %arg8: memref<1x64xf32, #tpu.memory_space<vmem>>, %arg9: memref<8x64xf32, #tpu.memory_space<vmem>>, %arg10: memref<1x64xf32, #tpu.memory_space<vmem>>, %arg11: memref<64x32xbf16, #tpu.memory_space<vmem>>, %arg12: memref<1x32xf32, #tpu.memory_space<vmem>>, %arg13: memref<32x256xbf16, #tpu.memory_space<vmem>>, %arg14: memref<128x32xbf16, #tpu.memory_space<vmem>>, %arg15: memref<1x32xf32, #tpu.memory_space<vmem>>, %arg16: memref<1x8x32xf32, #tpu.memory_space<vmem>>, %arg17: memref<16x64xf32, #tpu.memory_space<vmem>>, %arg18: memref<3x64xf32, #tpu.memory_space<vmem>>, %arg19: memref<8x64xf32, #tpu.memory_space<vmem>>, %arg20: memref<8x64xf32, #tpu.memory_space<vmem>>, %arg21: memref<8x64xf32, #tpu.memory_space<vmem>>, %arg22: memref<8x8xf32, #tpu.memory_space<vmem>>, %arg23: memref<8x8xf32, #tpu.memory_space<vmem>>, %arg24: memref<8x64xf32, #tpu.memory_space<vmem>>) attributes {dimension_semantics = [#tpu.dimension_semantics<parallel>, #tpu.dimension_semantics<arbitrary>], iteration_bounds = array<i64: 2, 1>, scalar_prefetch = 0 : i64, scratch_operands = 8 : i64, tpu.core_type = #tpu.core_type<tc>, window_params = [{transform_indices = @transform_0, window_bounds = array<i64: 1, 8, 32>}, {pipeline_mode = #tpu.pipeline_mode<synchronous>, transform_indices = @transform_1, window_bounds = array<i64: 32, 128>}, {pipeline_mode = #tpu.pipeline_mode<synchronous>, transform_indices = @transform_2, window_bounds = array<i64: 4, 64>}, {pipeline_mode = #tpu.pipeline_mode<synchronous>, transform_indices = @transform_3, window_bounds = array<i64: 1, 64>}, {pipeline_mode = #tpu.pipeline_mode<synchronous>, transform_indices = @transform_4, window_bounds = array<i64: 64, 128>}, {pipeline_mode = #tpu.pipeline_mode<synchronous>, transform_indices = @transform_5, window_bounds = array<i64: 128, 64>}, {pipeline_mode = #tpu.pipeline_mode<synchronous>, transform_indices = @transform_6, window_bounds = array<i64: 1, 64>}, {pipeline_mode = #tpu.pipeline_mode<synchronous>, transform_indices = @transform_7, window_bounds = array<i64: 8, 64>}, {pipeline_mode = #tpu.pipeline_mode<synchronous>, transform_indices = @transform_8, window_bounds = array<i64: 1, 64>}, {pipeline_mode = #tpu.pipeline_mode<synchronous>, transform_indices = @transform_9, window_bounds = array<i64: 64, 32>}, {pipeline_mode = #tpu.pipeline_mode<synchronous>, transform_indices = @transform_10, window_bounds = array<i64: 1, 32>}, {pipeline_mode = #tpu.pipeline_mode<synchronous>, transform_indices = @transform_11, window_bounds = array<i64: 32, 256>}, {pipeline_mode = #tpu.pipeline_mode<synchronous>, transform_indices = @transform_12, window_bounds = array<i64: 128, 32>}, {pipeline_mode = #tpu.pipeline_mode<synchronous>, transform_indices = @transform_13, window_bounds = array<i64: 1, 32>}, {transform_indices = @transform_14, window_bounds = array<i64: 1, 8, 32>}]} {
    %c0_i32 = arith.constant 0 : i32
    %0 = arith.cmpi eq, %arg1, %c0_i32 : i32
    %1 = arith.extui %0 : i1 to i32
    %c0_i32_0 = arith.constant 0 : i32
    %2 = arith.cmpi ne, %1, %c0_i32_0 : i32
    scf.if %2 {
      %cst_93 = arith.constant 0.000000e+00 : f32
      %271 = vector.broadcast %cst_93 : f32 to vector<3x64xf32>
      %c0_94 = arith.constant 0 : index
      %c0_95 = arith.constant 0 : index
      %272 = vector.load %arg18[%c0_94, %c0_95] : memref<3x64xf32, #tpu.memory_space<vmem>>, vector<3x64xf32>
      tpu.vector_store %arg18[%c0_94, %c0_95], %271 {strides = array<i32>} : memref<3x64xf32, #tpu.memory_space<vmem>>, vector<3x64xf32>,
      %cst_96 = arith.constant 0.000000e+00 : f32
      %273 = vector.broadcast %cst_96 : f32 to vector<8x64xf32>
      %c0_97 = arith.constant 0 : index
      %c0_98 = arith.constant 0 : index
      %274 = vector.load %arg19[%c0_97, %c0_98] : memref<8x64xf32, #tpu.memory_space<vmem>>, vector<8x64xf32>
      tpu.vector_store %arg19[%c0_97, %c0_98], %273 {strides = array<i32>} : memref<8x64xf32, #tpu.memory_space<vmem>>, vector<8x64xf32>,
    } else {
    }
    %c0 = arith.constant 0 : index
    %c0_1 = arith.constant 0 : index
    %c0_2 = arith.constant 0 : index
    %3 = vector.load %arg2[%c0, %c0_1, %c0_2] : memref<1x8x32xf32, #tpu.memory_space<vmem>>, vector<1x8x32xf32>
    %4 = vector.shape_cast %3 : vector<1x8x32xf32> to vector<8x32xf32>
    %5 = arith.truncf %4 : vector<8x32xf32> to vector<8x32xbf16>
    %c0_3 = arith.constant 0 : index
    %c0_4 = arith.constant 0 : index
    %6 = vector.load %arg3[%c0_3, %c0_4] : memref<32x128xbf16, #tpu.memory_space<vmem>>, vector<32x128xbf16>
    %cst = arith.constant dense<0.000000e+00> : vector<8x128xf32>
    %7 = tpu.matmul %5, %6, %cst {dimension_numbers = #tpu.dot_dimension_numbers<[1], [0], [0], [1], [0, 0, 1, 1], [], []>} : vector<8x32xbf16>, vector<32x128xbf16>, vector<8x128xf32> -> vector<8x128xf32>
    %8 = vector.extract_strided_slice %7 {offsets = [0, 0], sizes = [8, 64], strides = [1, 1]} : vector<8x128xf32> to vector<8x64xf32>
    %9 = vector.extract_strided_slice %7 {offsets = [0, 64], sizes = [8, 64], strides = [1, 1]} : vector<8x128xf32> to vector<8x64xf32>
    %c0_5 = arith.constant 0 : index
    %c0_6 = arith.constant 0 : index
    %10 = vector.load %arg18[%c0_5, %c0_6] : memref<3x64xf32, #tpu.memory_space<vmem>>, vector<3x64xf32>
    %c5 = arith.constant 5 : index
    %c0_7 = arith.constant 0 : index
    %11 = vector.load %arg17[%c5, %c0_7] : memref<16x64xf32, #tpu.memory_space<vmem>>, vector<3x64xf32>
    tpu.vector_store %arg17[%c5, %c0_7], %10 {strides = array<i32>} : memref<16x64xf32, #tpu.memory_space<vmem>>, vector<3x64xf32>,
    %c8 = arith.constant 8 : index
    %c0_8 = arith.constant 0 : index
    %12 = vector.load %arg17[%c8, %c0_8] : memref<16x64xf32, #tpu.memory_space<vmem>>, vector<8x64xf32>
    tpu.vector_store %arg17[%c8, %c0_8], %8 {strides = array<i32>} : memref<16x64xf32, #tpu.memory_space<vmem>>, vector<8x64xf32>,
    %c0_9 = arith.constant 0 : index
    %c0_10 = arith.constant 0 : index
    %13 = vector.load %arg5[%c0_9, %c0_10] : memref<1x64xf32, #tpu.memory_space<vmem>>, vector<1x64xf32>
    %c5_11 = arith.constant 5 : index
    %c0_12 = arith.constant 0 : index
    %14 = vector.load %arg17[%c5_11, %c0_12] : memref<16x64xf32, #tpu.memory_space<vmem>>, vector<8x64xf32>
    %c0_13 = arith.constant 0 : index
    %c0_14 = arith.constant 0 : index
    %15 = vector.load %arg4[%c0_13, %c0_14] : memref<4x64xf32, #tpu.memory_space<vmem>>, vector<1x64xf32>
    %16 = vector.broadcast %15 : vector<1x64xf32> to vector<8x64xf32>
    %17 = arith.mulf %14, %16 : vector<8x64xf32>
    %18 = vector.broadcast %13 : vector<1x64xf32> to vector<8x64xf32>
    %19 = arith.addf %18, %17 : vector<8x64xf32>
    %c6 = arith.constant 6 : index
    %c0_15 = arith.constant 0 : index
    %20 = vector.load %arg17[%c6, %c0_15] : memref<16x64xf32, #tpu.memory_space<vmem>>, vector<8x64xf32>
    %c1 = arith.constant 1 : index
    %c0_16 = arith.constant 0 : index
    %21 = vector.load %arg4[%c1, %c0_16] : memref<4x64xf32, #tpu.memory_space<vmem>>, vector<1x64xf32>
    %22 = vector.broadcast %21 : vector<1x64xf32> to vector<8x64xf32>
    %23 = arith.mulf %20, %22 : vector<8x64xf32>
    %24 = arith.addf %19, %23 : vector<8x64xf32>
    %c7 = arith.constant 7 : index
    %c0_17 = arith.constant 0 : index
    %25 = vector.load %arg17[%c7, %c0_17] : memref<16x64xf32, #tpu.memory_space<vmem>>, vector<8x64xf32>
    %c2 = arith.constant 2 : index
    %c0_18 = arith.constant 0 : index
    %26 = vector.load %arg4[%c2, %c0_18] : memref<4x64xf32, #tpu.memory_space<vmem>>, vector<1x64xf32>
    %27 = vector.broadcast %26 : vector<1x64xf32> to vector<8x64xf32>
    %28 = arith.mulf %25, %27 : vector<8x64xf32>
    %29 = arith.addf %24, %28 : vector<8x64xf32>
    %c8_19 = arith.constant 8 : index
    %c0_20 = arith.constant 0 : index
    %30 = vector.load %arg17[%c8_19, %c0_20] : memref<16x64xf32, #tpu.memory_space<vmem>>, vector<8x64xf32>
    %c3 = arith.constant 3 : index
    %c0_21 = arith.constant 0 : index
    %31 = vector.load %arg4[%c3, %c0_21] : memref<4x64xf32, #tpu.memory_space<vmem>>, vector<1x64xf32>
    %32 = vector.broadcast %31 : vector<1x64xf32> to vector<8x64xf32>
    %33 = arith.mulf %30, %32 : vector<8x64xf32>
    %34 = arith.addf %29, %33 : vector<8x64xf32>
    %35 = arith.negf %34 : vector<8x64xf32>
    %36 = math.exp %35 : vector<8x64xf32>
    %cst_22 = arith.constant 1.000000e+00 : f32
    %37 = vector.broadcast %cst_22 : f32 to vector<8x64xf32>
    %38 = arith.addf %37, %36 : vector<8x64xf32>
    %39 = arith.divf %37, %38 : vector<8x64xf32>
    %40 = arith.mulf %34, %39 : vector<8x64xf32>
    %41 = vector.extract_strided_slice %8 {offsets = [5, 0], sizes = [3, 64], strides = [1, 1]} : vector<8x64xf32> to vector<3x64xf32>
    %c0_23 = arith.constant 0 : index
    %c0_24 = arith.constant 0 : index
    %42 = vector.load %arg18[%c0_23, %c0_24] : memref<3x64xf32, #tpu.memory_space<vmem>>, vector<3x64xf32>
    tpu.vector_store %arg18[%c0_23, %c0_24], %41 {strides = array<i32>} : memref<3x64xf32, #tpu.memory_space<vmem>>, vector<3x64xf32>,
    %43 = arith.truncf %40 : vector<8x64xf32> to vector<8x64xbf16>
    %c0_25 = arith.constant 0 : index
    %c0_26 = arith.constant 0 : index
    %44 = vector.load %arg6[%c0_25, %c0_26] : memref<64x128xbf16, #tpu.memory_space<vmem>>, vector<64x128xbf16>
    %cst_27 = arith.constant dense<0.000000e+00> : vector<8x128xf32>
    %45 = tpu.matmul %43, %44, %cst_27 {dimension_numbers = #tpu.dot_dimension_numbers<[1], [0], [0], [1], [0, 0, 1, 1], [], []>} : vector<8x64xbf16>, vector<64x128xbf16>, vector<8x128xf32> -> vector<8x128xf32>
    %46 = arith.truncf %45 : vector<8x128xf32> to vector<8x128xbf16>
    %c0_28 = arith.constant 0 : index
    %c0_29 = arith.constant 0 : index
    %47 = vector.load %arg7[%c0_28, %c0_29] : memref<128x64xbf16, #tpu.memory_space<vmem>>, vector<128x64xbf16>
    %cst_30 = arith.constant dense<0.000000e+00> : vector<8x64xf32>
    %48 = tpu.matmul %46, %47, %cst_30 {dimension_numbers = #tpu.dot_dimension_numbers<[1], [0], [0], [1], [0, 0, 1, 1], [], []>} : vector<8x128xbf16>, vector<128x64xbf16>, vector<8x64xf32> -> vector<8x64xf32>
    %c0_31 = arith.constant 0 : index
    %c0_32 = arith.constant 0 : index
    %49 = vector.load %arg8[%c0_31, %c0_32] : memref<1x64xf32, #tpu.memory_space<vmem>>, vector<1x64xf32>
    %50 = vector.broadcast %49 : vector<1x64xf32> to vector<8x64xf32>
    %51 = arith.addf %48, %50 : vector<8x64xf32>
    %cst_33 = arith.constant 0.000000e+00 : f32
    %52 = vector.broadcast %cst_33 : f32 to vector<8x64xf32>
    %53 = arith.maximumf %51, %52 : vector<8x64xf32>
    %54 = vector.broadcast %cst_33 : f32 to vector<8x64xf32>
    %55 = arith.subf %51, %54 : vector<8x64xf32>
    %56 = arith.cmpf one, %55, %55 : vector<8x64xf32>
    %57 = vector.broadcast %cst_33 : f32 to vector<8x64xf32>
    %58 = arith.addf %51, %57 : vector<8x64xf32>
    %59 = math.absf %55 : vector<8x64xf32>
    %cst_34 = arith.constant 0.000000e+00 : f32
    %60 = vector.broadcast %cst_34 : f32 to vector<8x64xf32>
    %61 = arith.subf %60, %59 : vector<8x64xf32>
    %62 = math.exp %61 : vector<8x64xf32>
    %63 = math.log1p %62 : vector<8x64xf32>
    %64 = arith.addf %53, %63 : vector<8x64xf32>
    %65 = arith.select %56, %58, %64 : vector<8x64xi1>, vector<8x64xf32>
    %c0_35 = arith.constant 0 : index
    %c0_36 = arith.constant 0 : index
    %66 = vector.load %arg20[%c0_35, %c0_36] : memref<8x64xf32, #tpu.memory_space<vmem>>, vector<8x64xf32>
    tpu.vector_store %arg20[%c0_35, %c0_36], %65 {strides = array<i32>} : memref<8x64xf32, #tpu.memory_space<vmem>>, vector<8x64xf32>,
    %c0_37 = arith.constant 0 : index
    %c0_38 = arith.constant 0 : index
    %67 = vector.load %arg21[%c0_37, %c0_38] : memref<8x64xf32, #tpu.memory_space<vmem>>, vector<8x64xf32>
    tpu.vector_store %arg21[%c0_37, %c0_38], %40 {strides = array<i32>} : memref<8x64xf32, #tpu.memory_space<vmem>>, vector<8x64xf32>,
    %68 = vector.extract_strided_slice %45 {offsets = [0, 2], sizes = [8, 8], strides = [1, 1]} : vector<8x128xf32> to vector<8x8xf32>
    %c0_39 = arith.constant 0 : index
    %c0_40 = arith.constant 0 : index
    %69 = vector.load %arg22[%c0_39, %c0_40] : memref<8x8xf32, #tpu.memory_space<vmem>>, vector<8x8xf32>
    tpu.vector_store %arg22[%c0_39, %c0_40], %68 {strides = array<i32>} : memref<8x8xf32, #tpu.memory_space<vmem>>, vector<8x8xf32>,
    %70 = vector.extract_strided_slice %45 {offsets = [0, 10], sizes = [8, 8], strides = [1, 1]} : vector<8x128xf32> to vector<8x8xf32>
    %c0_41 = arith.constant 0 : index
    %c0_42 = arith.constant 0 : index
    %71 = vector.load %arg23[%c0_41, %c0_42] : memref<8x8xf32, #tpu.memory_space<vmem>>, vector<8x8xf32>
    tpu.vector_store %arg23[%c0_41, %c0_42], %70 {strides = array<i32>} : memref<8x8xf32, #tpu.memory_space<vmem>>, vector<8x8xf32>,
    %c0_43 = arith.constant 0 : index
    %c0_44 = arith.constant 0 : index
    %72 = vector.load %arg9[%c0_43, %c0_44] : memref<8x64xf32, #tpu.memory_space<vmem>>, vector<8x64xf32>
    %c0_45 = arith.constant 0 : index
    %c0_46 = arith.constant 0 : index
    %73 = vector.load %arg19[%c0_45, %c0_46] : memref<8x64xf32, #tpu.memory_space<vmem>>, vector<8x64xf32>
    %c0_i32_47 = arith.constant 0 : i32
    %c8_i32 = arith.constant 8 : i32
    %74 = arith.muli %c0_i32_47, %c8_i32 : i32
    %75 = tpu.assume_multiple %74, 8 : i32
    %76 = arith.index_cast %75 : i32 to index
    %c0_48 = arith.constant 0 : index
    %77 = vector.load %arg20[%76, %c0_48] : memref<8x64xf32, #tpu.memory_space<vmem>>, vector<8x64xf32>
    %78 = arith.index_cast %75 : i32 to index
    %c0_49 = arith.constant 0 : index
    %79 = vector.load %arg21[%78, %c0_49] : memref<8x64xf32, #tpu.memory_space<vmem>>, vector<8x64xf32>
    %80 = vector.shape_cast %77 : vector<8x64xf32> to vector<8x1x64xf32>
    %81 = vector.shape_cast %72 : vector<8x64xf32> to vector<1x8x64xf32>
    %82 = vector.broadcast %80 : vector<8x1x64xf32> to vector<8x8x64xf32>
    %83 = vector.broadcast %81 : vector<1x8x64xf32> to vector<8x8x64xf32>
    %84 = arith.mulf %82, %83 : vector<8x8x64xf32>
    %85 = math.exp %84 : vector<8x8x64xf32>
    %86 = arith.mulf %77, %79 : vector<8x64xf32>
    %87 = arith.index_cast %75 : i32 to index
    %c0_50 = arith.constant 0 : index
    %88 = vector.load %arg22[%87, %c0_50] : memref<8x8xf32, #tpu.memory_space<vmem>>, vector<8x8xf32>
    %89 = tpu.transpose %88, [1, 0] : vector<8x8xf32> -> vector<8x8xf32>
    %90 = arith.index_cast %75 : i32 to index
    %c0_51 = arith.constant 0 : index
    %91 = vector.load %arg23[%90, %c0_51] : memref<8x8xf32, #tpu.memory_space<vmem>>, vector<8x8xf32>
    %92 = tpu.transpose %91, [1, 0] : vector<8x8xf32> -> vector<8x8xf32>
    %93 = vector.extract_strided_slice %85 {offsets = [0, 0, 0], sizes = [1, 8, 64], strides = [1, 1, 1]} : vector<8x8x64xf32> to vector<1x8x64xf32>
    %94 = vector.shape_cast %93 : vector<1x8x64xf32> to vector<8x64xf32>
    %95 = arith.mulf %73, %94 : vector<8x64xf32>
    %96 = vector.extract_strided_slice %89 {offsets = [0, 0], sizes = [8, 1], strides = [1, 1]} : vector<8x8xf32> to vector<8x1xf32>
    %97 = vector.extract_strided_slice %86 {offsets = [0, 0], sizes = [1, 64], strides = [1, 1]} : vector<8x64xf32> to vector<1x64xf32>
    %98 = vector.broadcast %96 : vector<8x1xf32> to vector<8x64xf32>
    %99 = vector.broadcast %97 : vector<1x64xf32> to vector<8x64xf32>
    %100 = arith.mulf %98, %99 : vector<8x64xf32>
    %101 = arith.addf %95, %100 : vector<8x64xf32>
    %102 = vector.extract_strided_slice %92 {offsets = [0, 0], sizes = [8, 1], strides = [1, 1]} : vector<8x8xf32> to vector<8x1xf32>
    %103 = vector.broadcast %102 : vector<8x1xf32> to vector<8x64xf32>
    %104 = arith.mulf %101, %103 : vector<8x64xf32>
    %cst_52 = arith.constant dense<0.000000e+00> : vector<64xf32>
    %105 = vector.multi_reduction <add>, %104, %cst_52 [0] : vector<8x64xf32> to vector<64xf32>
    %106 = vector.shape_cast %105 : vector<64xf32> to vector<1x64xf32>
    %107 = vector.extract_strided_slice %85 {offsets = [1, 0, 0], sizes = [1, 8, 64], strides = [1, 1, 1]} : vector<8x8x64xf32> to vector<1x8x64xf32>
    %108 = vector.shape_cast %107 : vector<1x8x64xf32> to vector<8x64xf32>
    %109 = arith.mulf %101, %108 : vector<8x64xf32>
    %110 = vector.extract_strided_slice %89 {offsets = [0, 1], sizes = [8, 1], strides = [1, 1]} : vector<8x8xf32> to vector<8x1xf32>
    %111 = vector.extract_strided_slice %86 {offsets = [1, 0], sizes = [1, 64], strides = [1, 1]} : vector<8x64xf32> to vector<1x64xf32>
    %112 = vector.broadcast %110 : vector<8x1xf32> to vector<8x64xf32>
    %113 = vector.broadcast %111 : vector<1x64xf32> to vector<8x64xf32>
    %114 = arith.mulf %112, %113 : vector<8x64xf32>
    %115 = arith.addf %109, %114 : vector<8x64xf32>
    %116 = vector.extract_strided_slice %92 {offsets = [0, 1], sizes = [8, 1], strides = [1, 1]} : vector<8x8xf32> to vector<8x1xf32>
    %117 = vector.broadcast %116 : vector<8x1xf32> to vector<8x64xf32>
    %118 = arith.mulf %115, %117 : vector<8x64xf32>
    %cst_53 = arith.constant dense<0.000000e+00> : vector<64xf32>
    %119 = vector.multi_reduction <add>, %118, %cst_53 [0] : vector<8x64xf32> to vector<64xf32>
    %120 = vector.shape_cast %119 : vector<64xf32> to vector<1x64xf32>
    %121 = vector.extract_strided_slice %85 {offsets = [2, 0, 0], sizes = [1, 8, 64], strides = [1, 1, 1]} : vector<8x8x64xf32> to vector<1x8x64xf32>
    %122 = vector.shape_cast %121 : vector<1x8x64xf32> to vector<8x64xf32>
    %123 = arith.mulf %115, %122 : vector<8x64xf32>
    %124 = vector.extract_strided_slice %89 {offsets = [0, 2], sizes = [8, 1], strides = [1, 1]} : vector<8x8xf32> to vector<8x1xf32>
    %125 = vector.extract_strided_slice %86 {offsets = [2, 0], sizes = [1, 64], strides = [1, 1]} : vector<8x64xf32> to vector<1x64xf32>
    %126 = vector.broadcast %124 : vector<8x1xf32> to vector<8x64xf32>
    %127 = vector.broadcast %125 : vector<1x64xf32> to vector<8x64xf32>
    %128 = arith.mulf %126, %127 : vector<8x64xf32>
    %129 = arith.addf %123, %128 : vector<8x64xf32>
    %130 = vector.extract_strided_slice %92 {offsets = [0, 2], sizes = [8, 1], strides = [1, 1]} : vector<8x8xf32> to vector<8x1xf32>
    %131 = vector.broadcast %130 : vector<8x1xf32> to vector<8x64xf32>
    %132 = arith.mulf %129, %131 : vector<8x64xf32>
    %cst_54 = arith.constant dense<0.000000e+00> : vector<64xf32>
    %133 = vector.multi_reduction <add>, %132, %cst_54 [0] : vector<8x64xf32> to vector<64xf32>
    %134 = vector.shape_cast %133 : vector<64xf32> to vector<1x64xf32>
    %135 = vector.extract_strided_slice %85 {offsets = [3, 0, 0], sizes = [1, 8, 64], strides = [1, 1, 1]} : vector<8x8x64xf32> to vector<1x8x64xf32>
    %136 = vector.shape_cast %135 : vector<1x8x64xf32> to vector<8x64xf32>
    %137 = arith.mulf %129, %136 : vector<8x64xf32>
    %138 = vector.extract_strided_slice %89 {offsets = [0, 3], sizes = [8, 1], strides = [1, 1]} : vector<8x8xf32> to vector<8x1xf32>
    %139 = vector.extract_strided_slice %86 {offsets = [3, 0], sizes = [1, 64], strides = [1, 1]} : vector<8x64xf32> to vector<1x64xf32>
    %140 = vector.broadcast %138 : vector<8x1xf32> to vector<8x64xf32>
    %141 = vector.broadcast %139 : vector<1x64xf32> to vector<8x64xf32>
    %142 = arith.mulf %140, %141 : vector<8x64xf32>
    %143 = arith.addf %137, %142 : vector<8x64xf32>
    %144 = vector.extract_strided_slice %92 {offsets = [0, 3], sizes = [8, 1], strides = [1, 1]} : vector<8x8xf32> to vector<8x1xf32>
    %145 = vector.broadcast %144 : vector<8x1xf32> to vector<8x64xf32>
    %146 = arith.mulf %143, %145 : vector<8x64xf32>
    %cst_55 = arith.constant dense<0.000000e+00> : vector<64xf32>
    %147 = vector.multi_reduction <add>, %146, %cst_55 [0] : vector<8x64xf32> to vector<64xf32>
    %148 = vector.shape_cast %147 : vector<64xf32> to vector<1x64xf32>
    %149 = vector.extract_strided_slice %85 {offsets = [4, 0, 0], sizes = [1, 8, 64], strides = [1, 1, 1]} : vector<8x8x64xf32> to vector<1x8x64xf32>
    %150 = vector.shape_cast %149 : vector<1x8x64xf32> to vector<8x64xf32>
    %151 = arith.mulf %143, %150 : vector<8x64xf32>
    %152 = vector.extract_strided_slice %89 {offsets = [0, 4], sizes = [8, 1], strides = [1, 1]} : vector<8x8xf32> to vector<8x1xf32>
    %153 = vector.extract_strided_slice %86 {offsets = [4, 0], sizes = [1, 64], strides = [1, 1]} : vector<8x64xf32> to vector<1x64xf32>
    %154 = vector.broadcast %152 : vector<8x1xf32> to vector<8x64xf32>
    %155 = vector.broadcast %153 : vector<1x64xf32> to vector<8x64xf32>
    %156 = arith.mulf %154, %155 : vector<8x64xf32>
    %157 = arith.addf %151, %156 : vector<8x64xf32>
    %158 = vector.extract_strided_slice %92 {offsets = [0, 4], sizes = [8, 1], strides = [1, 1]} : vector<8x8xf32> to vector<8x1xf32>
    %159 = vector.broadcast %158 : vector<8x1xf32> to vector<8x64xf32>
    %160 = arith.mulf %157, %159 : vector<8x64xf32>
    %cst_56 = arith.constant dense<0.000000e+00> : vector<64xf32>
    %161 = vector.multi_reduction <add>, %160, %cst_56 [0] : vector<8x64xf32> to vector<64xf32>
    %162 = vector.shape_cast %161 : vector<64xf32> to vector<1x64xf32>
    %163 = vector.extract_strided_slice %85 {offsets = [5, 0, 0], sizes = [1, 8, 64], strides = [1, 1, 1]} : vector<8x8x64xf32> to vector<1x8x64xf32>
    %164 = vector.shape_cast %163 : vector<1x8x64xf32> to vector<8x64xf32>
    %165 = arith.mulf %157, %164 : vector<8x64xf32>
    %166 = vector.extract_strided_slice %89 {offsets = [0, 5], sizes = [8, 1], strides = [1, 1]} : vector<8x8xf32> to vector<8x1xf32>
    %167 = vector.extract_strided_slice %86 {offsets = [5, 0], sizes = [1, 64], strides = [1, 1]} : vector<8x64xf32> to vector<1x64xf32>
    %168 = vector.broadcast %166 : vector<8x1xf32> to vector<8x64xf32>
    %169 = vector.broadcast %167 : vector<1x64xf32> to vector<8x64xf32>
    %170 = arith.mulf %168, %169 : vector<8x64xf32>
    %171 = arith.addf %165, %170 : vector<8x64xf32>
    %172 = vector.extract_strided_slice %92 {offsets = [0, 5], sizes = [8, 1], strides = [1, 1]} : vector<8x8xf32> to vector<8x1xf32>
    %173 = vector.broadcast %172 : vector<8x1xf32> to vector<8x64xf32>
    %174 = arith.mulf %171, %173 : vector<8x64xf32>
    %cst_57 = arith.constant dense<0.000000e+00> : vector<64xf32>
    %175 = vector.multi_reduction <add>, %174, %cst_57 [0] : vector<8x64xf32> to vector<64xf32>
    %176 = vector.shape_cast %175 : vector<64xf32> to vector<1x64xf32>
    %177 = vector.extract_strided_slice %85 {offsets = [6, 0, 0], sizes = [1, 8, 64], strides = [1, 1, 1]} : vector<8x8x64xf32> to vector<1x8x64xf32>
    %178 = vector.shape_cast %177 : vector<1x8x64xf32> to vector<8x64xf32>
    %179 = arith.mulf %171, %178 : vector<8x64xf32>
    %180 = vector.extract_strided_slice %89 {offsets = [0, 6], sizes = [8, 1], strides = [1, 1]} : vector<8x8xf32> to vector<8x1xf32>
    %181 = vector.extract_strided_slice %86 {offsets = [6, 0], sizes = [1, 64], strides = [1, 1]} : vector<8x64xf32> to vector<1x64xf32>
    %182 = vector.broadcast %180 : vector<8x1xf32> to vector<8x64xf32>
    %183 = vector.broadcast %181 : vector<1x64xf32> to vector<8x64xf32>
    %184 = arith.mulf %182, %183 : vector<8x64xf32>
    %185 = arith.addf %179, %184 : vector<8x64xf32>
    %186 = vector.extract_strided_slice %92 {offsets = [0, 6], sizes = [8, 1], strides = [1, 1]} : vector<8x8xf32> to vector<8x1xf32>
    %187 = vector.broadcast %186 : vector<8x1xf32> to vector<8x64xf32>
    %188 = arith.mulf %185, %187 : vector<8x64xf32>
    %cst_58 = arith.constant dense<0.000000e+00> : vector<64xf32>
    %189 = vector.multi_reduction <add>, %188, %cst_58 [0] : vector<8x64xf32> to vector<64xf32>
    %190 = vector.shape_cast %189 : vector<64xf32> to vector<1x64xf32>
    %191 = vector.extract_strided_slice %85 {offsets = [7, 0, 0], sizes = [1, 8, 64], strides = [1, 1, 1]} : vector<8x8x64xf32> to vector<1x8x64xf32>
    %192 = vector.shape_cast %191 : vector<1x8x64xf32> to vector<8x64xf32>
    %193 = arith.mulf %185, %192 : vector<8x64xf32>
    %194 = vector.extract_strided_slice %89 {offsets = [0, 7], sizes = [8, 1], strides = [1, 1]} : vector<8x8xf32> to vector<8x1xf32>
    %195 = vector.extract_strided_slice %86 {offsets = [7, 0], sizes = [1, 64], strides = [1, 1]} : vector<8x64xf32> to vector<1x64xf32>
    %196 = vector.broadcast %194 : vector<8x1xf32> to vector<8x64xf32>
    %197 = vector.broadcast %195 : vector<1x64xf32> to vector<8x64xf32>
    %198 = arith.mulf %196, %197 : vector<8x64xf32>
    %199 = arith.addf %193, %198 : vector<8x64xf32>
    %200 = vector.extract_strided_slice %92 {offsets = [0, 7], sizes = [8, 1], strides = [1, 1]} : vector<8x8xf32> to vector<8x1xf32>
    %201 = vector.broadcast %200 : vector<8x1xf32> to vector<8x64xf32>
    %202 = arith.mulf %199, %201 : vector<8x64xf32>
    %cst_59 = arith.constant dense<0.000000e+00> : vector<64xf32>
    %203 = vector.multi_reduction <add>, %202, %cst_59 [0] : vector<8x64xf32> to vector<64xf32>
    %204 = vector.shape_cast %203 : vector<64xf32> to vector<1x64xf32>
    %205 = tpu.concatenate %106, %120, %134, %148, %162, %176, %190, %204 in 0 : vector<1x64xf32>, vector<1x64xf32>, vector<1x64xf32>, vector<1x64xf32>, vector<1x64xf32>, vector<1x64xf32>, vector<1x64xf32>, vector<1x64xf32> -> vector<8x64xf32>
    %206 = arith.index_cast %75 : i32 to index
    %c0_60 = arith.constant 0 : index
    %207 = vector.load %arg24[%206, %c0_60] : memref<8x64xf32, #tpu.memory_space<vmem>>, vector<8x64xf32>
    tpu.vector_store %arg24[%206, %c0_60], %205 {strides = array<i32>} : memref<8x64xf32, #tpu.memory_space<vmem>>, vector<8x64xf32>,
    %c1_i32 = arith.constant 1 : i32
    %c0_61 = arith.constant 0 : index
    %c0_62 = arith.constant 0 : index
    %208 = vector.load %arg19[%c0_61, %c0_62] : memref<8x64xf32, #tpu.memory_space<vmem>>, vector<8x64xf32>
    tpu.vector_store %arg19[%c0_61, %c0_62], %199 {strides = array<i32>} : memref<8x64xf32, #tpu.memory_space<vmem>>, vector<8x64xf32>,
    %c0_63 = arith.constant 0 : index
    %c0_64 = arith.constant 0 : index
    %209 = vector.load %arg24[%c0_63, %c0_64] : memref<8x64xf32, #tpu.memory_space<vmem>>, vector<8x64xf32>
    %c0_65 = arith.constant 0 : index
    %c0_66 = arith.constant 0 : index
    %210 = vector.load %arg21[%c0_65, %c0_66] : memref<8x64xf32, #tpu.memory_space<vmem>>, vector<8x64xf32>
    %c0_67 = arith.constant 0 : index
    %c0_68 = arith.constant 0 : index
    %211 = vector.load %arg10[%c0_67, %c0_68] : memref<1x64xf32, #tpu.memory_space<vmem>>, vector<1x64xf32>
    %212 = vector.broadcast %211 : vector<1x64xf32> to vector<8x64xf32>
    %213 = arith.mulf %210, %212 : vector<8x64xf32>
    %214 = arith.addf %209, %213 : vector<8x64xf32>
    %215 = arith.negf %9 : vector<8x64xf32>
    %216 = math.exp %215 : vector<8x64xf32>
    %cst_69 = arith.constant 1.000000e+00 : f32
    %217 = vector.broadcast %cst_69 : f32 to vector<8x64xf32>
    %218 = arith.addf %217, %216 : vector<8x64xf32>
    %219 = arith.divf %217, %218 : vector<8x64xf32>
    %220 = arith.mulf %9, %219 : vector<8x64xf32>
    %221 = arith.mulf %214, %220 : vector<8x64xf32>
    %222 = arith.truncf %221 : vector<8x64xf32> to vector<8x64xbf16>
    %c0_70 = arith.constant 0 : index
    %c0_71 = arith.constant 0 : index
    %223 = vector.load %arg11[%c0_70, %c0_71] : memref<64x32xbf16, #tpu.memory_space<vmem>>, vector<64x32xbf16>
    %cst_72 = arith.constant dense<0.000000e+00> : vector<8x32xf32>
    %224 = tpu.matmul %222, %223, %cst_72 {dimension_numbers = #tpu.dot_dimension_numbers<[1], [0], [0], [1], [0, 0, 1, 1], [], []>} : vector<8x64xbf16>, vector<64x32xbf16>, vector<8x32xf32> -> vector<8x32xf32>
    %225 = arith.addf %224, %4 : vector<8x32xf32>
    %c0_73 = arith.constant 0 : index
    %c0_74 = arith.constant 0 : index
    %226 = vector.load %arg12[%c0_73, %c0_74] : memref<1x32xf32, #tpu.memory_space<vmem>>, vector<1x32xf32>
    %227 = arith.mulf %225, %225 : vector<8x32xf32>
    %cst_75 = arith.constant dense<0.000000e+00> : vector<8xf32>
    %228 = vector.multi_reduction <add>, %227, %cst_75 [1] : vector<8x32xf32> to vector<8xf32>
    %229 = vector.shape_cast %228 : vector<8xf32> to vector<8x1xf32>
    %cst_76 = arith.constant 3.200000e+01 : f32
    %230 = vector.broadcast %cst_76 : f32 to vector<8x1xf32>
    %231 = arith.divf %229, %230 : vector<8x1xf32>
    %cst_77 = arith.constant 9.99999974E-6 : f32
    %232 = vector.broadcast %cst_77 : f32 to vector<8x1xf32>
    %233 = arith.addf %231, %232 : vector<8x1xf32>
    %234 = math.rsqrt %233 : vector<8x1xf32>
    %235 = vector.broadcast %234 : vector<8x1xf32> to vector<8x32xf32>
    %236 = arith.mulf %225, %235 : vector<8x32xf32>
    %237 = vector.broadcast %226 : vector<1x32xf32> to vector<8x32xf32>
    %238 = arith.mulf %236, %237 : vector<8x32xf32>
    %239 = arith.truncf %238 : vector<8x32xf32> to vector<8x32xbf16>
    %c0_78 = arith.constant 0 : index
    %c0_79 = arith.constant 0 : index
    %240 = vector.load %arg13[%c0_78, %c0_79] : memref<32x256xbf16, #tpu.memory_space<vmem>>, vector<32x256xbf16>
    %cst_80 = arith.constant dense<0.000000e+00> : vector<8x256xf32>
    %241 = tpu.matmul %239, %240, %cst_80 {dimension_numbers = #tpu.dot_dimension_numbers<[1], [0], [0], [1], [0, 0, 1, 1], [], []>} : vector<8x32xbf16>, vector<32x256xbf16>, vector<8x256xf32> -> vector<8x256xf32>
    %242 = vector.extract_strided_slice %241 {offsets = [0, 0], sizes = [8, 128], strides = [1, 1]} : vector<8x256xf32> to vector<8x128xf32>
    %243 = vector.extract_strided_slice %241 {offsets = [0, 128], sizes = [8, 128], strides = [1, 1]} : vector<8x256xf32> to vector<8x128xf32>
    %244 = arith.negf %243 : vector<8x128xf32>
    %245 = math.exp %244 : vector<8x128xf32>
    %cst_81 = arith.constant 1.000000e+00 : f32
    %246 = vector.broadcast %cst_81 : f32 to vector<8x128xf32>
    %247 = arith.addf %246, %245 : vector<8x128xf32>
    %248 = arith.divf %246, %247 : vector<8x128xf32>
    %249 = arith.mulf %243, %248 : vector<8x128xf32>
    %250 = arith.mulf %242, %249 : vector<8x128xf32>
    %251 = arith.truncf %250 : vector<8x128xf32> to vector<8x128xbf16>
    %c0_82 = arith.constant 0 : index
    %c0_83 = arith.constant 0 : index
    %252 = vector.load %arg14[%c0_82, %c0_83] : memref<128x32xbf16, #tpu.memory_space<vmem>>, vector<128x32xbf16>
    %cst_84 = arith.constant dense<0.000000e+00> : vector<8x32xf32>
    %253 = tpu.matmul %251, %252, %cst_84 {dimension_numbers = #tpu.dot_dimension_numbers<[1], [0], [0], [1], [0, 0, 1, 1], [], []>} : vector<8x128xbf16>, vector<128x32xbf16>, vector<8x32xf32> -> vector<8x32xf32>
    %254 = arith.addf %253, %238 : vector<8x32xf32>
    %c0_85 = arith.constant 0 : index
    %c0_86 = arith.constant 0 : index
    %255 = vector.load %arg15[%c0_85, %c0_86] : memref<1x32xf32, #tpu.memory_space<vmem>>, vector<1x32xf32>
    %256 = arith.mulf %254, %254 : vector<8x32xf32>
    %cst_87 = arith.constant dense<0.000000e+00> : vector<8xf32>
    %257 = vector.multi_reduction <add>, %256, %cst_87 [1] : vector<8x32xf32> to vector<8xf32>
    %258 = vector.shape_cast %257 : vector<8xf32> to vector<8x1xf32>
    %cst_88 = arith.constant 3.200000e+01 : f32
    %259 = vector.broadcast %cst_88 : f32 to vector<8x1xf32>
    %260 = arith.divf %258, %259 : vector<8x1xf32>
    %cst_89 = arith.constant 9.99999974E-6 : f32
    %261 = vector.broadcast %cst_89 : f32 to vector<8x1xf32>
    %262 = arith.addf %260, %261 : vector<8x1xf32>
    %263 = math.rsqrt %262 : vector<8x1xf32>
    %264 = vector.broadcast %263 : vector<8x1xf32> to vector<8x32xf32>
    %265 = arith.mulf %254, %264 : vector<8x32xf32>
    %266 = vector.broadcast %255 : vector<1x32xf32> to vector<8x32xf32>
    %267 = arith.mulf %265, %266 : vector<8x32xf32>
    %c0_90 = arith.constant 0 : index
    %c0_91 = arith.constant 0 : index
    %c0_92 = arith.constant 0 : index
    %268 = vector.load %arg16[%c0_90, %c0_91, %c0_92] : memref<1x8x32xf32, #tpu.memory_space<vmem>>, vector<1x8x32xf32>
    %269 = vector.shape_cast %268 : vector<1x8x32xf32> to vector<8x32xf32>
    %270 = vector.shape_cast %267 : vector<8x32xf32> to vector<1x8x32xf32>
    tpu.vector_store %arg16[%c0_90, %c0_91, %c0_92], %270 {strides = array<i32>} : memref<1x8x32xf32, #tpu.memory_space<vmem>>, vector<1x8x32xf32>,
    return
  }
  func.func @transform_0(%arg0: i32, %arg1: i32) -> (i32, i32, i32) {
    %c0_i32 = arith.constant 0 : i32
    %c0_i32_0 = arith.constant 0 : i32
    return %arg0, %arg1, %c0_i32 : i32, i32, i32
  }
  func.func @transform_1(%arg0: i32, %arg1: i32) -> (i32, i32) {
    %c0_i32 = arith.constant 0 : i32
    %c0_i32_0 = arith.constant 0 : i32
    %c0_i32_1 = arith.constant 0 : i32
    return %c0_i32, %c0_i32_0 : i32, i32
  }
  func.func @transform_2(%arg0: i32, %arg1: i32) -> (i32, i32) {
    %c0_i32 = arith.constant 0 : i32
    %c0_i32_0 = arith.constant 0 : i32
    %c0_i32_1 = arith.constant 0 : i32
    return %c0_i32, %c0_i32_0 : i32, i32
  }
  func.func @transform_3(%arg0: i32, %arg1: i32) -> (i32, i32) {
    %c0_i32 = arith.constant 0 : i32
    %c0_i32_0 = arith.constant 0 : i32
    %c0_i32_1 = arith.constant 0 : i32
    return %c0_i32, %c0_i32_0 : i32, i32
  }
  func.func @transform_4(%arg0: i32, %arg1: i32) -> (i32, i32) {
    %c0_i32 = arith.constant 0 : i32
    %c0_i32_0 = arith.constant 0 : i32
    %c0_i32_1 = arith.constant 0 : i32
    return %c0_i32, %c0_i32_0 : i32, i32
  }
  func.func @transform_5(%arg0: i32, %arg1: i32) -> (i32, i32) {
    %c0_i32 = arith.constant 0 : i32
    %c0_i32_0 = arith.constant 0 : i32
    %c0_i32_1 = arith.constant 0 : i32
    return %c0_i32, %c0_i32_0 : i32, i32
  }
  func.func @transform_6(%arg0: i32, %arg1: i32) -> (i32, i32) {
    %c0_i32 = arith.constant 0 : i32
    %c0_i32_0 = arith.constant 0 : i32
    %c0_i32_1 = arith.constant 0 : i32
    return %c0_i32, %c0_i32_0 : i32, i32
  }
  func.func @transform_7(%arg0: i32, %arg1: i32) -> (i32, i32) {
    %c0_i32 = arith.constant 0 : i32
    %c0_i32_0 = arith.constant 0 : i32
    %c0_i32_1 = arith.constant 0 : i32
    return %c0_i32, %c0_i32_0 : i32, i32
  }
  func.func @transform_8(%arg0: i32, %arg1: i32) -> (i32, i32) {
    %c0_i32 = arith.constant 0 : i32
    %c0_i32_0 = arith.constant 0 : i32
    %c0_i32_1 = arith.constant 0 : i32
    return %c0_i32, %c0_i32_0 : i32, i32
  }
  func.func @transform_9(%arg0: i32, %arg1: i32) -> (i32, i32) {
    %c0_i32 = arith.constant 0 : i32
    %c0_i32_0 = arith.constant 0 : i32
    %c0_i32_1 = arith.constant 0 : i32
    return %c0_i32, %c0_i32_0 : i32, i32
  }
  func.func @transform_10(%arg0: i32, %arg1: i32) -> (i32, i32) {
    %c0_i32 = arith.constant 0 : i32
    %c0_i32_0 = arith.constant 0 : i32
    %c0_i32_1 = arith.constant 0 : i32
    return %c0_i32, %c0_i32_0 : i32, i32
  }
  func.func @transform_11(%arg0: i32, %arg1: i32) -> (i32, i32) {
    %c0_i32 = arith.constant 0 : i32
    %c0_i32_0 = arith.constant 0 : i32
    %c0_i32_1 = arith.constant 0 : i32
    return %c0_i32, %c0_i32_0 : i32, i32
  }
  func.func @transform_12(%arg0: i32, %arg1: i32) -> (i32, i32) {
    %c0_i32 = arith.constant 0 : i32
    %c0_i32_0 = arith.constant 0 : i32
    %c0_i32_1 = arith.constant 0 : i32
    return %c0_i32, %c0_i32_0 : i32, i32
  }
  func.func @transform_13(%arg0: i32, %arg1: i32) -> (i32, i32) {
    %c0_i32 = arith.constant 0 : i32
    %c0_i32_0 = arith.constant 0 : i32
    %c0_i32_1 = arith.constant 0 : i32
    return %c0_i32, %c0_i32_0 : i32, i32
  }
  func.func @transform_14(%arg0: i32, %arg1: i32) -> (i32, i32, i32) {
    %c0_i32 = arith.constant 0 : i32
    %c0_i32_0 = arith.constant 0 : i32
    return %arg0, %arg1, %c0_i32 : i32, i32, i32
  }
}

</mosaic_0001>

<bundles_post_ra>
// kernel: tpu_custom_call.1
= control target key start
LH: loop header
LB: loop body
LE: loop exit
PB: predicated region body
PF: predicated region fallthrough
CT: control target
= control target key end

     0   :  { %s3666_s0 = inlined_call_operand.hbm [shape: f32[2,8,32], index: 0, kind: input, shape index: {}]   ;;  %s3667_s1 = inlined_call_operand.hbm [shape: bf16[32,128], index: 1, kind: input, shape index: {}]   ;;  %s3668_s2 = inlined_call_operand.hbm [shape: f32[4,64], index: 2, kind: input, shape index: {}]   ;;  %s3669_s3 = inlined_call_operand.hbm [shape: f32[1,64], index: 3, kind: input, shape index: {}]   ;;  %s3670_s4 = inlined_call_operand.hbm [shape: bf16[64,128], index: 4, kind: input, shape index: {}]   ;;  %s3671_s5 = inlined_call_operand.hbm [shape: bf16[128,64], index: 5, kind: input, shape index: {}]   ;;  %s3672_s6 = inlined_call_operand.hbm [shape: f32[1,64], index: 6, kind: input, shape index: {}]   ;;  %s3673_s7 = inlined_call_operand.hbm [shape: f32[8,64], index: 7, kind: input, shape index: {}]   ;;  %s3674_s8 = inlined_call_operand.hbm [shape: f32[1,64], index: 8, kind: input, shape index: {}]   ;;  %s3675_s9 = inlined_call_operand.hbm [shape: bf16[64,32], index: 9, kind: input, shape index: {}]   ;;  %s3676_s10 = inlined_call_operand.hbm [shape: f32[1,32], index: 10, kind: input, shape index: {}]   ;;  %s3677_s11 = inlined_call_operand.hbm [shape: bf16[32,256], index: 11, kind: input, shape index: {}]   ;;  %s3678_s12 = inlined_call_operand.hbm [shape: bf16[128,32], index: 12, kind: input, shape index: {}]   ;;  %s3679_s13 = inlined_call_operand.hbm [shape: f32[1,32], index: 13, kind: input, shape index: {}]   ;;  %s3680_s14 = inlined_call_operand.hbm [shape: f32[2,8,32], index: 14, kind: output, shape index: {}]  }
   0x1   :  { %3695 = sst [smem:[#allocation49_spill]] %s3666_s0 }
   0x2   :  { %3696 = sst [smem:[#allocation50_spill]] %s3667_s1 }
   0x3   :  { %3697 = sst [smem:[#allocation51_spill]] %s3668_s2 }
   0x4   :  { %3698 = sst [smem:[#allocation52_spill]] %s3669_s3 }
   0x5   :  { %3699 = sst [smem:[#allocation53_spill]] %s3680_s14 }
   0x6   :  { %19 = vsyncpa [#allocation11], 0 }
   0x7   :  { %21 = vsyncpa [#allocation11 + $0x1], 0 }
   0x8   :  { %22 = vsyncpa [#allocation14], 0 }
   0x9   :  { %23 = vsyncpa [#allocation17], 0 }
   0xa   :  { %24 = vsyncpa [#allocation20], 0 }
   0xb   :  { %25 = vsyncpa [#allocation23], 0 }
   0xc   :  { %26 = vsyncpa [#allocation26], 0 }
   0xd   :  { %27 = vsyncpa [#allocation29], 0 }
   0xe   :  { %28 = vsyncpa [#allocation32], 0 }
   0xf   :  { %29 = vsyncpa [#allocation12], 0 }
  0x10   :  { %31 = vsyncpa [#allocation12 + $0x1], 0  ;;  %s3036_s29 = smov 0   ;;  %s3038_s30 = smov 0  }
  0x11   :  { %s3040_s15 = smov 0   ;;  %s3042_s16 = smov 0  }
  0x12   :  { %s3044_s17 = smov 0   ;;  %s3046_s18 = smov 0  }
  0x13 LB: > { %3700 = sst [smem:[#allocation43_spill]] %s2906_s29  ;;  %s3681_s19 = sadd.s32 4294967295, %s2926_s18   ;;  %s2926_s18 = sphi %s3046_s18, %s37_s18   ;;  %s2922_s17 = sphi %s3044_s17, %s3742_s17   ;;  %s2918_s16 = sphi %s3042_s16, %s3741_s16   ;;  %s2914_s15 = sphi %s3040_s15, %s3740_s15   ;;  %s2910_s30 = sphi %s3038_s30, %s3739_s30   ;;  %s2906_s29 = sphi %s3036_s29, %s3738_s29  }
  0x14   : > { %3701 = sst [smem:[#allocation44_spill]] %s2910_s30  ;;  %p1940_p0 = scmp.ge.s32.totalorder %s2926_s18, 1 }
  0x15   : > { %3702 = sst [smem:[#allocation45_spill]] %s2914_s15  ;;  %p3070_p1 = scmp.eq.s32.totalorder %s3681_s19, 0 }
  0x16   : > { %3703 = sst [smem:[#allocation46_spill]] %s2918_s16  ;;  %p383_p2 = scmp.lt.s32.totalorder %s2926_s18, 3 }
  0x17   : > { %s3704_s20 = scalar_select %p3070_p1, 1, 0 }
  0x18   : > { %p3075_p3 = pnand %p1940_p0, %p383_p2  ;;  %s2928_s22 = smov [#allocation13]  }
  0x19   : > { %3705 = sst [smem:[#allocation47_spill]] %s3704_s20  ;;  %s395_s23 = sshll.u32 %s2928_s22, 4  ;;  %s3079_s23 = int_to_ptr.vmem [resolvable:$true] %s395_s23 }
  0x1a   : > { %s3706_s21 = scalar_select %p3075_p3, 1, 0 }
  0x1b   : > { %p2182_p4 = pneg %p3075_p3  ;;  %s2929_s25 = smov [#allocation16]  }
  0x1c   : > { %3707 = sst [smem:[#allocation48_spill]] %s3706_s21  ;;  %s420_s26 = sshll.u32 %s2929_s25, 4  ;;  %s3090_s26 = int_to_ptr.vmem [resolvable:$true] %s420_s26 }
  0x1d   : > { %p3086_p6 = pnand %p2182_p4, %p3070_p1  ;;  %s2930_s27 = smov [#allocation19]  }
  0x1e   : > { %s3092_s28 = sshll.u32 %s2930_s27, 4  ;;  %s3709_s1 = sld [smem:[#allocation50_spill]]  ;;  %s444_s28 = int_to_ptr.vmem [resolvable:$true] %s3092_s28 }
  0x1f   : > { %p3102_p8 = pneg %p3086_p6 }
  0x24   : > { %s2422_s14 = scalar_lea.hbm %s3709_s1, 256 }
  0x25   : > { %p2423_p7 = scmp.ne.s32.totalorder %s3709_s1, %s2422_s14  ;;  %p2429_p11 = scmp.lt.u32.totalorder %s2422_s14, %s3709_s1 }
  0x27   : > { %p2425_p9 = pnand %p3102_p8, %p2423_p7 }
  0x29   : > { %p2426_p10 = pneg %p2425_p9 }
  0x2b   : > { %p2431_p12 = pnand %p2429_p11, %p2426_p10 }
  0x2d   : > { %2434 = shalt.err (!%p2431_p12)
}
  0x2e   : > { %s2435_s16 = scalar_lea.vmem %s3079_s23, 256  ;;  %p2443_p4 = scmp.lt.s32.totalorder %s3079_s23, %s3079_s23 }
  0x2f   : > { %p2436_p13 = scmp.ne.s32.totalorder %s3079_s23, %s2435_s16  ;;  %p2444_p5 = scmp.lt.s32.totalorder %s2435_s16, %s2435_s16 }
  0x31   : > { %p2438_p0 = pnand %p2436_p13, %p3102_p8  ;;  %p2445_p7 = por %p2444_p5, %p2443_p4 }
  0x33   : > { %p2439_p2 = pneg %p2438_p0 }
  0x35   : > { %p2446_p9 = pnand %p2445_p7, %p2439_p2 }
  0x37   : > { %2449 = shalt.err (!%p2446_p9)
}
  0x38   : > { %s3692_s19 = smov 64   ;;  %s2932_s14 = smov 4  }
  0x39   : > { %2185 = dma.hbm_to_vmem [thread:$0]  (!%p3086_p6), %s3709_s1, 256, %s3079_s23, [#allocation14], %s3692_s19, %s3692_s19, %s2932_s14  }
  0x3a   : > { %s3711_s3 = sld [smem:[#allocation52_spill]] }
  0x40   : > { %s2450_s16 = scalar_lea.hbm %s3711_s3, 16 }
  0x41   : > { %p2451_p5 = scmp.ne.s32.totalorder %s3711_s3, %s2450_s16  ;;  %p2457_p12 = scmp.lt.u32.totalorder %s2450_s16, %s3711_s3 }
  0x43   : > { %p2453_p10 = pnand %p2451_p5, %p3102_p8 }
  0x45   : > { %p2454_p11 = pneg %p2453_p10 }
  0x47   : > { %p2459_p13 = pnand %p2457_p12, %p2454_p11 }
  0x49   : > { %2462 = shalt.err (!%p2459_p13)
}
  0x4a   : > { %s2463_s23 = scalar_lea.vmem %s3090_s26, 16  ;;  %s2470_s29 = scalar_lea.vmem %s3090_s26, 32 }
  0x4b   : > { %p2464_p0 = scmp.ne.s32.totalorder %s3090_s26, %s2463_s23  ;;  %p2471_p7 = scmp.lt.s32.totalorder %s3090_s26, %s3090_s26 }
  0x4c   : > { %p2472_p9 = scmp.lt.s32.totalorder %s2470_s29, %s2463_s23 }
  0x4d   : > { %p2466_p2 = pnand %p2464_p0, %p3102_p8 }
  0x4e   : > { %p2473_p5 = por %p2472_p9, %p2471_p7 }
  0x4f   : > { %p2467_p4 = pneg %p2466_p2 }
  0x51   : > { %p2474_p10 = pnand %p2473_p5, %p2467_p4 }
  0x53   : > { %2477 = shalt.err (!%p2474_p10)
}
  0x54   : > { %2191 = dma.hbm_to_vmem [thread:$0]  (!%p3086_p6), %s3711_s3, 16, %s3090_s26, [#allocation17]  }
  0x55   : > { %s2478_s22 = scalar_lea.hbm %s3671_s5, 1024 }
  0x56   : > { %p2479_p11 = scmp.ne.s32.totalorder %s3671_s5, %s2478_s22  ;;  %p2485_p0 = scmp.lt.u32.totalorder %s2478_s22, %s3671_s5 }
  0x58   : > { %p2481_p12 = pnand %p2479_p11, %p3102_p8 }
  0x5a   : > { %p2482_p13 = pneg %p2481_p12 }
  0x5c   : > { %p2487_p2 = pnand %p2485_p0, %p2482_p13 }
  0x5e   : > { %2490 = shalt.err (!%p2487_p2)
}
  0x5f   : > { %s2491_s29 = scalar_lea.vmem %s444_s28, 1024  ;;  %p2499_p5 = scmp.lt.s32.totalorder %s444_s28, %s444_s28 }
  0x60   : > { %p2492_p4 = scmp.ne.s32.totalorder %s444_s28, %s2491_s29  ;;  %p2500_p10 = scmp.lt.s32.totalorder %s2491_s29, %s2491_s29 }
  0x62   : > { %p2494_p7 = pnand %p2492_p4, %p3102_p8  ;;  %p2501_p3 = por %p2500_p10, %p2499_p5 }
  0x64   : > { %p2495_p9 = pneg %p2494_p7 }
  0x66   : > { %p2502_p1 = pnand %p2501_p3, %p2495_p9 }
  0x68   : > { %2505 = shalt.err (!%p2502_p1)
}
  0x69   : > { %2197 = dma.hbm_to_vmem [thread:$0]  (!%p3086_p6), %s3671_s5, 1024, %s444_s28, [#allocation20], %s3692_s19, %s3692_s19, %s2932_s14  }
  0x6a   : > { %s2933_s15 = smov [#allocation22]   ;;  %s2934_s21 = smov [#allocation25]  }
  0x6b   : > { %s468_s20 = sshll.u32 %s2933_s15, 4  ;;  %s489_s22 = sshll.u32 %s2934_s21, 4  ;;  %s469_s20 = int_to_ptr.vmem [resolvable:$true] %s468_s20  ;;  %s490_s22 = int_to_ptr.vmem [resolvable:$true] %s489_s22 }
  0x6c   : > { %s2506_s16 = scalar_lea.hbm %s3673_s7, 128 }
  0x6d   : > { %p2507_p1 = scmp.ne.s32.totalorder %s3673_s7, %s2506_s16  ;;  %p2513_p12 = scmp.lt.u32.totalorder %s2506_s16, %s3673_s7 }
  0x6f   : > { %p2509_p3 = pnand %p2507_p1, %p3102_p8 }
  0x71   : > { %p2510_p11 = pneg %p2509_p3 }
  0x73   : > { %p2515_p13 = pnand %p2513_p12, %p2510_p11 }
  0x75   : > { %2518 = shalt.err (!%p2515_p13)
}
  0x76   : > { %s2519_s28 = scalar_lea.vmem %s469_s20, 128  ;;  %p2527_p7 = scmp.lt.s32.totalorder %s469_s20, %s469_s20 }
  0x77   : > { %p2520_p0 = scmp.ne.s32.totalorder %s469_s20, %s2519_s28  ;;  %p2528_p9 = scmp.lt.s32.totalorder %s2519_s28, %s2519_s28 }
  0x79   : > { %p2522_p2 = pnand %p2520_p0, %p3102_p8  ;;  %p2529_p5 = por %p2528_p9, %p2527_p7 }
  0x7b   : > { %p2523_p4 = pneg %p2522_p2 }
  0x7d   : > { %p2530_p10 = pnand %p2529_p5, %p2523_p4 }
  0x7f   : > { %2533 = shalt.err (!%p2530_p10)
}
  0x80   : > { %2203 = dma.hbm_to_vmem [thread:$0]  (!%p3086_p6), %s3673_s7, 128, %s469_s20, [#allocation23]  }
  0x81   : > { %s2534_s25 = scalar_lea.hbm %s3675_s9, 512 }
  0x82   : > { %p2535_p1 = scmp.ne.s32.totalorder %s3675_s9, %s2534_s25  ;;  %p2541_p12 = scmp.lt.u32.totalorder %s2534_s25, %s3675_s9 }
  0x84   : > { %p2537_p3 = pnand %p2535_p1, %p3102_p8 }
  0x86   : > { %p2538_p11 = pneg %p2537_p3 }
  0x88   : > { %p2543_p13 = pnand %p2541_p12, %p2538_p11 }
  0x8a   : > { %2546 = shalt.err (!%p2543_p13)
}
  0x8b   : > { %s2547_s26 = scalar_lea.vmem %s490_s22, 512  ;;  %p2555_p7 = scmp.lt.s32.totalorder %s490_s22, %s490_s22 }
  0x8c   : > { %p2548_p0 = scmp.ne.s32.totalorder %s490_s22, %s2547_s26  ;;  %p2556_p9 = scmp.lt.s32.totalorder %s2547_s26, %s2547_s26 }
  0x8e   : > { %p2550_p2 = pnand %p2548_p0, %p3102_p8  ;;  %p2557_p5 = por %p2556_p9, %p2555_p7 }
  0x90   : > { %p2551_p4 = pneg %p2550_p2 }
  0x92   : > { %p2558_p10 = pnand %p2557_p5, %p2551_p4 }
  0x94   : > { %2561 = shalt.err (!%p2558_p10)
}
  0x95   : > { %2209 = dma.hbm_to_vmem [thread:$0]  (!%p3086_p6), %s3675_s9, 512, %s490_s22, [#allocation26], %s3692_s19, %s3692_s19, %s2932_s14  }
  0x96   : > { %s2935_s30 = smov [#allocation28]   ;;  %s2562_s25 = scalar_lea.hbm %s3677_s11, 512 }
  0x97   : > { %s513_s15 = sshll.u32 %s2935_s30, 4  ;;  %p2563_p1 = scmp.ne.s32.totalorder %s3677_s11, %s2562_s25  ;;  %s514_s15 = int_to_ptr.vmem [resolvable:$true] %s513_s15 }
  0x98   : > { %p2569_p12 = scmp.lt.u32.totalorder %s2562_s25, %s3677_s11 }
  0x99   : > { %p2565_p3 = pnand %p2563_p1, %p3102_p8 }
  0x9b   : > { %p2566_p11 = pneg %p2565_p3 }
  0x9d   : > { %p2571_p13 = pnand %p2569_p12, %p2566_p11 }
  0x9f   : > { %2574 = shalt.err (!%p2571_p13)
}
  0xa0   : > { %s2575_s22 = scalar_lea.vmem %s514_s15, 512  ;;  %p2583_p7 = scmp.lt.s32.totalorder %s514_s15, %s514_s15 }
  0xa1   : > { %p2576_p0 = scmp.ne.s32.totalorder %s514_s15, %s2575_s22  ;;  %p2584_p9 = scmp.lt.s32.totalorder %s2575_s22, %s2575_s22 }
  0xa3   : > { %p2578_p2 = pnand %p2576_p0, %p3102_p8  ;;  %p2585_p5 = por %p2584_p9, %p2583_p7 }
  0xa5   : > { %p2579_p4 = pneg %p2578_p2 }
  0xa7   : > { %p2586_p10 = pnand %p2585_p5, %p2579_p4 }
  0xa9   : > { %2589 = shalt.err (!%p2586_p10)
}
  0xaa   : > { %s2936_s26 = smov 128   ;;  %s2937_s20 = smov 8  }
  0xab   : > { %2215 = dma.hbm_to_vmem [thread:$0]  (!%p3086_p6), %s3677_s11, 512, %s514_s15, [#allocation29], %s2936_s26, %s2936_s26, %s2937_s20  }
  0xac   : > { %s2938_s1 = smov [#allocation15]   ;;  %s2939_s25 = smov [#allocation18]  }
  0xad   : > { %s409_s21 = sshll.u32 %s2938_s1, 4  ;;  %s430_s27 = sshll.u32 %s2939_s25, 4  ;;  %s410_s21 = int_to_ptr.vmem [resolvable:$true] %s409_s21  ;;  %s3229_s27 = int_to_ptr.vmem [resolvable:$true] %s430_s27 }
  0xae   : > { %s3712_s2 = sld [smem:[#allocation51_spill]] }
  0xb4   : > { %s2590_s29 = scalar_lea.hbm %s3712_s2, 64 }
  0xb5   : > { %p2591_p1 = scmp.ne.s32.totalorder %s3712_s2, %s2590_s29  ;;  %p2597_p12 = scmp.lt.u32.totalorder %s2590_s29, %s3712_s2 }
  0xb7   : > { %p2593_p3 = pnand %p2591_p1, %p3102_p8 }
  0xb9   : > { %p2594_p11 = pneg %p2593_p3 }
  0xbb   : > { %p2599_p13 = pnand %p2597_p12, %p2594_p11 }
  0xbd   : > { %2602 = shalt.err (!%p2599_p13)
}
  0xbe   : > { %s2603_s26 = scalar_lea.vmem %s410_s21, 64  ;;  %p2611_p7 = scmp.lt.s32.totalorder %s410_s21, %s410_s21 }
  0xbf   : > { %p2604_p0 = scmp.ne.s32.totalorder %s410_s21, %s2603_s26  ;;  %p2612_p9 = scmp.lt.s32.totalorder %s2603_s26, %s2603_s26 }
  0xc1   : > { %p2606_p2 = pnand %p2604_p0, %p3102_p8  ;;  %p2613_p5 = por %p2612_p9, %p2611_p7 }
  0xc3   : > { %p2607_p4 = pneg %p2606_p2 }
  0xc5   : > { %p2614_p10 = pnand %p2613_p5, %p2607_p4 }
  0xc7   : > { %2617 = shalt.err (!%p2614_p10)
}
  0xc8   : > { %2188 = dma.hbm_to_vmem [thread:$0]  (!%p3086_p6), %s3712_s2, 64, %s410_s21, [#allocation14]  }
  0xc9   : > { %s2618_s25 = scalar_lea.hbm %s3670_s4, 512 }
  0xca   : > { %p2619_p1 = scmp.ne.s32.totalorder %s3670_s4, %s2618_s25  ;;  %p2625_p12 = scmp.lt.u32.totalorder %s2618_s25, %s3670_s4 }
  0xcc   : > { %p2621_p3 = pnand %p2619_p1, %p3102_p8 }
  0xce   : > { %p2622_p11 = pneg %p2621_p3 }
  0xd0   : > { %p2627_p13 = pnand %p2625_p12, %p2622_p11 }
  0xd2   : > { %2630 = shalt.err (!%p2627_p13)
}
  0xd3   : > { %s2631_s21 = scalar_lea.vmem %s3229_s27, 512  ;;  %p2639_p7 = scmp.lt.s32.totalorder %s3229_s27, %s3229_s27 }
  0xd4   : > { %p2632_p0 = scmp.ne.s32.totalorder %s3229_s27, %s2631_s21  ;;  %p2640_p9 = scmp.lt.s32.totalorder %s2631_s21, %s2631_s21 }
  0xd6   : > { %p2634_p2 = pnand %p2632_p0, %p3102_p8  ;;  %p2641_p5 = por %p2640_p9, %p2639_p7 }
  0xd8   : > { %p2635_p4 = pneg %p2634_p2 }
  0xda   : > { %p2642_p10 = pnand %p2641_p5, %p2635_p4 }
  0xdc   : > { %2645 = shalt.err (!%p2642_p10)
}
  0xdd   : > { %s3713_s28 = smov 64   ;;  %s2940_s19 = smov [#allocation21]  }
  0xde   : > { %2194 = dma.hbm_to_vmem [thread:$0]  (!%p3086_p6), %s3670_s4, 512, %s3229_s27, [#allocation17], %s3713_s28, %s3713_s28, %s2932_s14  }
  0xdf   : > { %s457_s20 = sshll.u32 %s2940_s19, 4  ;;  %s2941_s30 = smov [#allocation24]   ;;  %s458_s20 = int_to_ptr.vmem [resolvable:$true] %s457_s20 }
  0xe0   : > { %s479_s1 = sshll.u32 %s2941_s30, 4  ;;  %s2646_s23 = scalar_lea.hbm %s3672_s6, 16  ;;  %s3275_s1 = int_to_ptr.vmem [resolvable:$true] %s479_s1 }
  0xe1   : > { %p2647_p1 = scmp.ne.s32.totalorder %s3672_s6, %s2646_s23  ;;  %p2653_p12 = scmp.lt.u32.totalorder %s2646_s23, %s3672_s6 }
  0xe3   : > { %p2649_p3 = pnand %p2647_p1, %p3102_p8 }
  0xe5   : > { %p2650_p11 = pneg %p2649_p3 }
  0xe7   : > { %p2655_p13 = pnand %p2653_p12, %p2650_p11 }
  0xe9   : > { %2658 = shalt.err (!%p2655_p13)
}
  0xea   : > { %s2659_s15 = scalar_lea.vmem %s458_s20, 16  ;;  %s2666_s26 = scalar_lea.vmem %s458_s20, 32 }
  0xeb   : > { %p2660_p0 = scmp.ne.s32.totalorder %s458_s20, %s2659_s15  ;;  %p2667_p7 = scmp.lt.s32.totalorder %s458_s20, %s458_s20 }
  0xec   : > { %p2668_p9 = scmp.lt.s32.totalorder %s2666_s26, %s2659_s15 }
  0xed   : > { %p2662_p2 = pnand %p2660_p0, %p3102_p8 }
  0xee   : > { %p2669_p5 = por %p2668_p9, %p2667_p7 }
  0xef   : > { %p2663_p4 = pneg %p2662_p2 }
  0xf1   : > { %p2670_p10 = pnand %p2669_p5, %p2663_p4 }
  0xf3   : > { %2673 = shalt.err (!%p2670_p10)
}
  0xf4   : > { %2200 = dma.hbm_to_vmem [thread:$0]  (!%p3086_p6), %s3672_s6, 16, %s458_s20, [#allocation20]  }
  0xf5   : > { %s2674_s23 = scalar_lea.hbm %s3674_s8, 16 }
  0xf6   : > { %p2675_p1 = scmp.ne.s32.totalorder %s3674_s8, %s2674_s23  ;;  %p2681_p12 = scmp.lt.u32.totalorder %s2674_s23, %s3674_s8 }
  0xf8   : > { %p2677_p3 = pnand %p2675_p1, %p3102_p8 }
  0xfa   : > { %p2678_p11 = pneg %p2677_p3 }
  0xfc   : > { %p2683_p13 = pnand %p2681_p12, %p2678_p11 }
  0xfe   : > { %2686 = shalt.err (!%p2683_p13)
}
  0xff   : > { %s2687_s20 = scalar_lea.vmem %s3275_s1, 16  ;;  %s2694_s15 = scalar_lea.vmem %s3275_s1, 32 }
 0x100   : > { %p2688_p0 = scmp.ne.s32.totalorder %s3275_s1, %s2687_s20  ;;  %p2695_p7 = scmp.lt.s32.totalorder %s3275_s1, %s3275_s1 }
 0x101   : > { %p2696_p9 = scmp.lt.s32.totalorder %s2694_s15, %s2687_s20 }
 0x102   : > { %p2690_p2 = pnand %p2688_p0, %p3102_p8 }
 0x103   : > { %p2697_p5 = por %p2696_p9, %p2695_p7 }
 0x104   : > { %p2691_p4 = pneg %p2690_p2 }
 0x106   : > { %p2698_p10 = pnand %p2697_p5, %p2691_p4 }
 0x108   : > { %2701 = shalt.err (!%p2698_p10)
}
 0x109   : > { %2206 = dma.hbm_to_vmem [thread:$0]  (!%p3086_p6), %s3674_s8, 16, %s3275_s1, [#allocation23]  }
 0x10a   : > { %s2942_s30 = smov [#allocation27]   ;;  %s2943_s16 = smov [#allocation30]  }
 0x10b   : > { %s503_s25 = sshll.u32 %s2942_s30, 4  ;;  %s526_s23 = sshll.u32 %s2943_s16, 4  ;;  %s504_s25 = int_to_ptr.vmem [resolvable:$true] %s503_s25  ;;  %s3319_s23 = int_to_ptr.vmem [resolvable:$true] %s526_s23 }
 0x10c   : > { %s2702_s21 = scalar_lea.hbm %s3676_s10, 16 }
 0x10d   : > { %p2703_p1 = scmp.ne.s32.totalorder %s3676_s10, %s2702_s21  ;;  %p2709_p12 = scmp.lt.u32.totalorder %s2702_s21, %s3676_s10 }
 0x10f   : > { %p2705_p3 = pnand %p2703_p1, %p3102_p8 }
 0x111   : > { %p2706_p11 = pneg %p2705_p3 }
 0x113   : > { %p2711_p13 = pnand %p2709_p12, %p2706_p11 }
 0x115   : > { %2714 = shalt.err (!%p2711_p13)
}
 0x116   : > { %s2715_s26 = scalar_lea.vmem %s504_s25, 16  ;;  %s2722_s19 = scalar_lea.vmem %s504_s25, 32 }
 0x117   : > { %p2716_p0 = scmp.ne.s32.totalorder %s504_s25, %s2715_s26  ;;  %p2723_p7 = scmp.lt.s32.totalorder %s504_s25, %s504_s25 }
 0x118   : > { %p2724_p9 = scmp.lt.s32.totalorder %s2722_s19, %s2715_s26 }
 0x119   : > { %p2718_p2 = pnand %p2716_p0, %p3102_p8 }
 0x11a   : > { %p2725_p5 = por %p2724_p9, %p2723_p7 }
 0x11b   : > { %p2719_p4 = pneg %p2718_p2 }
 0x11d   : > { %p2726_p10 = pnand %p2725_p5, %p2719_p4 }
 0x11f   : > { %2729 = shalt.err (!%p2726_p10)
}
 0x120   : > { %2212 = dma.hbm_to_vmem [thread:$0]  (!%p3086_p6), %s3676_s10, 16, %s504_s25, [#allocation26]  }
 0x121   : > { %s2730_s21 = scalar_lea.hbm %s3678_s12, 1024 }
 0x122   : > { %p2731_p1 = scmp.ne.s32.totalorder %s3678_s12, %s2730_s21  ;;  %p2737_p12 = scmp.lt.u32.totalorder %s2730_s21, %s3678_s12 }
 0x124   : > { %p2733_p3 = pnand %p2731_p1, %p3102_p8 }
 0x126   : > { %p2734_p11 = pneg %p2733_p3 }
 0x128   : > { %p2739_p13 = pnand %p2737_p12, %p2734_p11 }
 0x12a   : > { %2742 = shalt.err (!%p2739_p13)
}
 0x12b   : > { %s2743_s25 = scalar_lea.vmem %s3319_s23, 1024  ;;  %p2751_p7 = scmp.lt.s32.totalorder %s3319_s23, %s3319_s23 }
 0x12c   : > { %p2744_p0 = scmp.ne.s32.totalorder %s3319_s23, %s2743_s25  ;;  %p2752_p9 = scmp.lt.s32.totalorder %s2743_s25, %s2743_s25 }
 0x12e   : > { %p2746_p2 = pnand %p2744_p0, %p3102_p8  ;;  %p2753_p5 = por %p2752_p9, %p2751_p7 }
 0x130   : > { %p2747_p4 = pneg %p2746_p2 }
 0x132   : > { %p2754_p10 = pnand %p2753_p5, %p2747_p4 }
 0x134   : > { %2757 = shalt.err (!%p2754_p10)
}
 0x135   : > { %2218 = dma.hbm_to_vmem [thread:$0]  (!%p3086_p6), %s3678_s12, 1024, %s3319_s23, [#allocation29], %s3713_s28, %s3713_s28, %s2932_s14  }
 0x136   : > { %s2944_s30 = smov [#allocation31]   ;;  %s2758_s21 = scalar_lea.hbm %s3679_s13, 16 }
 0x137   : > { %s540_s16 = sshll.u32 %s2944_s30, 4  ;;  %p2759_p1 = scmp.ne.s32.totalorder %s3679_s13, %s2758_s21  ;;  %s541_s16 = int_to_ptr.vmem [resolvable:$true] %s540_s16 }
 0x138   : > { %p2765_p12 = scmp.lt.u32.totalorder %s2758_s21, %s3679_s13 }
 0x139   : > { %p2761_p3 = pnand %p2759_p1, %p3102_p8 }
 0x13b   : > { %p2762_p11 = pneg %p2761_p3 }
 0x13d   : > { %p2767_p13 = pnand %p2765_p12, %p2762_p11 }
 0x13f   : > { %2770 = shalt.err (!%p2767_p13)
}
 0x140   : > { %s2771_s14 = scalar_lea.vmem %s541_s16, 16  ;;  %s2778_s28 = scalar_lea.vmem %s541_s16, 32 }
 0x141   : > { %p2772_p0 = scmp.ne.s32.totalorder %s541_s16, %s2771_s14  ;;  %p2779_p7 = scmp.lt.s32.totalorder %s541_s16, %s541_s16 }
 0x142   : > { %p2780_p9 = scmp.lt.s32.totalorder %s2778_s28, %s2771_s14 }
 0x143   : > { %p2774_p2 = pnand %p2772_p0, %p3102_p8 }
 0x144   : > { %p2781_p5 = por %p2780_p9, %p2779_p7 }
 0x145   : > { %p2775_p4 = pneg %p2774_p2 }
 0x147   : > { %p2782_p10 = pnand %p2781_p5, %p2775_p4 }
 0x149   : > { %2785 = shalt.err (!%p2782_p10)
}
 0x14a   : > { %s3714_s26 = sld [smem:[#allocation45_spill]]  ;;  %s3715_s19 = sld [smem:[#allocation44_spill]] }
 0x14b   : > { %s3716_s0 = sld [smem:[#allocation43_spill]]  ;;  %s3717_s30 = sld [smem:[#allocation47_spill]] }
 0x14c   : > { %2221 = dma.hbm_to_vmem [thread:$0]  (!%p3086_p6), %s3679_s13, 16, %s541_s16, [#allocation32]  }
 0x14d   : > { %s1939_s29 = sadd.s32 4294967294, %s2926_s18   ;;  %s49_s22 = sadd.s32 1, %s2922_s17 }
 0x14e   : > { %p51_p8 = scmp.ge.s32.totalorder %s49_s22, 2  ;;  %p66_p3 = scmp.eq.s32.totalorder %s2926_s18, 0 }
 0x14f   : > { %s3721_s20 = sadd.s32 4294967295, %s2926_s18   ;;  %p376_p4 = scmp.eq.s32.totalorder %s1939_s29, 1 }
 0x150   : > { %s58_s24 = sadd.s32 1, %s3714_s26  ;;  %p65_p1 = scmp.ne.s32.totalorder %s3714_s26, %s3715_s19 }
 0x151   : > { %p71_p11 = scmp.ne.s32.totalorder %s3715_s19, %s3716_s0  ;;  %s3744_s22 = smov (%p51_p8, %s49_s22), 0 }
 0x152   : > { %p3393_p12 = por %p66_p3, %p65_p1  ;;  %p3719_p13 = scmp.ne.s32.totalorder %s3717_s30, 0 }
 0x153   : > { %s53_s27 = ssub.s32 %s2922_s17, %s3744_s22  ;;  %p370_p0 = scmp.eq.s32.totalorder %s3721_s20, 1 }
 0x154   : > { %p3399_p6 = por %p3719_p13, %p71_p11  ;;  %p56_p2 = scmp.eq.s32.totalorder %s53_s27, 0 }
 0x155   : > { %p3407_p7 = por %p370_p0, %p65_p1  ;;  %p2243_p9 = scmp.lt.s32.totalorder %s2926_s18, 2 }
 0x156   : > { %s3413_s1 = scalar_select %p56_p2, %s3714_s26, %s58_s24  }
 0x157   : > { %s3722_s15 = scalar_select %p3407_p7, 1, 0 }
 0x158   : > { %p3415_p5 = por %p376_p4, %p71_p11  ;;  %s551_s28 = sand.u32 1, %s3714_s26  }
 0x159   : > { %s1955_s23 = sshll.u32 %s551_s28, 3  ;;  %s1956_s25 = sshll.u32 %s2922_s17, 7 }
 0x15a   : > { %s3723_s14 = scalar_select %p3415_p5, 1, 0 }
 0x15b   : > { %s3724_s30 = sld [smem:[#allocation49_spill]]  ;;  %s555_s29 = scalar_lea.vmem [#allocation10], %s1955_s23 }
 0x15c   : > { %s563_s27 = sshll.u32 %s555_s29, 4  ;;  %p3430_p10 = pnand %p2243_p9, %p3393_p12  ;;  %s3426_s27 = int_to_ptr.vmem [resolvable:$true] %s563_s27 }
 0x15d   : > { %s552_s26 = scalar_lea.sflag [#allocation11], %s551_s28 }
 0x15e   : > { %p2788_p1 = pneg %p3430_p10 }
 0x161   : > { %s3725_s2 = smov %s3724_s30  ;;  %s3424_s20 = scalar_lea.hbm %s3724_s30, %s1956_s25 }
 0x162   : > { %s2786_s3 = scalar_lea.hbm %s3424_s20, 128  ;;  %s2791_s19 = scalar_lea.hbm %s3725_s2, 256 }
 0x163   : > { %p2787_p8 = scmp.ne.s32.totalorder %s3424_s20, %s2786_s3  ;;  %p2792_p12 = scmp.lt.u32.totalorder %s3424_s20, %s3725_s2 }
 0x164   : > { %p2793_p13 = scmp.lt.u32.totalorder %s2791_s19, %s2786_s3  ;;  %p2795_p2 = scmp.lt.u32.totalorder %s2786_s3, %s3424_s20 }
 0x165   : > { %p2789_p3 = pnand %p2788_p1, %p2787_p8 }
 0x166   : > { %p2794_p0 = por %p2793_p13, %p2792_p12 }
 0x167   : > { %p2790_p11 = pneg %p2789_p3 }
 0x168   : > { %p2796_p4 = por %p2795_p2, %p2794_p0 }
 0x16a   : > { %p2797_p9 = pnand %p2796_p4, %p2790_p11 }
 0x16c   : > { %2800 = shalt.err (!%p2797_p9)
}
 0x16d   : > { %s2801_s28 = scalar_lea.vmem %s3426_s27, 128  ;;  %s2945_s30 = smov [#allocation10]  }
 0x16e   : > { %p2802_p8 = scmp.ne.s32.totalorder %s3426_s27, %s2801_s28  ;;  %s2806_s29 = sshll.u32 %s2945_s30, 4  ;;  %s2807_s29 = int_to_ptr.vmem [resolvable:$false] %s2806_s29 }
 0x16f   : > { %s2808_s23 = scalar_lea.vmem %s2807_s29, 256  ;;  %p2809_p7 = scmp.lt.s32.totalorder %s3426_s27, %s2807_s29 }
 0x170   : > { %p2804_p3 = pnand %p2802_p8, %p2788_p1  ;;  %p2810_p12 = scmp.lt.s32.totalorder %s2808_s23, %s2801_s28 }
 0x172   : > { %p2805_p5 = pneg %p2804_p3  ;;  %p2811_p13 = por %p2810_p12, %p2809_p7 }
 0x174   : > { %p2812_p0 = pnand %p2811_p13, %p2805_p5 }
 0x176   : > { %2815 = shalt.err (!%p2812_p0)
}
 0x177   : > { %2225 = dma.hbm_to_vmem [thread:$0]  (!%p3430_p10), %s3424_s20, 128, %s3426_s27, %s552_s26  }
 0x178   : > { %s3727_s3 = sld [smem:[#allocation48_spill]] }
 0x17e   : > { %p3728_p11 = scmp.ne.s32.totalorder %s3727_s3, 0 }
 0x17f   : > { %s3729_s25 = sld [smem:[#allocation44_spill]] (!%p3728_p11) }
 0x180   : > { %572 = sbr.rel (%p3728_p11) target bundleno = 2359 (0x937), region = 76 }
 0x185   : > { %s3462_s19 = sand.u32 (!%p3728_p11), 1, %s3729_s25  }
 0x186   : > { %s1958_s21 = sshll.u32 (!%p3728_p11), %s3462_s19, 3  ;;  %s575_s0 = scalar_lea.sflag (!%p3728_p11), [#allocation11], %s3462_s19 }
 0x187   : > { %s578_s28 = scalar_lea.vmem [#allocation10], %s1958_s21 }
 0x188   : > { %2869 = dma.done.wait (%p3399_p6), %s575_s0, 128  }
 0x189   : > { %2871 = vsyncadd (%p3399_p6), %s575_s0, 4294967168  ;;  %s3730_s20 = sld [smem:[#allocation47_spill]] }
 0x18f   : > { %p3731_p7 = scmp.ne.s32.totalorder %s3730_s20, 0 }
 0x191   : > { %2873 = dma.done.wait (%p3731_p7), [#allocation14], 320  }
 0x192   : > { %2875 = vsyncadd (%p3731_p7), [#allocation14], 4294966976 }
 0x193   : > { %2877 = dma.done.wait (%p3731_p7), [#allocation17], 528  }
 0x194   : > { %2879 = vsyncadd (%p3731_p7), [#allocation17], 4294966768 }
 0x195   : > { %2881 = dma.done.wait (%p3731_p7), [#allocation20], 1040  }
 0x196   : > { %2883 = vsyncadd (%p3731_p7), [#allocation20], 4294966256 }
 0x197   : > { %2885 = dma.done.wait (%p3731_p7), [#allocation23], 144  }
 0x198   : > { %2887 = vsyncadd (%p3731_p7), [#allocation23], 4294967152 }
 0x199   : > { %2889 = dma.done.wait (%p3731_p7), [#allocation26], 528  }
 0x19a   : > { %2891 = vsyncadd (%p3731_p7), [#allocation26], 4294966768 }
 0x19b   : > { %2893 = dma.done.wait (%p3731_p7), [#allocation29], 1536  }
 0x19c   : > { %2895 = vsyncadd (%p3731_p7), [#allocation29], 4294965760 }
 0x19d   : > { %2897 = dma.done.wait (%p3731_p7), [#allocation32], 16  }
 0x19e   : > { %2899 = vsyncadd (%p3731_p7), [#allocation32], 4294967280  ;;  %vm680_vm0 = vcmask 518144   ;;  %v2946_v0 = vmov 0.0   ;;  %vm2947_vm1 = vmmov 0   ;;  %vm682_vm2 = vcmask 523264  }
 0x19f   : > { %2054 = vmatprep.subr.bf16.mxu1 %v2946_v0  ;;  %2058 = vmatprep.mubr.msk.bf16.mxu1 %vm2947_vm1, %v2946_v0  ;;  %681 = vst.msk [vmem:[#allocation3] sm:$0x7] %vm680_vm0, %v2946_v0  ;;  %v2353_v1 = vld [vmem:[#allocation13] sm:$0xff]   ;;  %v2354_v2 = vld [vmem:[#allocation13 + $0x8] sm:$0xff]   ;;  %v3510_v3 = vld [vmem:[%s578_s28] sm:$0xff]  ;;  %vm702_vm3 = vcmask 261120  }
 0x1a0   : > { %683 = vst.msk [vmem:[#allocation4] sm:$0xff] %vm682_vm2, %v2946_v0  ;;  %2074 = vmatprep.subr.bf16.mxu0 %v2946_v0  ;;  %2090 = vmatprep.mubr.msk.bf16.mxu0 %vm2947_vm1, %v2946_v0  ;;  %v685_v4 = vpack.c.bf16 %v3510_v3, %v3510_v3  ;;  %v2355_v6 = vld [vmem:[#allocation18] sm:$0xff]   ;;  %v2356_v7 = vld [vmem:[#allocation18 + $0x8] sm:$0xff]   ;;  %v2357_v8 = vld [vmem:[#allocation18 + $0x10] sm:$0xff]   ;;  %vm797_vm4 = vcmask 523269   ;;  %s2948_s16 = smov 126  }
 0x1a1   : > { %2055 = vmatpush3.bf16.msra.mxu1 %v2353_v1  ;;  %v2358_v9 = vld [vmem:[#allocation18 + $0x18] sm:$0xff]   ;;  %v2359_v10 = vld [vmem:[#allocation19] sm:$0xff]   ;;  %v2360_v11 = vld [vmem:[#allocation19 + $0x8] sm:$0xff]   ;;  %s2949_s27 = smov 118   ;;  %vm1011_vm5 = vcmask 64512   ;;  %v2950_v53 = vmov 0  }
 0x1a2   : > { %2056 = vmatprep.subr.bf16.mxu1 %v2946_v0  ;;  %2075 = vmatpush3.bf16.msra.mxu0 %v2359_v10  ;;  %v2361_v12 = vld [vmem:[#allocation19 + $0x10] sm:$0xff]   ;;  %v2362_v13 = vld [vmem:[#allocation19 + $0x18] sm:$0xff]   ;;  %v2363_v14 = vld [vmem:[#allocation19 + $0x20] sm:$0xff]   ;;  %v2951_v55 = vmov 1   ;;  %s2958_s24 = smov 64   ;;  %vm1388_vm8 = vcmask 1040384  }
 0x1a3   : > { %2076 = vmatprep.subr.bf16.mxu0 %v2946_v0  ;;  %v2364_v15 = vld [vmem:[#allocation19 + $0x28] sm:$0xff]   ;;  %v2365_v16 = vld [vmem:[#allocation19 + $0x30] sm:$0xff]   ;;  %v1976_v21 = vld [vmem:[#allocation15] ss:$0 sm:$0xff]  ;;  %2337 = vset.pattern.permute.xlu0 %v2950_v53  ;;  %vm1390_vm9 = vcmask 1041408   ;;  %vm1392_vm10 = vcmask 1042432  }
 0x1a4   : > { %v1978_v22 = vld [vmem:[#allocation15 + $0x1] ss:$0 sm:$0xff]  ;;  %v1977_v23 = vld [vmem:[#allocation16] ss:$0 sm:$0xff]  ;;  %v1979_v28 = vld [vmem:[#allocation15 + $0x2] ss:$0 sm:$0xff] }
 0x1a5   : > { %2057 = vmatpush3.bf16.msra.mxu1 %v2354_v2  ;;  %v1980_v32 = vld [vmem:[#allocation15 + $0x3] ss:$0 sm:$0xff]  ;;  %v1987_v56 = vld [vmem:[#allocation21] ss:$0 sm:$0xff]  ;;  %vm1394_vm11 = vcmask 1043456   ;;  %vm1396_vm12 = vcmask 1044480  }
 0x1a6   : > { %2062 = vmatprep.subr.bf16.mxu1 %v2946_v0  ;;  %v746_v5 = vld [vmem:[#allocation3] sm:$0x7]  ;;  %2077 = vmatpush3.bf16.msra.mxu0 %v2360_v11  ;;  %v2366_v44 = vld [vmem:[#allocation19 + $0x38] sm:$0xff]   ;;  %vm1398_vm13 = vcmask 1045504   ;;  %vm1400_vm14 = vcmask 1046528   ;;  %s3732_s26 = sld [smem:[#allocation46_spill]] }
 0x1a7   : > { %748 = vst.msk [vmem:[#allocation2 + $0x5] sm:$0x7] %vm680_vm0, %v746_v5  ;;  %2078 = vmatprep.subr.bf16.mxu0 %v2946_v0  ;;  %s674_s29 = scalar_lea.vmem [#allocation33], %s1958_s21  ;;  %s3733_s0 = sld [smem:[#allocation53_spill]] }
 0x1a8   : > { %2059 = vmatmul.mubr.msk.bf16.vlgmr.msra.gmra.mrb[0].mxu1 %vm702_vm3, %v685_v4  ;;  %s1734_s23 = sshll.u32 %s674_s29, 4  ;;  %s1720_s20 = scalar_lea.sflag [#allocation12], %s3462_s19  ;;  %s3618_s23 = int_to_ptr.vmem [resolvable:$true] %s1734_s23 }
 0x1a9   : > { %2070 = vmatprep.mubr.msk.bf16.mxu1 %vm2947_vm1, %v2946_v0  ;;  %2063 = vmatpush3.bf16.msra.mxu1 %v2355_v6  ;;  %p3734_p5 = scmp.ne.s32.totalorder %s3722_s15, 0  ;;  %s2960_s21 = smov [#allocation33]  }
 0x1aa   : > { %2064 = vmatprep.subr.bf16.mxu1 %v2946_v0  ;;  %2079 = vmatpush3.bf16.msra.mxu0 %v2361_v12 }
 0x1ab   : > { %2080 = vmatprep.subr.bf16.mxu0 %v2946_v0 }
 0x1ac   : > { %s2020_s30 = sshll.u32 %s3732_s26, 7 }
 0x1ad   : > { %2065 = vmatpush3.bf16.msra.mxu1 %v2356_v7  ;;  %s3616_s28 = scalar_lea.hbm %s3733_s0, %s2020_s30 }
 0x1ae   : > { %2066 = vmatprep.subr.bf16.mxu1 %v2946_v0  ;;  %2081 = vmatpush3.bf16.msra.mxu0 %v2362_v13 }
 0x1af   : > { %2082 = vmatprep.subr.bf16.mxu0 %v2946_v0 }
 0x1b1   : > { %2067 = vmatpush3.bf16.msra.mxu1 %v2357_v8 }
 0x1b2   : > { %2068 = vmatprep.subr.bf16.mxu1 %v2946_v0  ;;  %2083 = vmatpush3.bf16.msra.mxu0 %v2363_v14 }
 0x1b3   : > { %2084 = vmatprep.subr.bf16.mxu0 %v2946_v0 }
 0x1b5   : > { %2069 = vmatpush3.bf16.msra.mxu1 %v2358_v9 }
 0x1b6   : > { %2094 = vmatprep.subr.bf16.mxu1 %v2946_v0  ;;  %2085 = vmatpush3.bf16.msra.mxu0 %v2364_v15 }
 0x1b7   : > { %2086 = vmatprep.subr.bf16.mxu0 %v2946_v0 }
 0x1ba   : > { %2087 = vmatpush3.bf16.msra.mxu0 %v2365_v16 }
 0x1bb   : > { %2088 = vmatprep.subr.bf16.mxu0 %v2946_v0 }
 0x1be   : > { %2089 = vmatpush3.bf16.msra.mxu0 %v2366_v44  ;;  %v3555_v44 = vld [vmem:[#allocation22] sm:$0xff] }
 0x1bf   : > { %2106 = vmatprep.subr.bf16.mxu0 %v2946_v0 }
 0x27b   : > { %v3531_v17 = vpop.f32.mrb[0].mxu1 }
 0x27c   : > { %750 = vst.msk [vmem:[#allocation2 + $0x8] sm:$0xff] %vm682_vm2, %v3531_v17  ;;  %v2060_v18 = vpop.f32.mrb[1].mxu1  ;;  %v1997_v16 = vmul.f32 -1.442695, %v3531_v17 }
 0x27d   : > { %798 = vst.msk [vmem:[#allocation3 - $0x5] sm:$0xe0] %vm797_vm4, %v3531_v17  ;;  %v743_v19 = vpop.f32.mrb[2].mxu1  ;;  %v2952_v18 = vmov 2  }
 0x27e   : > { %v2061_v20 = vpop.f32.mrb[3].mxu1  ;;  %v2953_v19 = vmov 5  }
 0x283   : > { %v752_v24 = vld [vmem:[#allocation2 + $0x5] sm:$0xff] }
 0x284   : > { %v766_v25 = vld [vmem:[#allocation2 + $0x6] sm:$0xff]  ;;  %v758_v26 = vmul.f32 %v1976_v21, %v752_v24  ;;  %v2954_v21 = vmov 3   ;;  %v2956_v24 = vmov 6  }
 0x285   : > { %v774_v27 = vld [vmem:[#allocation2 + $0x7] sm:$0xff]  ;;  %v772_v30 = vmul.f32 %v1978_v22, %v766_v25  ;;  %v2955_v22 = vmov 4  }
 0x286   : > { %v765_v29 = vadd.f32 %v1977_v23, %v758_v26  ;;  %v782_v31 = vld [vmem:[#allocation2 + $0x8] sm:$0xff]  ;;  %v780_v34 = vmul.f32 %v1979_v28, %v774_v27  ;;  %v2957_v26 = vmov 7  }
 0x287   : > { %v788_v36 = vmul.f32 %v1980_v32, %v782_v31  ;;  %v2370_v31 = vld [vmem:[#allocation25 + $0x10] sm:$0xff]   ;;  %v2371_v32 = vld [vmem:[#allocation25 + $0x18] sm:$0xff]  }
 0x288   : > { %v773_v33 = vadd.f32 %v772_v30, %v765_v29  ;;  %v2368_v29 = vld [vmem:[#allocation25] sm:$0xff]   ;;  %v2369_v30 = vld [vmem:[#allocation25 + $0x8] sm:$0xff]  }
 0x28a   : > { %v781_v35 = vadd.f32 %v780_v34, %v773_v33  ;;  %v1026_v33 = vlaneseq  ;;  %v2959_v34 = vmov 1966171168  }
 0x28c   : > { %v789_v37 = vadd.f32 %v788_v36, %v781_v35  ;;  %v1024_v35 = vunpack.c.l.s4 %v2959_v34 }
 0x28e   : > { %v1981_v38 = vmul.f32 -1.442695, %v789_v37  ;;  %v1025_v36 = vunpack.c.0.s8 %v1024_v35 }
 0x290   : > { %2386 = vpow2.f32 %v1981_v38 }
 0x29a   : > { %v2387_v39 = vpop.eup %2386 }
 0x29b   : > { %v793_v40 = vadd.f32 1.0, %v2387_v39 }
 0x29d   : > { %2388 = vrcp.f32 %v793_v40 }
 0x2a7   : > { %v2389_v41 = vpop.eup %2388 }
 0x2a8   : > { %v796_v42 = vmul.f32 %v2389_v41, %v789_v37 }
 0x2aa   : > { %v799_v43 = vpack.c.bf16 %v796_v42, %v796_v42  ;;  %1006 = vst.msk [vmem:[#allocation6] sm:$0xff] %vm682_vm2, %v796_v42 }
 0x2ac   : > { %2071 = vmatmul.mubr.msk.bf16.vlgmr.msra.gmra.mrb[4].mxu1 %vm682_vm2, %v799_v43 }
 0x2ad   : > { %2102 = vmatprep.mubr.msk.bf16.mxu1 %vm2947_vm1, %v2946_v0  ;;  %2095 = vmatpush3.bf16.msra.mxu1 %v2368_v29 }
 0x2ae   : > { %2096 = vmatprep.subr.bf16.mxu1 %v2946_v0 }
 0x2b1   : > { %2097 = vmatpush3.bf16.msra.mxu1 %v2369_v30 }
 0x2b2   : > { %2098 = vmatprep.subr.bf16.mxu1 %v2946_v0 }
 0x2b5   : > { %2099 = vmatpush3.bf16.msra.mxu1 %v2370_v31 }
 0x2b6   : > { %2100 = vmatprep.subr.bf16.mxu1 %v2946_v0 }
 0x2b9   : > { %2101 = vmatpush3.bf16.msra.mxu1 %v2371_v32 }
 0x37f   : > { %v869_v45 = vpop.f32.mrb[4].mxu1 }
 0x380   : > { %v875_v46 = vpack.c.bf16 %v869_v45, %v869_v45  ;;  %1008 = vrot.lane.b32.xlu0 %v869_v45, %s2948_s16  ;;  %v2072_v47 = vpop.f32.mrb[5].mxu1  ;;  %s2816_s16 = scalar_lea.vmem %s3618_s23, 128 }
 0x381   : > { %v872_v48 = vpop.f32.mrb[6].mxu1  ;;  %p2817_p6 = scmp.ne.s32.totalorder %s3618_s23, %s2816_s16 }
 0x382   : > { %v2073_v49 = vpop.f32.mrb[7].mxu1  ;;  %2091 = vmatmul.mubr.bf16.vlgmr.msra.gmra.mrb[0].mxu0 %v875_v46 }
 0x383   : > { %2122 = vmatprep.mubr.msk.bf16.mxu0 %vm2947_vm1, %v2946_v0  ;;  %p2818_p10 = pnand %p2817_p6, %p3734_p5 }
 0x384   : > { %1013 = vrot.lane.b32.xlu0 %v869_v45, %s2949_s27  ;;  %s2820_s27 = sshll.u32 %s2960_s21, 4  ;;  %s2821_s27 = int_to_ptr.vmem [resolvable:$false] %s2820_s27 }
 0x385   : > { %p2819_p1 = pneg %p2818_p10  ;;  %p2823_p2 = scmp.lt.s32.totalorder %s3618_s23, %s2821_s27 }
 0x3f2   : > { %v1009_v50 = vpop.permute.xlu0 %1008 }
 0x3f3   : > { %1012 = vst.msk [vmem:[#allocation7] sm:$0xff] %vm1011_vm5, %v1009_v50 }
 0x3f6   : > { %v1014_v51 = vpop.permute.xlu0 %1013 }
 0x3f7   : > { %1016 = vst.msk [vmem:[#allocation8] sm:$0xff] %vm1011_vm5, %v1014_v51 }
 0x3fa   : > { %v1136_v52 = vld [vmem:[#allocation7] sm:$0xff] }
 0x3fb   : > { %1137 = vxpose.xlu1.b32.start.end [1/1] (short) (narrow) %v1136_v52, 8 }
 0x3fe   : > { %v1169_v54 = vld [vmem:[#allocation8] sm:$0xff] }
 0x3ff   : > { %1170 = vxpose.xlu1.b32.start.end [1/1] (short) (narrow) %v1169_v54, 8 }
 0x41d   : > { %2338 = vset.pattern.permute.xlu1 %v2951_v55 }
 0x455   : > { %v981_v57 = vpop.f32.mrb[0].mxu0 }
 0x456   : > { %v982_v58 = vadd.f32 %v1987_v56, %v981_v57  ;;  %v2092_v59 = vpop.f32.mrb[1].mxu0 }
 0x457   : > { %v984_v60 = vpop.f32.mrb[2].mxu0 }
 0x458   : > { %v990_v61 = vand.u32 2147483647, %v982_v58  ;;  %v2093_v62 = vpop.f32.mrb[3].mxu0  ;;  %v987_v11 = vmax.f32 %v982_v58, 0.0  ;;  %vm988_vm7 = vcmp.ne.f32.partialorder %v982_v58, %v982_v58 }
 0x459   : > { %v3560_v62 = vld [vmem:[#allocation6] sm:$0xff] }
 0x45a   : > { %v991_v63 = vsub.f32 0.0, %v990_v61 }
 0x45c   : > { %v992_v1 = vmul.f32 1.442695, %v991_v63 }
 0x45e   : > { %2390 = vpow2.f32 %v992_v1 }
 0x468   : > { %v2391_v2 = vpop.eup %2390 }
 0x469   : > { %v994_v4 = vadd.f32 1.0, %v2391_v2  ;;  %v997_v5 = vmul.f32 -0.5, %v2391_v2  ;;  %v1000_v7 = vand.u32 2147483647, %v2391_v2 }
 0x46b   : > { %2392 = vlog2.f32 %v994_v4  ;;  %v998_v6 = vadd.f32 1.0, %v997_v5  ;;  %vm1001_vm6 = vcmp.lt.f32.partialorder %v1000_v7, 0.0004427343  ;;  %v1018_v7 = vld [vmem:[#allocation4] sm:$0xff] }
 0x46c   : > { %2394 = vpow2.f32 %v1997_v16 }
 0x46d   : > { %v999_v10 = vmul.f32 %v2391_v2, %v998_v6 }
 0x475   : > { %v2393_v8 = vpop.eup %2392 }
 0x476   : > { %v996_v9 = vmul.f32 0.6931472, %v2393_v8  ;;  %v2395_v23 = vpop.eup %2394 }
 0x477   : > { %v1418_v25 = vadd.f32 1.0, %v2395_v23 }
 0x478   : > { %v1002_v12 = vsel %vm1001_vm6, %v999_v10, %v996_v9 }
 0x479   : > { %v1003_v13 = vadd.f32 %v1002_v12, %v987_v11  ;;  %2396 = vrcp.f32 %v1418_v25 }
 0x47b   : > { %v1004_v14 = vsel %vm988_vm7, %v982_v58, %v1003_v13  ;;  %v1153_v15 = vpop.trf.xlu1 }
 0x47c   : > { %1005 = vst.msk [vmem:[#allocation5] sm:$0xff] %vm682_vm2, %v1004_v14  ;;  %1205 = vperm.xlu0 %2337, %v1153_v15   ;;  %1229 = vperm.xlu1 %2338, %v1153_v15  }
 0x47f   : > { %v1186_v20 = vpop.trf.xlu1 }
 0x480   : > { %2339 = vset.pattern.permute.xlu0 %v2952_v18  ;;  %2342 = vset.pattern.permute.xlu1 %v2953_v19 }
 0x481   : > { %1252 = vperm.xlu0 %2339, %v1153_v15   ;;  %1321 = vperm.xlu1 %2342, %v1153_v15  }
 0x483   : > { %v2397_v27 = vpop.eup %2396  ;;  %v1019_v38 = vld [vmem:[#allocation5] sm:$0xff] }
 0x484   : > { %v1421_v28 = vmul.f32 %v2397_v27, %v3531_v17  ;;  %v3551_v17 = vshrl.u32 %v1026_v33, 7  ;;  %v1022_v47 = vcombine.high %v1019_v38, %v1019_v38  ;;  %v3564_v4 = vmul.f32 %v3560_v62, %v1019_v38 }
 0x485   : > { %2340 = vset.pattern.permute.xlu0 %v2954_v21  ;;  %2344 = vset.pattern.permute.xlu1 %v2950_v53 }
 0x486   : > { %1275 = vperm.xlu0 %2340, %v1153_v15   ;;  %1216 = vperm.xlu1 %2344, %v1186_v20   ;;  %v1028_v37 = vsub.s32 %v1025_v36, %v3551_v17  ;;  %v1073_v41 = vsub.s32 0, %v3551_v17  ;;  %v1234_v11 = vsub.s32 1, %v3551_v17  ;;  %v1280_v35 = vsub.s32 3, %v3551_v17 }
 0x488   : > { %v1029_v39 = vrot.slane %v1019_v38, %v1028_v37  ;;  %v1036_v51 = vrot.slane %v1022_v47, %v1028_v37  ;;  %v1211_v12 = vrot.slane %v3564_v4, %v1073_v41 }
 0x48a   : > { %2341 = vset.pattern.permute.xlu0 %v2955_v22  ;;  %2345 = vset.pattern.permute.xlu1 %v2951_v55  ;;  %v1045_v40 = vrot.slane %v1029_v39, %v1028_v37  ;;  %v1037_v42 = vcombine.high %v1029_v39, %v1029_v39  ;;  %v1052_v56 = vrot.slane %v1036_v51, %v1028_v37 }
 0x48b   : > { %1298 = vperm.xlu0 %2341, %v1153_v15   ;;  %1239 = vperm.xlu1 %2345, %v1186_v20   ;;  %v1038_v60 = vcombine.high %v1036_v51, %v1036_v51 }
 0x48c   : > { %v1074_v43 = vrot.slane %v1045_v40, %v1073_v41  ;;  %v1059_v45 = vrot.slane %v1037_v42, %v1028_v37  ;;  %v1067_v49 = vcombine.high %v1045_v40, %v1045_v40  ;;  %v1090_v61 = vrot.slane %v1052_v56, %v1073_v41 }
 0x48d   : > { %v1066_v2 = vrot.slane %v1038_v60, %v1028_v37  ;;  %v1068_v5 = vcombine.high %v1052_v56, %v1052_v56  ;;  %v1303_v42 = vsub.s32 4, %v3551_v17 }
 0x48e   : > { %v1111_v46 = vmul.f32 %v1074_v43, %v3555_v44  ;;  %v1078_v48 = vrot.slane %v1059_v45, %v1073_v41  ;;  %v1082_v54 = vrot.slane %v1067_v49, %v1073_v41  ;;  %v1069_v55 = vcombine.high %v1059_v45, %v1059_v45 }
 0x48f   : > { %2343 = vset.pattern.permute.xlu0 %v2956_v24  ;;  %2347 = vset.pattern.permute.xlu1 %v2954_v21  ;;  %v1115_v9 = vmul.f32 %v1090_v61, %v3555_v44  ;;  %v1094_v10 = vrot.slane %v1066_v2, %v1073_v41  ;;  %v1070_v21 = vcombine.high %v1066_v2, %v1066_v2 }
 0x490   : > { %1344 = vperm.xlu0 %2343, %v1153_v15   ;;  %1285 = vperm.xlu1 %2347, %v1186_v20   ;;  %v1119_v50 = vmul.f32 1.442695, %v1111_v46  ;;  %v1112_v52 = vmul.f32 %v1078_v48, %v3555_v44  ;;  %v1113_v58 = vmul.f32 %v1082_v54, %v3555_v44  ;;  %v1086_v59 = vrot.slane %v1069_v55, %v1073_v41 }
 0x491   : > { %v1102_v32 = vrot.slane %v1070_v21, %v1073_v41  ;;  %v1304_v51 = vrot.slane %v3564_v4, %v1303_v42  ;;  %v1326_v54 = vsub.s32 5, %v3551_v17 }
 0x492   : > { %2398 = vpow2.f32 %v1119_v50  ;;  %v1121_v57 = vmul.f32 1.442695, %v1112_v52  ;;  %v1123_v63 = vmul.f32 1.442695, %v1113_v58  ;;  %v1114_v1 = vmul.f32 %v1086_v59, %v3555_v44 }
 0x493   : > { %v1118_v45 = vmul.f32 %v1102_v32, %v3555_v44  ;;  %v1327_v2 = vrot.slane %v3564_v4, %v1326_v54 }
 0x494   : > { %2346 = vset.pattern.permute.xlu0 %v2952_v18  ;;  %2348 = vset.pattern.permute.xlu1 %v2957_v26  ;;  %2400 = vpow2.f32 %v1121_v57  ;;  %v1125_v8 = vmul.f32 1.442695, %v1114_v1  ;;  %v1098_v18 = vrot.slane %v1068_v5, %v1073_v41  ;;  %v1281_v41 = vrot.slane %v3564_v4, %v1280_v35 }
 0x495   : > { %1262 = vperm.xlu0 %2346, %v1186_v20   ;;  %1367 = vperm.xlu1 %2348, %v1153_v15   ;;  %2402 = vpow2.f32 %v1123_v63  ;;  %v1133_v52 = vmul.f32 1.442695, %v1118_v45 }
 0x496   : > { %2404 = vpow2.f32 %v1125_v8  ;;  %v1117_v31 = vmul.f32 %v1098_v18, %v3555_v44 }
 0x498   : > { %v1131_v43 = vmul.f32 1.442695, %v1117_v31 }
 0x499   : > { %2349 = vset.pattern.permute.xlu0 %v2955_v22  ;;  %2350 = vset.pattern.permute.xlu1 %v2953_v19  ;;  %v1127_v19 = vmul.f32 1.442695, %v1115_v9  ;;  %v1235_v22 = vrot.slane %v3564_v4, %v1234_v11 }
 0x49a   : > { %1308 = vperm.xlu0 %2349, %v1186_v20   ;;  %1331 = vperm.xlu1 %2350, %v1186_v20  }
 0x49b   : > { %2406 = vpow2.f32 %v1127_v19 }
 0x49c   : > { %v2399_v6 = vpop.eup %2398 }
 0x49d   : > { %v1202_v15 = vmul.f32 %v2399_v6, %v1018_v7  ;;  %v1349_v7 = vsub.s32 6, %v3551_v17 }
 0x49e   : > { %2352 = vset.pattern.permute.xlu0 %v2957_v26  ;;  %2351 = vset.pattern.permute.xlu1 %v2956_v24  ;;  %v1257_v24 = vsub.s32 2, %v3551_v17  ;;  %v2401_v25 = vpop.eup %2400 }
 0x49f   : > { %1377 = vperm.xlu0 %2352, %v1186_v20   ;;  %1354 = vperm.xlu1 %2351, %v1186_v20   ;;  %v1116_v20 = vmul.f32 %v1094_v10, %v3555_v44  ;;  %v2403_v36 = vpop.eup %2402  ;;  %v1350_v18 = vrot.slane %v3564_v4, %v1349_v7 }
 0x4a0   : > { %v1258_v34 = vrot.slane %v3564_v4, %v1257_v24  ;;  %v2405_v48 = vpop.eup %2404 }
 0x4a1   : > { %v1129_v30 = vmul.f32 1.442695, %v1116_v20 }
 0x4a3   : > { %1423 = vrot.lane.b32.xlu1 %v1421_v28, %s2958_s24  ;;  %2408 = vpow2.f32 %v1129_v30  ;;  %s2822_s24 = scalar_lea.vmem %s2821_s27, 256 }
 0x4a4   : > { %2410 = vpow2.f32 %v1131_v43  ;;  %p2824_p4 = scmp.lt.s32.totalorder %s2822_s24, %s2816_s16 }
 0x4a5   : > { %v2407_v59 = vpop.eup %2406  ;;  %2412 = vpow2.f32 %v1133_v52 }
 0x4a6   : > { %p2825_p9 = por %p2824_p4, %p2823_p2 }
 0x4a8   : > { %p2826_p8 = pnand %p2825_p9, %p2819_p1 }
 0x4ad   : > { %v2409_v8 = vpop.eup %2408 }
 0x4ae   : > { %v2411_v20 = vpop.eup %2410 }
 0x4af   : > { %v2413_v32 = vpop.eup %2412 }
 0x4fb   : > { %v1230_v13 = vpop.permute.xlu1 %1229  ;;  %v1206_v14 = vpop.permute.xlu0 %1205 }
 0x4fc   : > { %v1212_v16 = vmul.f32 %v1211_v12, %v1206_v14  ;;  %v1236_v26 = vmul.f32 %v1235_v22, %v1230_v13  ;;  %v1372_v22 = vsub.s32 7, %v3551_v17 }
 0x4fe   : > { %v1213_v23 = vadd.f32 %v1212_v16, %v1202_v15 }
 0x500   : > { %v1227_v27 = vmul.f32 %v2401_v25, %v1213_v23  ;;  %v1322_v28 = vpop.permute.xlu1 %1321  ;;  %v1253_v29 = vpop.permute.xlu0 %1252 }
 0x501   : > { %v1259_v38 = vmul.f32 %v1258_v34, %v1253_v29  ;;  %v1328_v11 = vmul.f32 %v1327_v2, %v1322_v28 }
 0x502   : > { %v1237_v33 = vadd.f32 %v1236_v26, %v1227_v27 }
 0x504   : > { %v1250_v37 = vmul.f32 %v2403_v36, %v1237_v33 }
 0x505   : > { %v1217_v39 = vpop.permute.xlu1 %1216  ;;  %v1276_v40 = vpop.permute.xlu0 %1275 }
 0x506   : > { %v1260_v46 = vadd.f32 %v1259_v38, %v1250_v37  ;;  %v1219_v47 = vmul.f32 %v1217_v39, %v1213_v23  ;;  %v1282_v50 = vmul.f32 %v1281_v41, %v1276_v40 }
 0x508   : > { %v1273_v49 = vmul.f32 %v2405_v48, %v1260_v46  ;;  %v1220_v55 = vsel %vm682_vm2, %v1219_v47, 0.0 }
 0x509   : > { %v1221_v63 = vrot.slane %v1220_v55, 4 }
 0x50a   : > { %v1283_v56 = vadd.f32 %v1282_v50, %v1273_v49  ;;  %v1240_v57 = vpop.permute.xlu1 %1239  ;;  %v1299_v58 = vpop.permute.xlu0 %1298 }
 0x50b   : > { %v1242_v44 = vmul.f32 %v1240_v57, %v1237_v33  ;;  %v1305_v60 = vmul.f32 %v1304_v51, %v1299_v58  ;;  %v1222_v15 = vadd.f32 %v1221_v63, %v1220_v55  ;;  %v1373_v33 = vrot.slane %v3564_v4, %v1372_v22 }
 0x50c   : > { %v1296_v61 = vmul.f32 %v2407_v59, %v1283_v56 }
 0x50d   : > { %v1243_v1 = vsel %vm682_vm2, %v1242_v44, 0.0  ;;  %v1223_v29 = vrot.slane %v1222_v15, 2 }
 0x50e   : > { %v1244_v5 = vrot.slane %v1243_v1, 4  ;;  %v1306_v6 = vadd.f32 %v1305_v60, %v1296_v61 }
 0x50f   : > { %v1286_v9 = vpop.permute.xlu1 %1285  ;;  %v1345_v10 = vpop.permute.xlu0 %1344  ;;  %v1224_v38 = vadd.f32 %v1223_v29, %v1222_v15 }
 0x510   : > { %v1245_v12 = vadd.f32 %v1244_v5, %v1243_v1  ;;  %v1288_v13 = vmul.f32 %v1286_v9, %v1283_v56  ;;  %v1319_v14 = vmul.f32 %v2409_v8, %v1306_v6  ;;  %v1351_v24 = vmul.f32 %v1350_v18, %v1345_v10 }
 0x511   : > { %v1225_v52 = vrot.slane %v1224_v38, 1 }
 0x512   : > { %v1289_v16 = vsel %vm682_vm2, %v1288_v13, 0.0  ;;  %v1329_v19 = vadd.f32 %v1328_v11, %v1319_v14  ;;  %v1246_v23 = vrot.slane %v1245_v12, 2 }
 0x513   : > { %v1290_v21 = vrot.slane %v1289_v16, 4  ;;  %v1226_v10 = vadd.f32 %v1225_v52, %v1224_v38  ;;  %v2375_v52 = vld [vmem:[#allocation28 + $0x10] ss:$8 sps:$4 sm:$0xff]  }
 0x514   : > { %v1368_v25 = vpop.permute.xlu1 %1367  ;;  %v1263_v26 = vpop.permute.xlu0 %1262  ;;  %v1342_v27 = vmul.f32 %v2411_v20, %v1329_v19  ;;  %v1247_v35 = vadd.f32 %v1246_v23, %v1245_v12 }
 0x515   : > { %v1265_v28 = vmul.f32 %v1263_v26, %v1260_v46  ;;  %v1291_v30 = vadd.f32 %v1290_v21, %v1289_v16  ;;  %v1374_v39 = vmul.f32 %v1373_v33, %v1368_v25 }
 0x516   : > { %v1352_v31 = vadd.f32 %v1351_v24, %v1342_v27  ;;  %v1248_v46 = vrot.slane %v1247_v35, 1 }
 0x517   : > { %v1266_v34 = vsel %vm682_vm2, %v1265_v28, 0.0  ;;  %v1292_v42 = vrot.slane %v1291_v30, 2 }
 0x518   : > { %v1267_v36 = vrot.slane %v1266_v34, 4  ;;  %v1365_v37 = vmul.f32 %v2413_v32, %v1352_v31  ;;  %v1249_v61 = vadd.f32 %v1248_v46, %v1247_v35 }
 0x519   : > { %v1332_v17 = vpop.permute.xlu1 %1331  ;;  %v1309_v40 = vpop.permute.xlu0 %1308  ;;  %v1293_v54 = vadd.f32 %v1292_v42, %v1291_v30 }
 0x51a   : > { %v1268_v43 = vadd.f32 %v1267_v36, %v1266_v34  ;;  %v1334_v45 = vmul.f32 %v1332_v17, %v1329_v19  ;;  %v1311_v47 = vmul.f32 %v1309_v40, %v1306_v6  ;;  %v1375_v41 = vadd.f32 %v1374_v39, %v1365_v37  ;;  %v1996_v37 = vld [vmem:[#allocation24] ss:$0 sm:$0xff] }
 0x51b   : > { %v1294_v11 = vrot.slane %v1293_v54, 1  ;;  %v1389_v16 = vsel %vm1388_vm8, %v1226_v10, %v1249_v61  ;;  %v1413_v38 = vmul.f32 %v1996_v37, %v3560_v62  ;;  %v2374_v62 = vld [vmem:[#allocation28 + $0x4] ss:$8 sps:$4 sm:$0xff]   ;;  %v2380_v61 = vld [vmem:[#allocation30 + $0x10] sm:$0xff]  }
 0x51c   : > { %v1269_v48 = vrot.slane %v1268_v43, 2  ;;  %v1335_v49 = vsel %vm682_vm2, %v1334_v45, 0.0  ;;  %v1312_v4 = vsel %vm682_vm2, %v1311_v47, 0.0  ;;  %1403 = vst.msk [vmem:[#allocation4] sm:$0xff] %vm682_vm2, %v1375_v41  ;;  %1548 = vmatprep.subr.bf16.mxu1 %v2374_v62 }
 0x51d   : > { %v1336_v50 = vrot.slane %v1335_v49, 4  ;;  %v1313_v51 = vrot.slane %v1312_v4, 4  ;;  %v1295_v23 = vadd.f32 %v1294_v11, %v1293_v54 }
 0x51e   : > { %v1270_v55 = vadd.f32 %v1269_v48, %v1268_v43  ;;  %v1355_v56 = vpop.permute.xlu1 %1354  ;;  %v1378_v57 = vpop.permute.xlu0 %1377 }
 0x51f   : > { %v1337_v58 = vadd.f32 %v1336_v50, %v1335_v49  ;;  %v1314_v59 = vadd.f32 %v1313_v51, %v1312_v4  ;;  %v1357_v44 = vmul.f32 %v1355_v56, %v1352_v31  ;;  %v1380_v60 = vmul.f32 %v1378_v57, %v1375_v41  ;;  %v2372_v50 = vld [vmem:[#allocation28] ss:$8 sps:$4 sm:$0xff]   ;;  %v2377_v51 = vld [vmem:[#allocation28 + $0x14] ss:$8 sps:$4 sm:$0xff]  }
 0x520   : > { %v1271_v63 = vrot.slane %v1270_v55, 1  ;;  %v2003_v56 = vld [vmem:[#allocation27] ss:$0 sm:$0xff] }
 0x521   : > { %v1338_v1 = vrot.slane %v1337_v58, 2  ;;  %v1315_v2 = vrot.slane %v1314_v59, 2  ;;  %v1358_v5 = vsel %vm682_vm2, %v1357_v44, 0.0  ;;  %v1381_v6 = vsel %vm682_vm2, %v1380_v60, 0.0  ;;  %v2378_v44 = vld [vmem:[#allocation30] sm:$0xff]   ;;  %v2379_v60 = vld [vmem:[#allocation30 + $0x8] sm:$0xff]  }
 0x522   : > { %v1272_v7 = vadd.f32 %v1271_v63, %v1270_v55  ;;  %v1359_v8 = vrot.slane %v1358_v5, 4  ;;  %v1382_v9 = vrot.slane %v1381_v6, 4  ;;  %v1424_v40 = vpop.permute.xlu1 %1423  ;;  %2107 = vmatpush3.bf16.msra.mxu0 %v2378_v44  ;;  %v2381_v63 = vld [vmem:[#allocation30 + $0x18] sm:$0xff]  }
 0x523   : > { %v1339_v12 = vadd.f32 %v1338_v1, %v1337_v58  ;;  %v1316_v13 = vadd.f32 %v1315_v2, %v1314_v59  ;;  %2108 = vmatprep.subr.bf16.mxu0 %v2946_v0  ;;  %v2382_v1 = vld [vmem:[#allocation30 + $0x20] sm:$0xff]   ;;  %v2383_v2 = vld [vmem:[#allocation30 + $0x28] sm:$0xff]  }
 0x524   : > { %v1360_v14 = vadd.f32 %v1359_v8, %v1358_v5  ;;  %v1383_v15 = vadd.f32 %v1382_v9, %v1381_v6  ;;  %v1391_v20 = vsel %vm1390_vm9, %v1389_v16, %v1272_v7  ;;  %v2384_v5 = vld [vmem:[#allocation30 + $0x30] sm:$0xff]   ;;  %v2385_v6 = vld [vmem:[#allocation30 + $0x38] sm:$0xff]  }
 0x525   : > { %v1340_v18 = vrot.slane %v1339_v12, 1  ;;  %v1317_v19 = vrot.slane %v1316_v13, 1  ;;  %v1393_v29 = vsel %vm1392_vm10, %v1391_v20, %v1295_v23 }
 0x526   : > { %v1361_v21 = vrot.slane %v1360_v14, 2  ;;  %v1384_v22 = vrot.slane %v1383_v15, 2  ;;  %2109 = vmatpush3.bf16.msra.mxu0 %v2379_v60 }
 0x527   : > { %v1318_v24 = vadd.f32 %v1317_v19, %v1316_v13  ;;  %v1341_v27 = vadd.f32 %v1340_v18, %v1339_v12  ;;  %2110 = vmatprep.subr.bf16.mxu0 %v2946_v0 }
 0x528   : > { %v1362_v25 = vadd.f32 %v1361_v21, %v1360_v14  ;;  %v1385_v26 = vadd.f32 %v1384_v22, %v1383_v15 }
 0x529   : > { %v1395_v28 = vsel %vm1394_vm11, %v1393_v29, %v1318_v24 }
 0x52a   : > { %v1363_v30 = vrot.slane %v1362_v25, 1  ;;  %v1386_v31 = vrot.slane %v1385_v26, 1  ;;  %v1397_v34 = vsel %vm1396_vm12, %v1395_v28, %v1341_v27  ;;  %2111 = vmatpush3.bf16.msra.mxu0 %v2380_v61  ;;  %v2018_v28 = vld [vmem:[#allocation31] ss:$0 sm:$0xff] }
 0x52b   : > { %2112 = vmatprep.subr.bf16.mxu0 %v2946_v0 }
 0x52c   : > { %v1364_v32 = vadd.f32 %v1363_v30, %v1362_v25  ;;  %v1387_v33 = vadd.f32 %v1386_v31, %v1385_v26 }
 0x52e   : > { %v1399_v35 = vsel %vm1398_vm13, %v1397_v34, %v1364_v32  ;;  %2113 = vmatpush3.bf16.msra.mxu0 %v2381_v63 }
 0x52f   : > { %v1401_v36 = vsel %vm1400_vm14, %v1399_v35, %v1387_v33  ;;  %2114 = vmatprep.subr.bf16.mxu0 %v2946_v0 }
 0x530   : > { %1402 = vst.msk [vmem:[#allocation9] sm:$0xff] %vm682_vm2, %v1401_v36 }
 0x532   : > { %2115 = vmatpush3.bf16.msra.mxu0 %v2382_v1 }
 0x533   : > { %2116 = vmatprep.subr.bf16.mxu0 %v2946_v0 }
 0x536   : > { %2117 = vmatpush3.bf16.msra.mxu0 %v2383_v2 }
 0x537   : > { %v1404_v39 = vld [vmem:[#allocation9] sm:$0xff]  ;;  %2118 = vmatprep.subr.bf16.mxu0 %v2946_v0 }
 0x538   : > { %v1414_v17 = vadd.f32 %v1413_v38, %v1404_v39 }
 0x53a   : > { %v1426_v42 = vmul.f32 %v1424_v40, %v1414_v17  ;;  %2119 = vmatpush3.bf16.msra.mxu0 %v2384_v5 }
 0x53b   : > { %2120 = vmatprep.subr.bf16.mxu0 %v2946_v0 }
 0x53c   : > { %v1427_v43 = vpack.c.bf16 %v1426_v42, %v1426_v42 }
 0x53e   : > { %2103 = vmatmul.mubr.msk.bf16.vlgmr.msra.gmra.mrb[8].mxu1 %vm682_vm2, %v1427_v43  ;;  %2121 = vmatpush3.bf16.msra.mxu0 %v2385_v6 }
 0x53f   : > { %1580 = vmatprep.mubr.bf16.mxu1 %v2950_v53  ;;  %1549 = vmatpush1.bf16.msra.mxu1 %v2372_v50 }
 0x540   : > { %1550 = vmatprep.subr.bf16.mxu1 %v2377_v51 }
 0x543   : > { %1551 = vmatpush1.bf16.msra.mxu1 %v2375_v52 }
 0x611   : > { %v1497_v45 = vpop.f32.mrb[8].mxu1 }
 0x612   : > { %v1498_v47 = vadd.f32 %v1497_v45, %v3510_v3  ;;  %v2104_v41 = vpop.f32.mrb[9].mxu1 }
 0x613   : > { %v1500_v46 = vpop.f32.mrb[10].mxu1 }
 0x614   : > { %v2105_v48 = vpop.f32.mrb[11].mxu1  ;;  %v1504_v49 = vmul.f32 %v1498_v47, %v1498_v47 }
 0x616   : > { %v1505_v4 = vsel %vm702_vm3, %v1504_v49, 0.0 }
 0x617   : > { %1506 = vadd.xlane.f32.xlu1 %v1505_v4 }
 0x6a4   : > { %v1507_v54 = vpop.xlane.xlu1 %1506 }
 0x6a5   : > { %v1509_v53 = vmul.f32 0.03125, %v1507_v54 }
 0x6a7   : > { %v1510_v55 = vadd.f32 1e-05, %v1509_v53 }
 0x6a9   : > { %2414 = vrsqrt.f32 %v1510_v55 }
 0x6b3   : > { %v2415_v3 = vpop.eup %2414 }
 0x6b4   : > { %v1512_v57 = vmul.f32 %v2415_v3, %v1498_v47 }
 0x6b6   : > { %v1519_v58 = vmul.f32 %v2003_v56, %v1512_v57 }
 0x6b8   : > { %v1520_v59 = vpack.c.bf16 %v1519_v58, %v1519_v58 }
 0x6ba   : > { %2008 = vmatmul.mubr.msk.bf16.vlgmr.msra.gmra.mrb[12].mxu1 %vm702_vm3, %v1520_v59 }
 0x78d   : > { %v1582_v7 = vpop.f32.mrb[12].mxu1 }
 0x78e   : > { %v1584_v8 = vpop.f32.mrb[13].mxu1 }
 0x78f   : > { %v2009_v9 = vmul.f32 -1.442695, %v1584_v8  ;;  %v1586_v10 = vpop.f32.mrb[14].mxu1 }
 0x790   : > { %v1587_v11 = vpop.f32.mrb[15].mxu1 }
 0x791   : > { %2416 = vpow2.f32 %v2009_v9 }
 0x79b   : > { %v2417_v12 = vpop.eup %2416 }
 0x79c   : > { %v1592_v13 = vadd.f32 1.0, %v2417_v12 }
 0x79e   : > { %2418 = vrcp.f32 %v1592_v13 }
 0x7a8   : > { %v2419_v14 = vpop.eup %2418 }
 0x7a9   : > { %v1595_v15 = vmul.f32 %v2419_v14, %v1584_v8 }
 0x7ab   : > { %v1596_v16 = vmul.f32 %v1595_v15, %v1582_v7 }
 0x7ad   : > { %v1597_v18 = vpack.c.bf16 %v1596_v16, %v1596_v16 }
 0x7af   : > { %2123 = vmatmul.mubr.bf16.vlgmr.msra.gmra.mrb[4].mxu0 %v1597_v18 }
 0x882   : > { %v1696_v19 = vpop.f32.mrb[4].mxu0 }
 0x883   : > { %v1697_v0 = vadd.f32 %v1696_v19, %v1519_v58  ;;  %v2124_v20 = vpop.f32.mrb[5].mxu0 }
 0x884   : > { %v1699_v21 = vpop.f32.mrb[6].mxu0 }
 0x885   : > { %v2125_v22 = vpop.f32.mrb[7].mxu0  ;;  %v1703_v23 = vmul.f32 %v1697_v0, %v1697_v0 }
 0x887   : > { %v1704_v24 = vsel %vm702_vm3, %v1703_v23, 0.0 }
 0x888   : > { %1705 = vadd.xlane.f32.xlu0 %v1704_v24 }
 0x915   : > { %v1706_v25 = vpop.xlane.xlu0 %1705 }
 0x916   : > { %v1707_v26 = vmul.f32 0.03125, %v1706_v25 }
 0x918   : > { %v1708_v27 = vadd.f32 1e-05, %v1707_v26 }
 0x91a   : > { %2420 = vrsqrt.f32 %v1708_v27 }
 0x924   : > { %v2421_v29 = vpop.eup %2420 }
 0x925   : > { %v1710_v30 = vmul.f32 %v2421_v29, %v1697_v0 }
 0x927   : > { %v1717_v31 = vmul.f32 %v2018_v28, %v1710_v30 }
 0x929   : > { %1718 = vst.msk [vmem:[%s674_s29] sm:$0xff] %vm702_vm3, %v1717_v31 }
 0x92a   : > { %2829 = shalt.err (!%p2826_p8)
}
 0x92b   : > { %s2830_s19 = scalar_lea.hbm %s3616_s28, 128  ;;  %s2834_s29 = scalar_lea.hbm %s3733_s0, 256 }
 0x92c   : > { %p2831_p3 = scmp.ne.s32.totalorder %s3616_s28, %s2830_s19  ;;  %p2835_p0 = scmp.lt.u32.totalorder %s3616_s28, %s3733_s0 }
 0x92d   : > { %p2836_p11 = scmp.lt.u32.totalorder %s2834_s29, %s2830_s19  ;;  %p2838_p6 = scmp.lt.u32.totalorder %s2830_s19, %s3616_s28 }
 0x92e   : > { %p2832_p12 = pnand %p2831_p3, %p3734_p5 }
 0x92f   : > { %p2837_p7 = por %p2836_p11, %p2835_p0 }
 0x930   : > { %p2833_p13 = pneg %p2832_p12 }
 0x931   : > { %p2839_p10 = por %p2838_p6, %p2837_p7 }
 0x933   : > { %p2840_p1 = pnand %p2839_p10, %p2833_p13 }
 0x935   : > { %2843 = shalt.err (!%p2840_p1)
}
 0x936   : > { %2180 = dma.vmem_to_hbm [thread:$0]  (%p3734_p5), %s3618_s23, 128, %s3616_s28, %s1720_s20  }
 0x937 PF: > { %s3735_s16 = sld [smem:[#allocation43_spill]]  ;;  %p3736_p2 = scmp.ne.s32.totalorder %s3723_s14, 0 }
 0x938   : > { %p3737_p4 = scmp.ge.s32.totalorder %s2926_s18, 2 }
 0x93a   : > { %p2227_p9 = pnand %p3737_p4, %p3736_p2 }
 0x93d   : > { %s1746_s21 = sand.u32 1, %s3735_s16  }
 0x93e   : > { %s1747_s27 = scalar_lea.sflag [#allocation12], %s1746_s21 }
 0x93f   : > { %2901 = dma.done.wait (!%p2227_p9), %s1747_s27, 128  }
 0x940   : > { %2903 = vsyncadd (!%p2227_p9), %s1747_s27, 4294967168  ;;  %s37_s18 = sadd.s32 1, %s2926_s18   ;;  %s3738_s29 = sld [smem:[#allocation44_spill]] }
 0x941   : > { %p34_p8 = scmp.ge.s32.totalorder %s37_s18, 4   ;;  %s3739_s30 = sld [smem:[#allocation45_spill]] }
 0x942   : > { %s3740_s15 = smov %s3413_s1  ;;  %s3741_s16 = smov %s2922_s17 }
 0x943   : > { %s3742_s17 = smov %s3744_s22  ;;  %36 = sbr.rel (!%p34_p8) target bundleno = 19 (0x13), region = 177 }
 0x94a   :  { %1752 = vsyncpa [#allocation11], 1 }
 0x94b   :  { %1754 = vsyncpa [#allocation11 + $0x1], 1 }
 0x94c   :  { %1755 = vsyncpa [#allocation14], 1 }
 0x94d   :  { %1756 = vsyncpa [#allocation17], 1 }
 0x94e   :  { %1757 = vsyncpa [#allocation20], 1 }
 0x94f   :  { %1758 = vsyncpa [#allocation23], 1 }
 0x950   :  { %1759 = vsyncpa [#allocation26], 1 }
 0x951   :  { %1760 = vsyncpa [#allocation29], 1 }
 0x952   :  { %1761 = vsyncpa [#allocation32], 1 }
 0x953   :  { %1762 = vsyncpa [#allocation12], 1 }
 0x954   :  { %1764 = vsyncpa [#allocation12 + $0x1], 1 }

// kernel: tpu_custom_call.1
= control target key start
LH: loop header
LB: loop body
LE: loop exit
PB: predicated region body
PF: predicated region fallthrough
CT: control target
= control target key end

     0   :  { %s3666_s0 = inlined_call_operand.hbm [shape: f32[2,8,32], index: 0, kind: input, shape index: {}]   ;;  %s3667_s1 = inlined_call_operand.hbm [shape: bf16[32,128], index: 1, kind: input, shape index: {}]   ;;  %s3668_s2 = inlined_call_operand.hbm [shape: f32[4,64], index: 2, kind: input, shape index: {}]   ;;  %s3669_s3 = inlined_call_operand.hbm [shape: f32[1,64], index: 3, kind: input, shape index: {}]   ;;  %s3670_s4 = inlined_call_operand.hbm [shape: bf16[64,128], index: 4, kind: input, shape index: {}]   ;;  %s3671_s5 = inlined_call_operand.hbm [shape: bf16[128,64], index: 5, kind: input, shape index: {}]   ;;  %s3672_s6 = inlined_call_operand.hbm [shape: f32[1,64], index: 6, kind: input, shape index: {}]   ;;  %s3673_s7 = inlined_call_operand.hbm [shape: f32[8,64], index: 7, kind: input, shape index: {}]   ;;  %s3674_s8 = inlined_call_operand.hbm [shape: f32[1,64], index: 8, kind: input, shape index: {}]   ;;  %s3675_s9 = inlined_call_operand.hbm [shape: bf16[64,32], index: 9, kind: input, shape index: {}]   ;;  %s3676_s10 = inlined_call_operand.hbm [shape: f32[1,32], index: 10, kind: input, shape index: {}]   ;;  %s3677_s11 = inlined_call_operand.hbm [shape: bf16[32,256], index: 11, kind: input, shape index: {}]   ;;  %s3678_s12 = inlined_call_operand.hbm [shape: bf16[128,32], index: 12, kind: input, shape index: {}]   ;;  %s3679_s13 = inlined_call_operand.hbm [shape: f32[1,32], index: 13, kind: input, shape index: {}]   ;;  %s3680_s14 = inlined_call_operand.hbm [shape: f32[2,8,32], index: 14, kind: output, shape index: {}]  }
   0x1   :  { %3695 = sst [smem:[#allocation49_spill]] %s3666_s0 }
   0x2   :  { %3696 = sst [smem:[#allocation50_spill]] %s3667_s1 }
   0x3   :  { %3697 = sst [smem:[#allocation51_spill]] %s3668_s2 }
   0x4   :  { %3698 = sst [smem:[#allocation52_spill]] %s3669_s3 }
   0x5   :  { %3699 = sst [smem:[#allocation53_spill]] %s3680_s14 }
   0x6   :  { %19 = vsyncpa [#allocation11], 0 }
   0x7   :  { %21 = vsyncpa [#allocation11 + $0x1], 0 }
   0x8   :  { %22 = vsyncpa [#allocation14], 0 }
   0x9   :  { %23 = vsyncpa [#allocation17], 0 }
   0xa   :  { %24 = vsyncpa [#allocation20], 0 }
   0xb   :  { %25 = vsyncpa [#allocation23], 0 }
   0xc   :  { %26 = vsyncpa [#allocation26], 0 }
   0xd   :  { %27 = vsyncpa [#allocation29], 0 }
   0xe   :  { %28 = vsyncpa [#allocation32], 0 }
   0xf   :  { %29 = vsyncpa [#allocation12], 0 }
  0x10   :  { %31 = vsyncpa [#allocation12 + $0x1], 0  ;;  %s3036_s29 = smov 0   ;;  %s3038_s30 = smov 0  }
  0x11   :  { %s3040_s15 = smov 0   ;;  %s3042_s16 = smov 0  }
  0x12   :  { %s3044_s17 = smov 0   ;;  %s3046_s18 = smov 0  }
  0x13 LB: > { %3700 = sst [smem:[#allocation43_spill]] %s2906_s29  ;;  %s3681_s19 = sadd.s32 4294967295, %s2926_s18   ;;  %s2926_s18 = sphi %s3046_s18, %s37_s18   ;;  %s2922_s17 = sphi %s3044_s17, %s3742_s17   ;;  %s2918_s16 = sphi %s3042_s16, %s3741_s16   ;;  %s2914_s15 = sphi %s3040_s15, %s3740_s15   ;;  %s2910_s30 = sphi %s3038_s30, %s3739_s30   ;;  %s2906_s29 = sphi %s3036_s29, %s3738_s29  }
  0x14   : > { %3701 = sst [smem:[#allocation44_spill]] %s2910_s30  ;;  %p1940_p0 = scmp.ge.s32.totalorder %s2926_s18, 1 }
  0x15   : > { %3702 = sst [smem:[#allocation45_spill]] %s2914_s15  ;;  %p3070_p1 = scmp.eq.s32.totalorder %s3681_s19, 0 }
  0x16   : > { %3703 = sst [smem:[#allocation46_spill]] %s2918_s16  ;;  %p383_p2 = scmp.lt.s32.totalorder %s2926_s18, 3 }
  0x17   : > { %s3704_s20 = scalar_select %p3070_p1, 1, 0 }
  0x18   : > { %p3075_p3 = pnand %p1940_p0, %p383_p2  ;;  %s2928_s22 = smov [#allocation13]  }
  0x19   : > { %3705 = sst [smem:[#allocation47_spill]] %s3704_s20  ;;  %s395_s23 = sshll.u32 %s2928_s22, 4  ;;  %s3079_s23 = int_to_ptr.vmem [resolvable:$true] %s395_s23 }
  0x1a   : > { %s3706_s21 = scalar_select %p3075_p3, 1, 0 }
  0x1b   : > { %p2182_p4 = pneg %p3075_p3  ;;  %s2929_s25 = smov [#allocation16]  }
  0x1c   : > { %3707 = sst [smem:[#allocation48_spill]] %s3706_s21  ;;  %s420_s26 = sshll.u32 %s2929_s25, 4  ;;  %s3090_s26 = int_to_ptr.vmem [resolvable:$true] %s420_s26 }
  0x1d   : > { %p3086_p6 = pnand %p2182_p4, %p3070_p1  ;;  %s2930_s27 = smov [#allocation19]  }
  0x1e   : > { %s3092_s28 = sshll.u32 %s2930_s27, 4  ;;  %s3709_s1 = sld [smem:[#allocation50_spill]]  ;;  %s444_s28 = int_to_ptr.vmem [resolvable:$true] %s3092_s28 }
  0x1f   : > { %p3102_p8 = pneg %p3086_p6 }
  0x24   : > { %s2422_s14 = scalar_lea.hbm %s3709_s1, 256 }
  0x25   : > { %p2423_p7 = scmp.ne.s32.totalorder %s3709_s1, %s2422_s14  ;;  %p2429_p11 = scmp.lt.u32.totalorder %s2422_s14, %s3709_s1 }
  0x27   : > { %p2425_p9 = pnand %p3102_p8, %p2423_p7 }
  0x29   : > { %p2426_p10 = pneg %p2425_p9 }
  0x2b   : > { %p2431_p12 = pnand %p2429_p11, %p2426_p10 }
  0x2d   : > { %2434 = shalt.err (!%p2431_p12)
}
  0x2e   : > { %s2435_s16 = scalar_lea.vmem %s3079_s23, 256  ;;  %p2443_p4 = scmp.lt.s32.totalorder %s3079_s23, %s3079_s23 }
  0x2f   : > { %p2436_p13 = scmp.ne.s32.totalorder %s3079_s23, %s2435_s16  ;;  %p2444_p5 = scmp.lt.s32.totalorder %s2435_s16, %s2435_s16 }
  0x31   : > { %p2438_p0 = pnand %p2436_p13, %p3102_p8  ;;  %p2445_p7 = por %p2444_p5, %p2443_p4 }
  0x33   : > { %p2439_p2 = pneg %p2438_p0 }
  0x35   : > { %p2446_p9 = pnand %p2445_p7, %p2439_p2 }
  0x37   : > { %2449 = shalt.err (!%p2446_p9)
}
  0x38   : > { %s3692_s19 = smov 64   ;;  %s2932_s14 = smov 4  }
  0x39   : > { %2185 = dma.hbm_to_vmem [thread:$0]  (!%p3086_p6), %s3709_s1, 256, %s3079_s23, [#allocation14], %s3692_s19, %s3692_s19, %s2932_s14  }
  0x3a   : > { %s3711_s3 = sld [smem:[#allocation52_spill]] }
  0x40   : > { %s2450_s16 = scalar_lea.hbm %s3711_s3, 16 }
  0x41   : > { %p2451_p5 = scmp.ne.s32.totalorder %s3711_s3, %s2450_s16  ;;  %p2457_p12 = scmp.lt.u32.totalorder %s2450_s16, %s3711_s3 }
  0x43   : > { %p2453_p10 = pnand %p2451_p5, %p3102_p8 }
  0x45   : > { %p2454_p11 = pneg %p2453_p10 }
  0x47   : > { %p2459_p13 = pnand %p2457_p12, %p2454_p11 }
  0x49   : > { %2462 = shalt.err (!%p2459_p13)
}
  0x4a   : > { %s2463_s23 = scalar_lea.vmem %s3090_s26, 16  ;;  %s2470_s29 = scalar_lea.vmem %s3090_s26, 32 }
  0x4b   : > { %p2464_p0 = scmp.ne.s32.totalorder %s3090_s26, %s2463_s23  ;;  %p2471_p7 = scmp.lt.s32.totalorder %s3090_s26, %s3090_s26 }
  0x4c   : > { %p2472_p9 = scmp.lt.s32.totalorder %s2470_s29, %s2463_s23 }
  0x4d   : > { %p2466_p2 = pnand %p2464_p0, %p3102_p8 }
  0x4e   : > { %p2473_p5 = por %p2472_p9, %p2471_p7 }
  0x4f   : > { %p2467_p4 = pneg %p2466_p2 }
  0x51   : > { %p2474_p10 = pnand %p2473_p5, %p2467_p4 }
  0x53   : > { %2477 = shalt.err (!%p2474_p10)
}
  0x54   : > { %2191 = dma.hbm_to_vmem [thread:$0]  (!%p3086_p6), %s3711_s3, 16, %s3090_s26, [#allocation17]  }
  0x55   : > { %s2478_s22 = scalar_lea.hbm %s3671_s5, 1024 }
  0x56   : > { %p2479_p11 = scmp.ne.s32.totalorder %s3671_s5, %s2478_s22  ;;  %p2485_p0 = scmp.lt.u32.totalorder %s2478_s22, %s3671_s5 }
  0x58   : > { %p2481_p12 = pnand %p2479_p11, %p3102_p8 }
  0x5a   : > { %p2482_p13 = pneg %p2481_p12 }
  0x5c   : > { %p2487_p2 = pnand %p2485_p0, %p2482_p13 }
  0x5e   : > { %2490 = shalt.err (!%p2487_p2)
}
  0x5f   : > { %s2491_s29 = scalar_lea.vmem %s444_s28, 1024  ;;  %p2499_p5 = scmp.lt.s32.totalorder %s444_s28, %s444_s28 }
  0x60   : > { %p2492_p4 = scmp.ne.s32.totalorder %s444_s28, %s2491_s29  ;;  %p2500_p10 = scmp.lt.s32.totalorder %s2491_s29, %s2491_s29 }
  0x62   : > { %p2494_p7 = pnand %p2492_p4, %p3102_p8  ;;  %p2501_p3 = por %p2500_p10, %p2499_p5 }
  0x64   : > { %p2495_p9 = pneg %p2494_p7 }
  0x66   : > { %p2502_p1 = pnand %p2501_p3, %p2495_p9 }
  0x68   : > { %2505 = shalt.err (!%p2502_p1)
}
  0x69   : > { %2197 = dma.hbm_to_vmem [thread:$0]  (!%p3086_p6), %s3671_s5, 1024, %s444_s28, [#allocation20], %s3692_s19, %s3692_s19, %s2932_s14  }
  0x6a   : > { %s2933_s15 = smov [#allocation22]   ;;  %s2934_s21 = smov [#allocation25]  }
  0x6b   : > { %s468_s20 = sshll.u32 %s2933_s15, 4  ;;  %s489_s22 = sshll.u32 %s2934_s21, 4  ;;  %s469_s20 = int_to_ptr.vmem [resolvable:$true] %s468_s20  ;;  %s490_s22 = int_to_ptr.vmem [resolvable:$true] %s489_s22 }
  0x6c   : > { %s2506_s16 = scalar_lea.hbm %s3673_s7, 128 }
  0x6d   : > { %p2507_p1 = scmp.ne.s32.totalorder %s3673_s7, %s2506_s16  ;;  %p2513_p12 = scmp.lt.u32.totalorder %s2506_s16, %s3673_s7 }
  0x6f   : > { %p2509_p3 = pnand %p2507_p1, %p3102_p8 }
  0x71   : > { %p2510_p11 = pneg %p2509_p3 }
  0x73   : > { %p2515_p13 = pnand %p2513_p12, %p2510_p11 }
  0x75   : > { %2518 = shalt.err (!%p2515_p13)
}
  0x76   : > { %s2519_s28 = scalar_lea.vmem %s469_s20, 128  ;;  %p2527_p7 = scmp.lt.s32.totalorder %s469_s20, %s469_s20 }
  0x77   : > { %p2520_p0 = scmp.ne.s32.totalorder %s469_s20, %s2519_s28  ;;  %p2528_p9 = scmp.lt.s32.totalorder %s2519_s28, %s2519_s28 }
  0x79   : > { %p2522_p2 = pnand %p2520_p0, %p3102_p8  ;;  %p2529_p5 = por %p2528_p9, %p2527_p7 }
  0x7b   : > { %p2523_p4 = pneg %p2522_p2 }
  0x7d   : > { %p2530_p10 = pnand %p2529_p5, %p2523_p4 }
  0x7f   : > { %2533 = shalt.err (!%p2530_p10)
}
  0x80   : > { %2203 = dma.hbm_to_vmem [thread:$0]  (!%p3086_p6), %s3673_s7, 128, %s469_s20, [#allocation23]  }
  0x81   : > { %s2534_s25 = scalar_lea.hbm %s3675_s9, 512 }
  0x82   : > { %p2535_p1 = scmp.ne.s32.totalorder %s3675_s9, %s2534_s25  ;;  %p2541_p12 = scmp.lt.u32.totalorder %s2534_s25, %s3675_s9 }
  0x84   : > { %p2537_p3 = pnand %p2535_p1, %p3102_p8 }
  0x86   : > { %p2538_p11 = pneg %p2537_p3 }
  0x88   : > { %p2543_p13 = pnand %p2541_p12, %p2538_p11 }
  0x8a   : > { %2546 = shalt.err (!%p2543_p13)
}
  0x8b   : > { %s2547_s26 = scalar_lea.vmem %s490_s22, 512  ;;  %p2555_p7 = scmp.lt.s32.totalorder %s490_s22, %s490_s22 }
  0x8c   : > { %p2548_p0 = scmp.ne.s32.totalorder %s490_s22, %s2547_s26  ;;  %p2556_p9 = scmp.lt.s32.totalorder %s2547_s26, %s2547_s26 }
  0x8e   : > { %p2550_p2 = pnand %p2548_p0, %p3102_p8  ;;  %p2557_p5 = por %p2556_p9, %p2555_p7 }
  0x90   : > { %p2551_p4 = pneg %p2550_p2 }
  0x92   : > { %p2558_p10 = pnand %p2557_p5, %p2551_p4 }
  0x94   : > { %2561 = shalt.err (!%p2558_p10)
}
  0x95   : > { %2209 = dma.hbm_to_vmem [thread:$0]  (!%p3086_p6), %s3675_s9, 512, %s490_s22, [#allocation26], %s3692_s19, %s3692_s19, %s2932_s14  }
  0x96   : > { %s2935_s30 = smov [#allocation28]   ;;  %s2562_s25 = scalar_lea.hbm %s3677_s11, 512 }
  0x97   : > { %s513_s15 = sshll.u32 %s2935_s30, 4  ;;  %p2563_p1 = scmp.ne.s32.totalorder %s3677_s11, %s2562_s25  ;;  %s514_s15 = int_to_ptr.vmem [resolvable:$true] %s513_s15 }
  0x98   : > { %p2569_p12 = scmp.lt.u32.totalorder %s2562_s25, %s3677_s11 }
  0x99   : > { %p2565_p3 = pnand %p2563_p1, %p3102_p8 }
  0x9b   : > { %p2566_p11 = pneg %p2565_p3 }
  0x9d   : > { %p2571_p13 = pnand %p2569_p12, %p2566_p11 }
  0x9f   : > { %2574 = shalt.err (!%p2571_p13)
}
  0xa0   : > { %s2575_s22 = scalar_lea.vmem %s514_s15, 512  ;;  %p2583_p7 = scmp.lt.s32.totalorder %s514_s15, %s514_s15 }
  0xa1   : > { %p2576_p0 = scmp.ne.s32.totalorder %s514_s15, %s2575_s22  ;;  %p2584_p9 = scmp.lt.s32.totalorder %s2575_s22, %s2575_s22 }
  0xa3   : > { %p2578_p2 = pnand %p2576_p0, %p3102_p8  ;;  %p2585_p5 = por %p2584_p9, %p2583_p7 }
  0xa5   : > { %p2579_p4 = pneg %p2578_p2 }
  0xa7   : > { %p2586_p10 = pnand %p2585_p5, %p2579_p4 }
  0xa9   : > { %2589 = shalt.err (!%p2586_p10)
}
  0xaa   : > { %s2936_s26 = smov 128   ;;  %s2937_s20 = smov 8  }
  0xab   : > { %2215 = dma.hbm_to_vmem [thread:$0]  (!%p3086_p6), %s3677_s11, 512, %s514_s15, [#allocation29], %s2936_s26, %s2936_s26, %s2937_s20  }
  0xac   : > { %s2938_s1 = smov [#allocation15]   ;;  %s2939_s25 = smov [#allocation18]  }
  0xad   : > { %s409_s21 = sshll.u32 %s2938_s1, 4  ;;  %s430_s27 = sshll.u32 %s2939_s25, 4  ;;  %s410_s21 = int_to_ptr.vmem [resolvable:$true] %s409_s21  ;;  %s3229_s27 = int_to_ptr.vmem [resolvable:$true] %s430_s27 }
  0xae   : > { %s3712_s2 = sld [smem:[#allocation51_spill]] }
  0xb4   : > { %s2590_s29 = scalar_lea.hbm %s3712_s2, 64 }
  0xb5   : > { %p2591_p1 = scmp.ne.s32.totalorder %s3712_s2, %s2590_s29  ;;  %p2597_p12 = scmp.lt.u32.totalorder %s2590_s29, %s3712_s2 }
  0xb7   : > { %p2593_p3 = pnand %p2591_p1, %p3102_p8 }
  0xb9   : > { %p2594_p11 = pneg %p2593_p3 }
  0xbb   : > { %p2599_p13 = pnand %p2597_p12, %p2594_p11 }
  0xbd   : > { %2602 = shalt.err (!%p2599_p13)
}
  0xbe   : > { %s2603_s26 = scalar_lea.vmem %s410_s21, 64  ;;  %p2611_p7 = scmp.lt.s32.totalorder %s410_s21, %s410_s21 }
  0xbf   : > { %p2604_p0 = scmp.ne.s32.totalorder %s410_s21, %s2603_s26  ;;  %p2612_p9 = scmp.lt.s32.totalorder %s2603_s26, %s2603_s26 }
  0xc1   : > { %p2606_p2 = pnand %p2604_p0, %p3102_p8  ;;  %p2613_p5 = por %p2612_p9, %p2611_p7 }
  0xc3   : > { %p2607_p4 = pneg %p2606_p2 }
  0xc5   : > { %p2614_p10 = pnand %p2613_p5, %p2607_p4 }
  0xc7   : > { %2617 = shalt.err (!%p2614_p10)
}
  0xc8   : > { %2188 = dma.hbm_to_vmem [thread:$0]  (!%p3086_p6), %s3712_s2, 64, %s410_s21, [#allocation14]  }
  0xc9   : > { %s2618_s25 = scalar_lea.hbm %s3670_s4, 512 }
  0xca   : > { %p2619_p1 = scmp.ne.s32.totalorder %s3670_s4, %s2618_s25  ;;  %p2625_p12 = scmp.lt.u32.totalorder %s2618_s25, %s3670_s4 }
  0xcc   : > { %p2621_p3 = pnand %p2619_p1, %p3102_p8 }
  0xce   : > { %p2622_p11 = pneg %p2621_p3 }
  0xd0   : > { %p2627_p13 = pnand %p2625_p12, %p2622_p11 }
  0xd2   : > { %2630 = shalt.err (!%p2627_p13)
}
  0xd3   : > { %s2631_s21 = scalar_lea.vmem %s3229_s27, 512  ;;  %p2639_p7 = scmp.lt.s32.totalorder %s3229_s27, %s3229_s27 }
  0xd4   : > { %p2632_p0 = scmp.ne.s32.totalorder %s3229_s27, %s2631_s21  ;;  %p2640_p9 = scmp.lt.s32.totalorder %s2631_s21, %s2631_s21 }
  0xd6   : > { %p2634_p2 = pnand %p2632_p0, %p3102_p8  ;;  %p2641_p5 = por %p2640_p9, %p2639_p7 }
  0xd8   : > { %p2635_p4 = pneg %p2634_p2 }
  0xda   : > { %p2642_p10 = pnand %p2641_p5, %p2635_p4 }
  0xdc   : > { %2645 = shalt.err (!%p2642_p10)
}
  0xdd   : > { %s3713_s28 = smov 64   ;;  %s2940_s19 = smov [#allocation21]  }
  0xde   : > { %2194 = dma.hbm_to_vmem [thread:$0]  (!%p3086_p6), %s3670_s4, 512, %s3229_s27, [#allocation17], %s3713_s28, %s3713_s28, %s2932_s14  }
  0xdf   : > { %s457_s20 = sshll.u32 %s2940_s19, 4  ;;  %s2941_s30 = smov [#allocation24]   ;;  %s458_s20 = int_to_ptr.vmem [resolvable:$true] %s457_s20 }
  0xe0   : > { %s479_s1 = sshll.u32 %s2941_s30, 4  ;;  %s2646_s23 = scalar_lea.hbm %s3672_s6, 16  ;;  %s3275_s1 = int_to_ptr.vmem [resolvable:$true] %s479_s1 }
  0xe1   : > { %p2647_p1 = scmp.ne.s32.totalorder %s3672_s6, %s2646_s23  ;;  %p2653_p12 = scmp.lt.u32.totalorder %s2646_s23, %s3672_s6 }
  0xe3   : > { %p2649_p3 = pnand %p2647_p1, %p3102_p8 }
  0xe5   : > { %p2650_p11 = pneg %p2649_p3 }
  0xe7   : > { %p2655_p13 = pnand %p2653_p12, %p2650_p11 }
  0xe9   : > { %2658 = shalt.err (!%p2655_p13)
}
  0xea   : > { %s2659_s15 = scalar_lea.vmem %s458_s20, 16  ;;  %s2666_s26 = scalar_lea.vmem %s458_s20, 32 }
  0xeb   : > { %p2660_p0 = scmp.ne.s32.totalorder %s458_s20, %s2659_s15  ;;  %p2667_p7 = scmp.lt.s32.totalorder %s458_s20, %s458_s20 }
  0xec   : > { %p2668_p9 = scmp.lt.s32.totalorder %s2666_s26, %s2659_s15 }
  0xed   : > { %p2662_p2 = pnand %p2660_p0, %p3102_p8 }
  0xee   : > { %p2669_p5 = por %p2668_p9, %p2667_p7 }
  0xef   : > { %p2663_p4 = pneg %p2662_p2 }
  0xf1   : > { %p2670_p10 = pnand %p2669_p5, %p2663_p4 }
  0xf3   : > { %2673 = shalt.err (!%p2670_p10)
}
  0xf4   : > { %2200 = dma.hbm_to_vmem [thread:$0]  (!%p3086_p6), %s3672_s6, 16, %s458_s20, [#allocation20]  }
  0xf5   : > { %s2674_s23 = scalar_lea.hbm %s3674_s8, 16 }
  0xf6   : > { %p2675_p1 = scmp.ne.s32.totalorder %s3674_s8, %s2674_s23  ;;  %p2681_p12 = scmp.lt.u32.totalorder %s2674_s23, %s3674_s8 }
  0xf8   : > { %p2677_p3 = pnand %p2675_p1, %p3102_p8 }
  0xfa   : > { %p2678_p11 = pneg %p2677_p3 }
  0xfc   : > { %p2683_p13 = pnand %p2681_p12, %p2678_p11 }
  0xfe   : > { %2686 = shalt.err (!%p2683_p13)
}
  0xff   : > { %s2687_s20 = scalar_lea.vmem %s3275_s1, 16  ;;  %s2694_s15 = scalar_lea.vmem %s3275_s1, 32 }
 0x100   : > { %p2688_p0 = scmp.ne.s32.totalorder %s3275_s1, %s2687_s20  ;;  %p2695_p7 = scmp.lt.s32.totalorder %s3275_s1, %s3275_s1 }
 0x101   : > { %p2696_p9 = scmp.lt.s32.totalorder %s2694_s15, %s2687_s20 }
 0x102   : > { %p2690_p2 = pnand %p2688_p0, %p3102_p8 }
 0x103   : > { %p2697_p5 = por %p2696_p9, %p2695_p7 }
 0x104   : > { %p2691_p4 = pneg %p2690_p2 }
 0x106   : > { %p2698_p10 = pnand %p2697_p5, %p2691_p4 }
 0x108   : > { %2701 = shalt.err (!%p2698_p10)
}
 0x109   : > { %2206 = dma.hbm_to_vmem [thread:$0]  (!%p3086_p6), %s3674_s8, 16, %s3275_s1, [#allocation23]  }
 0x10a   : > { %s2942_s30 = smov [#allocation27]   ;;  %s2943_s16 = smov [#allocation30]  }
 0x10b   : > { %s503_s25 = sshll.u32 %s2942_s30, 4  ;;  %s526_s23 = sshll.u32 %s2943_s16, 4  ;;  %s504_s25 = int_to_ptr.vmem [resolvable:$true] %s503_s25  ;;  %s3319_s23 = int_to_ptr.vmem [resolvable:$true] %s526_s23 }
 0x10c   : > { %s2702_s21 = scalar_lea.hbm %s3676_s10, 16 }
 0x10d   : > { %p2703_p1 = scmp.ne.s32.totalorder %s3676_s10, %s2702_s21  ;;  %p2709_p12 = scmp.lt.u32.totalorder %s2702_s21, %s3676_s10 }
 0x10f   : > { %p2705_p3 = pnand %p2703_p1, %p3102_p8 }
 0x111   : > { %p2706_p11 = pneg %p2705_p3 }
 0x113   : > { %p2711_p13 = pnand %p2709_p12, %p2706_p11 }
 0x115   : > { %2714 = shalt.err (!%p2711_p13)
}
 0x116   : > { %s2715_s26 = scalar_lea.vmem %s504_s25, 16  ;;  %s2722_s19 = scalar_lea.vmem %s504_s25, 32 }
 0x117   : > { %p2716_p0 = scmp.ne.s32.totalorder %s504_s25, %s2715_s26  ;;  %p2723_p7 = scmp.lt.s32.totalorder %s504_s25, %s504_s25 }
 0x118   : > { %p2724_p9 = scmp.lt.s32.totalorder %s2722_s19, %s2715_s26 }
 0x119   : > { %p2718_p2 = pnand %p2716_p0, %p3102_p8 }
 0x11a   : > { %p2725_p5 = por %p2724_p9, %p2723_p7 }
 0x11b   : > { %p2719_p4 = pneg %p2718_p2 }
 0x11d   : > { %p2726_p10 = pnand %p2725_p5, %p2719_p4 }
 0x11f   : > { %2729 = shalt.err (!%p2726_p10)
}
 0x120   : > { %2212 = dma.hbm_to_vmem [thread:$0]  (!%p3086_p6), %s3676_s10, 16, %s504_s25, [#allocation26]  }
 0x121   : > { %s2730_s21 = scalar_lea.hbm %s3678_s12, 1024 }
 0x122   : > { %p2731_p1 = scmp.ne.s32.totalorder %s3678_s12, %s2730_s21  ;;  %p2737_p12 = scmp.lt.u32.totalorder %s2730_s21, %s3678_s12 }
 0x124   : > { %p2733_p3 = pnand %p2731_p1, %p3102_p8 }
 0x126   : > { %p2734_p11 = pneg %p2733_p3 }
 0x128   : > { %p2739_p13 = pnand %p2737_p12, %p2734_p11 }
 0x12a   : > { %2742 = shalt.err (!%p2739_p13)
}
 0x12b   : > { %s2743_s25 = scalar_lea.vmem %s3319_s23, 1024  ;;  %p2751_p7 = scmp.lt.s32.totalorder %s3319_s23, %s3319_s23 }
 0x12c   : > { %p2744_p0 = scmp.ne.s32.totalorder %s3319_s23, %s2743_s25  ;;  %p2752_p9 = scmp.lt.s32.totalorder %s2743_s25, %s2743_s25 }
 0x12e   : > { %p2746_p2 = pnand %p2744_p0, %p3102_p8  ;;  %p2753_p5 = por %p2752_p9, %p2751_p7 }
 0x130   : > { %p2747_p4 = pneg %p2746_p2 }
 0x132   : > { %p2754_p10 = pnand %p2753_p5, %p2747_p4 }
 0x134   : > { %2757 = shalt.err (!%p2754_p10)
}
 0x135   : > { %2218 = dma.hbm_to_vmem [thread:$0]  (!%p3086_p6), %s3678_s12, 1024, %s3319_s23, [#allocation29], %s3713_s28, %s3713_s28, %s2932_s14  }
 0x136   : > { %s2944_s30 = smov [#allocation31]   ;;  %s2758_s21 = scalar_lea.hbm %s3679_s13, 16 }
 0x137   : > { %s540_s16 = sshll.u32 %s2944_s30, 4  ;;  %p2759_p1 = scmp.ne.s32.totalorder %s3679_s13, %s2758_s21  ;;  %s541_s16 = int_to_ptr.vmem [resolvable:$true] %s540_s16 }
 0x138   : > { %p2765_p12 = scmp.lt.u32.totalorder %s2758_s21, %s3679_s13 }
 0x139   : > { %p2761_p3 = pnand %p2759_p1, %p3102_p8 }
 0x13b   : > { %p2762_p11 = pneg %p2761_p3 }
 0x13d   : > { %p2767_p13 = pnand %p2765_p12, %p2762_p11 }
 0x13f   : > { %2770 = shalt.err (!%p2767_p13)
}
 0x140   : > { %s2771_s14 = scalar_lea.vmem %s541_s16, 16  ;;  %s2778_s28 = scalar_lea.vmem %s541_s16, 32 }
 0x141   : > { %p2772_p0 = scmp.ne.s32.totalorder %s541_s16, %s2771_s14  ;;  %p2779_p7 = scmp.lt.s32.totalorder %s541_s16, %s541_s16 }
 0x142   : > { %p2780_p9 = scmp.lt.s32.totalorder %s2778_s28, %s2771_s14 }
 0x143   : > { %p2774_p2 = pnand %p2772_p0, %p3102_p8 }
 0x144   : > { %p2781_p5 = por %p2780_p9, %p2779_p7 }
 0x145   : > { %p2775_p4 = pneg %p2774_p2 }
 0x147   : > { %p2782_p10 = pnand %p2781_p5, %p2775_p4 }
 0x149   : > { %2785 = shalt.err (!%p2782_p10)
}
 0x14a   : > { %s3714_s26 = sld [smem:[#allocation45_spill]]  ;;  %s3715_s19 = sld [smem:[#allocation44_spill]] }
 0x14b   : > { %s3716_s0 = sld [smem:[#allocation43_spill]]  ;;  %s3717_s30 = sld [smem:[#allocation47_spill]] }
 0x14c   : > { %2221 = dma.hbm_to_vmem [thread:$0]  (!%p3086_p6), %s3679_s13, 16, %s541_s16, [#allocation32]  }
 0x14d   : > { %s1939_s29 = sadd.s32 4294967294, %s2926_s18   ;;  %s49_s22 = sadd.s32 1, %s2922_s17 }
 0x14e   : > { %p51_p8 = scmp.ge.s32.totalorder %s49_s22, 2  ;;  %p66_p3 = scmp.eq.s32.totalorder %s2926_s18, 0 }
 0x14f   : > { %s3721_s20 = sadd.s32 4294967295, %s2926_s18   ;;  %p376_p4 = scmp.eq.s32.totalorder %s1939_s29, 1 }
 0x150   : > { %s58_s24 = sadd.s32 1, %s3714_s26  ;;  %p65_p1 = scmp.ne.s32.totalorder %s3714_s26, %s3715_s19 }
 0x151   : > { %p71_p11 = scmp.ne.s32.totalorder %s3715_s19, %s3716_s0  ;;  %s3744_s22 = smov (%p51_p8, %s49_s22), 0 }
 0x152   : > { %p3393_p12 = por %p66_p3, %p65_p1  ;;  %p3719_p13 = scmp.ne.s32.totalorder %s3717_s30, 0 }
 0x153   : > { %s53_s27 = ssub.s32 %s2922_s17, %s3744_s22  ;;  %p370_p0 = scmp.eq.s32.totalorder %s3721_s20, 1 }
 0x154   : > { %p3399_p6 = por %p3719_p13, %p71_p11  ;;  %p56_p2 = scmp.eq.s32.totalorder %s53_s27, 0 }
 0x155   : > { %p3407_p7 = por %p370_p0, %p65_p1  ;;  %p2243_p9 = scmp.lt.s32.totalorder %s2926_s18, 2 }
 0x156   : > { %s3413_s1 = scalar_select %p56_p2, %s3714_s26, %s58_s24  }
 0x157   : > { %s3722_s15 = scalar_select %p3407_p7, 1, 0 }
 0x158   : > { %p3415_p5 = por %p376_p4, %p71_p11  ;;  %s551_s28 = sand.u32 1, %s3714_s26  }
 0x159   : > { %s1955_s23 = sshll.u32 %s551_s28, 3  ;;  %s1956_s25 = sshll.u32 %s2922_s17, 7 }
 0x15a   : > { %s3723_s14 = scalar_select %p3415_p5, 1, 0 }
 0x15b   : > { %s3724_s30 = sld [smem:[#allocation49_spill]]  ;;  %s555_s29 = scalar_lea.vmem [#allocation10], %s1955_s23 }
 0x15c   : > { %s563_s27 = sshll.u32 %s555_s29, 4  ;;  %p3430_p10 = pnand %p2243_p9, %p3393_p12  ;;  %s3426_s27 = int_to_ptr.vmem [resolvable:$true] %s563_s27 }
 0x15d   : > { %s552_s26 = scalar_lea.sflag [#allocation11], %s551_s28 }
 0x15e   : > { %p2788_p1 = pneg %p3430_p10 }
 0x161   : > { %s3725_s2 = smov %s3724_s30  ;;  %s3424_s20 = scalar_lea.hbm %s3724_s30, %s1956_s25 }
 0x162   : > { %s2786_s3 = scalar_lea.hbm %s3424_s20, 128  ;;  %s2791_s19 = scalar_lea.hbm %s3725_s2, 256 }
 0x163   : > { %p2787_p8 = scmp.ne.s32.totalorder %s3424_s20, %s2786_s3  ;;  %p2792_p12 = scmp.lt.u32.totalorder %s3424_s20, %s3725_s2 }
 0x164   : > { %p2793_p13 = scmp.lt.u32.totalorder %s2791_s19, %s2786_s3  ;;  %p2795_p2 = scmp.lt.u32.totalorder %s2786_s3, %s3424_s20 }
 0x165   : > { %p2789_p3 = pnand %p2788_p1, %p2787_p8 }
 0x166   : > { %p2794_p0 = por %p2793_p13, %p2792_p12 }
 0x167   : > { %p2790_p11 = pneg %p2789_p3 }
 0x168   : > { %p2796_p4 = por %p2795_p2, %p2794_p0 }
 0x16a   : > { %p2797_p9 = pnand %p2796_p4, %p2790_p11 }
 0x16c   : > { %2800 = shalt.err (!%p2797_p9)
}
 0x16d   : > { %s2801_s28 = scalar_lea.vmem %s3426_s27, 128  ;;  %s2945_s30 = smov [#allocation10]  }
 0x16e   : > { %p2802_p8 = scmp.ne.s32.totalorder %s3426_s27, %s2801_s28  ;;  %s2806_s29 = sshll.u32 %s2945_s30, 4  ;;  %s2807_s29 = int_to_ptr.vmem [resolvable:$false] %s2806_s29 }
 0x16f   : > { %s2808_s23 = scalar_lea.vmem %s2807_s29, 256  ;;  %p2809_p7 = scmp.lt.s32.totalorder %s3426_s27, %s2807_s29 }
 0x170   : > { %p2804_p3 = pnand %p2802_p8, %p2788_p1  ;;  %p2810_p12 = scmp.lt.s32.totalorder %s2808_s23, %s2801_s28 }
 0x172   : > { %p2805_p5 = pneg %p2804_p3  ;;  %p2811_p13 = por %p2810_p12, %p2809_p7 }
 0x174   : > { %p2812_p0 = pnand %p2811_p13, %p2805_p5 }
 0x176   : > { %2815 = shalt.err (!%p2812_p0)
}
 0x177   : > { %2225 = dma.hbm_to_vmem [thread:$0]  (!%p3430_p10), %s3424_s20, 128, %s3426_s27, %s552_s26  }
 0x178   : > { %s3727_s3 = sld [smem:[#allocation48_spill]] }
 0x17e   : > { %p3728_p11 = scmp.ne.s32.totalorder %s3727_s3, 0 }
 0x17f   : > { %s3729_s25 = sld [smem:[#allocation44_spill]] (!%p3728_p11) }
 0x180   : > { %572 = sbr.rel (%p3728_p11) target bundleno = 2359 (0x937), region = 76 }
 0x185   : > { %s3462_s19 = sand.u32 (!%p3728_p11), 1, %s3729_s25  }
 0x186   : > { %s1958_s21 = sshll.u32 (!%p3728_p11), %s3462_s19, 3  ;;  %s575_s0 = scalar_lea.sflag (!%p3728_p11), [#allocation11], %s3462_s19 }
 0x187   : > { %s578_s28 = scalar_lea.vmem [#allocation10], %s1958_s21 }
 0x188   : > { %2869 = dma.done.wait (%p3399_p6), %s575_s0, 128  }
 0x189   : > { %2871 = vsyncadd (%p3399_p6), %s575_s0, 4294967168  ;;  %s3730_s20 = sld [smem:[#allocation47_spill]] }
 0x18f   : > { %p3731_p7 = scmp.ne.s32.totalorder %s3730_s20, 0 }
 0x191   : > { %2873 = dma.done.wait (%p3731_p7), [#allocation14], 320  }
 0x192   : > { %2875 = vsyncadd (%p3731_p7), [#allocation14], 4294966976 }
 0x193   : > { %2877 = dma.done.wait (%p3731_p7), [#allocation17], 528  }
 0x194   : > { %2879 = vsyncadd (%p3731_p7), [#allocation17], 4294966768 }
 0x195   : > { %2881 = dma.done.wait (%p3731_p7), [#allocation20], 1040  }
 0x196   : > { %2883 = vsyncadd (%p3731_p7), [#allocation20], 4294966256 }
 0x197   : > { %2885 = dma.done.wait (%p3731_p7), [#allocation23], 144  }
 0x198   : > { %2887 = vsyncadd (%p3731_p7), [#allocation23], 4294967152 }
 0x199   : > { %2889 = dma.done.wait (%p3731_p7), [#allocation26], 528  }
 0x19a   : > { %2891 = vsyncadd (%p3731_p7), [#allocation26], 4294966768 }
 0x19b   : > { %2893 = dma.done.wait (%p3731_p7), [#allocation29], 1536  }
 0x19c   : > { %2895 = vsyncadd (%p3731_p7), [#allocation29], 4294965760 }
 0x19d   : > { %2897 = dma.done.wait (%p3731_p7), [#allocation32], 16  }
 0x19e   : > { %2899 = vsyncadd (%p3731_p7), [#allocation32], 4294967280  ;;  %vm680_vm0 = vcmask 518144   ;;  %v2946_v0 = vmov 0.0   ;;  %vm2947_vm1 = vmmov 0   ;;  %vm682_vm2 = vcmask 523264  }
 0x19f   : > { %2054 = vmatprep.subr.bf16.mxu1 %v2946_v0  ;;  %2058 = vmatprep.mubr.msk.bf16.mxu1 %vm2947_vm1, %v2946_v0  ;;  %681 = vst.msk [vmem:[#allocation3] sm:$0x7] %vm680_vm0, %v2946_v0  ;;  %v2353_v1 = vld [vmem:[#allocation13] sm:$0xff]   ;;  %v2354_v2 = vld [vmem:[#allocation13 + $0x8] sm:$0xff]   ;;  %v3510_v3 = vld [vmem:[%s578_s28] sm:$0xff]  ;;  %vm702_vm3 = vcmask 261120  }
 0x1a0   : > { %683 = vst.msk [vmem:[#allocation4] sm:$0xff] %vm682_vm2, %v2946_v0  ;;  %2074 = vmatprep.subr.bf16.mxu0 %v2946_v0  ;;  %2090 = vmatprep.mubr.msk.bf16.mxu0 %vm2947_vm1, %v2946_v0  ;;  %v685_v4 = vpack.c.bf16 %v3510_v3, %v3510_v3  ;;  %v2355_v6 = vld [vmem:[#allocation18] sm:$0xff]   ;;  %v2356_v7 = vld [vmem:[#allocation18 + $0x8] sm:$0xff]   ;;  %v2357_v8 = vld [vmem:[#allocation18 + $0x10] sm:$0xff]   ;;  %vm797_vm4 = vcmask 523269   ;;  %s2948_s16 = smov 126  }
 0x1a1   : > { %2055 = vmatpush3.bf16.msra.mxu1 %v2353_v1  ;;  %v2358_v9 = vld [vmem:[#allocation18 + $0x18] sm:$0xff]   ;;  %v2359_v10 = vld [vmem:[#allocation19] sm:$0xff]   ;;  %v2360_v11 = vld [vmem:[#allocation19 + $0x8] sm:$0xff]   ;;  %s2949_s27 = smov 118   ;;  %vm1011_vm5 = vcmask 64512   ;;  %v2950_v53 = vmov 0  }
 0x1a2   : > { %2056 = vmatprep.subr.bf16.mxu1 %v2946_v0  ;;  %2075 = vmatpush3.bf16.msra.mxu0 %v2359_v10  ;;  %v2361_v12 = vld [vmem:[#allocation19 + $0x10] sm:$0xff]   ;;  %v2362_v13 = vld [vmem:[#allocation19 + $0x18] sm:$0xff]   ;;  %v2363_v14 = vld [vmem:[#allocation19 + $0x20] sm:$0xff]   ;;  %v2951_v55 = vmov 1   ;;  %s2958_s24 = smov 64   ;;  %vm1388_vm8 = vcmask 1040384  }
 0x1a3   : > { %2076 = vmatprep.subr.bf16.mxu0 %v2946_v0  ;;  %v2364_v15 = vld [vmem:[#allocation19 + $0x28] sm:$0xff]   ;;  %v2365_v16 = vld [vmem:[#allocation19 + $0x30] sm:$0xff]   ;;  %v1976_v21 = vld [vmem:[#allocation15] ss:$0 sm:$0xff]  ;;  %2337 = vset.pattern.permute.xlu0 %v2950_v53  ;;  %vm1390_vm9 = vcmask 1041408   ;;  %vm1392_vm10 = vcmask 1042432  }
 0x1a4   : > { %v1978_v22 = vld [vmem:[#allocation15 + $0x1] ss:$0 sm:$0xff]  ;;  %v1977_v23 = vld [vmem:[#allocation16] ss:$0 sm:$0xff]  ;;  %v1979_v28 = vld [vmem:[#allocation15 + $0x2] ss:$0 sm:$0xff] }
 0x1a5   : > { %2057 = vmatpush3.bf16.msra.mxu1 %v2354_v2  ;;  %v1980_v32 = vld [vmem:[#allocation15 + $0x3] ss:$0 sm:$0xff]  ;;  %v1987_v56 = vld [vmem:[#allocation21] ss:$0 sm:$0xff]  ;;  %vm1394_vm11 = vcmask 1043456   ;;  %vm1396_vm12 = vcmask 1044480  }
 0x1a6   : > { %2062 = vmatprep.subr.bf16.mxu1 %v2946_v0  ;;  %v746_v5 = vld [vmem:[#allocation3] sm:$0x7]  ;;  %2077 = vmatpush3.bf16.msra.mxu0 %v2360_v11  ;;  %v2366_v44 = vld [vmem:[#allocation19 + $0x38] sm:$0xff]   ;;  %vm1398_vm13 = vcmask 1045504   ;;  %vm1400_vm14 = vcmask 1046528   ;;  %s3732_s26 = sld [smem:[#allocation46_spill]] }
 0x1a7   : > { %748 = vst.msk [vmem:[#allocation2 + $0x5] sm:$0x7] %vm680_vm0, %v746_v5  ;;  %2078 = vmatprep.subr.bf16.mxu0 %v2946_v0  ;;  %s674_s29 = scalar_lea.vmem [#allocation33], %s1958_s21  ;;  %s3733_s0 = sld [smem:[#allocation53_spill]] }
 0x1a8   : > { %2059 = vmatmul.mubr.msk.bf16.vlgmr.msra.gmra.mrb[0].mxu1 %vm702_vm3, %v685_v4  ;;  %s1734_s23 = sshll.u32 %s674_s29, 4  ;;  %s1720_s20 = scalar_lea.sflag [#allocation12], %s3462_s19  ;;  %s3618_s23 = int_to_ptr.vmem [resolvable:$true] %s1734_s23 }
 0x1a9   : > { %2070 = vmatprep.mubr.msk.bf16.mxu1 %vm2947_vm1, %v2946_v0  ;;  %2063 = vmatpush3.bf16.msra.mxu1 %v2355_v6  ;;  %p3734_p5 = scmp.ne.s32.totalorder %s3722_s15, 0  ;;  %s2960_s21 = smov [#allocation33]  }
 0x1aa   : > { %2064 = vmatprep.subr.bf16.mxu1 %v2946_v0  ;;  %2079 = vmatpush3.bf16.msra.mxu0 %v2361_v12 }
 0x1ab   : > { %2080 = vmatprep.subr.bf16.mxu0 %v2946_v0 }
 0x1ac   : > { %s2020_s30 = sshll.u32 %s3732_s26, 7 }
 0x1ad   : > { %2065 = vmatpush3.bf16.msra.mxu1 %v2356_v7  ;;  %s3616_s28 = scalar_lea.hbm %s3733_s0, %s2020_s30 }
 0x1ae   : > { %2066 = vmatprep.subr.bf16.mxu1 %v2946_v0  ;;  %2081 = vmatpush3.bf16.msra.mxu0 %v2362_v13 }
 0x1af   : > { %2082 = vmatprep.subr.bf16.mxu0 %v2946_v0 }
 0x1b1   : > { %2067 = vmatpush3.bf16.msra.mxu1 %v2357_v8 }
 0x1b2   : > { %2068 = vmatprep.subr.bf16.mxu1 %v2946_v0  ;;  %2083 = vmatpush3.bf16.msra.mxu0 %v2363_v14 }
 0x1b3   : > { %2084 = vmatprep.subr.bf16.mxu0 %v2946_v0 }
 0x1b5   : > { %2069 = vmatpush3.bf16.msra.mxu1 %v2358_v9 }
 0x1b6   : > { %2094 = vmatprep.subr.bf16.mxu1 %v2946_v0  ;;  %2085 = vmatpush3.bf16.msra.mxu0 %v2364_v15 }
 0x1b7   : > { %2086 = vmatprep.subr.bf16.mxu0 %v2946_v0 }
 0x1ba   : > { %2087 = vmatpush3.bf16.msra.mxu0 %v2365_v16 }
 0x1bb   : > { %2088 = vmatprep.subr.bf16.mxu0 %v2946_v0 }
 0x1be   : > { %2089 = vmatpush3.bf16.msra.mxu0 %v2366_v44  ;;  %v3555_v44 = vld [vmem:[#allocation22] sm:$0xff] }
 0x1bf   : > { %2106 = vmatprep.subr.bf16.mxu0 %v2946_v0 }
 0x27b   : > { %v3531_v17 = vpop.f32.mrb[0].mxu1 }
 0x27c   : > { %750 = vst.msk [vmem:[#allocation2 + $0x8] sm:$0xff] %vm682_vm2, %v3531_v17  ;;  %v2060_v18 = vpop.f32.mrb[1].mxu1  ;;  %v1997_v16 = vmul.f32 -1.442695, %v3531_v17 }
 0x27d   : > { %798 = vst.msk [vmem:[#allocation3 - $0x5] sm:$0xe0] %vm797_vm4, %v3531_v17  ;;  %v743_v19 = vpop.f32.mrb[2].mxu1  ;;  %v2952_v18 = vmov 2  }
 0x27e   : > { %v2061_v20 = vpop.f32.mrb[3].mxu1  ;;  %v2953_v19 = vmov 5  }
 0x283   : > { %v752_v24 = vld [vmem:[#allocation2 + $0x5] sm:$0xff] }
 0x284   : > { %v766_v25 = vld [vmem:[#allocation2 + $0x6] sm:$0xff]  ;;  %v758_v26 = vmul.f32 %v1976_v21, %v752_v24  ;;  %v2954_v21 = vmov 3   ;;  %v2956_v24 = vmov 6  }
 0x285   : > { %v774_v27 = vld [vmem:[#allocation2 + $0x7] sm:$0xff]  ;;  %v772_v30 = vmul.f32 %v1978_v22, %v766_v25  ;;  %v2955_v22 = vmov 4  }
 0x286   : > { %v765_v29 = vadd.f32 %v1977_v23, %v758_v26  ;;  %v782_v31 = vld [vmem:[#allocation2 + $0x8] sm:$0xff]  ;;  %v780_v34 = vmul.f32 %v1979_v28, %v774_v27  ;;  %v2957_v26 = vmov 7  }
 0x287   : > { %v788_v36 = vmul.f32 %v1980_v32, %v782_v31  ;;  %v2370_v31 = vld [vmem:[#allocation25 + $0x10] sm:$0xff]   ;;  %v2371_v32 = vld [vmem:[#allocation25 + $0x18] sm:$0xff]  }
 0x288   : > { %v773_v33 = vadd.f32 %v772_v30, %v765_v29  ;;  %v2368_v29 = vld [vmem:[#allocation25] sm:$0xff]   ;;  %v2369_v30 = vld [vmem:[#allocation25 + $0x8] sm:$0xff]  }
 0x28a   : > { %v781_v35 = vadd.f32 %v780_v34, %v773_v33  ;;  %v1026_v33 = vlaneseq  ;;  %v2959_v34 = vmov 1966171168  }
 0x28c   : > { %v789_v37 = vadd.f32 %v788_v36, %v781_v35  ;;  %v1024_v35 = vunpack.c.l.s4 %v2959_v34 }
 0x28e   : > { %v1981_v38 = vmul.f32 -1.442695, %v789_v37  ;;  %v1025_v36 = vunpack.c.0.s8 %v1024_v35 }
 0x290   : > { %2386 = vpow2.f32 %v1981_v38 }
 0x29a   : > { %v2387_v39 = vpop.eup %2386 }
 0x29b   : > { %v793_v40 = vadd.f32 1.0, %v2387_v39 }
 0x29d   : > { %2388 = vrcp.f32 %v793_v40 }
 0x2a7   : > { %v2389_v41 = vpop.eup %2388 }
 0x2a8   : > { %v796_v42 = vmul.f32 %v2389_v41, %v789_v37 }
 0x2aa   : > { %v799_v43 = vpack.c.bf16 %v796_v42, %v796_v42  ;;  %1006 = vst.msk [vmem:[#allocation6] sm:$0xff] %vm682_vm2, %v796_v42 }
 0x2ac   : > { %2071 = vmatmul.mubr.msk.bf16.vlgmr.msra.gmra.mrb[4].mxu1 %vm682_vm2, %v799_v43 }
 0x2ad   : > { %2102 = vmatprep.mubr.msk.bf16.mxu1 %vm2947_vm1, %v2946_v0  ;;  %2095 = vmatpush3.bf16.msra.mxu1 %v2368_v29 }
 0x2ae   : > { %2096 = vmatprep.subr.bf16.mxu1 %v2946_v0 }
 0x2b1   : > { %2097 = vmatpush3.bf16.msra.mxu1 %v2369_v30 }
 0x2b2   : > { %2098 = vmatprep.subr.bf16.mxu1 %v2946_v0 }
 0x2b5   : > { %2099 = vmatpush3.bf16.msra.mxu1 %v2370_v31 }
 0x2b6   : > { %2100 = vmatprep.subr.bf16.mxu1 %v2946_v0 }
 0x2b9   : > { %2101 = vmatpush3.bf16.msra.mxu1 %v2371_v32 }
 0x37f   : > { %v869_v45 = vpop.f32.mrb[4].mxu1 }
 0x380   : > { %v875_v46 = vpack.c.bf16 %v869_v45, %v869_v45  ;;  %1008 = vrot.lane.b32.xlu0 %v869_v45, %s2948_s16  ;;  %v2072_v47 = vpop.f32.mrb[5].mxu1  ;;  %s2816_s16 = scalar_lea.vmem %s3618_s23, 128 }
 0x381   : > { %v872_v48 = vpop.f32.mrb[6].mxu1  ;;  %p2817_p6 = scmp.ne.s32.totalorder %s3618_s23, %s2816_s16 }
 0x382   : > { %v2073_v49 = vpop.f32.mrb[7].mxu1  ;;  %2091 = vmatmul.mubr.bf16.vlgmr.msra.gmra.mrb[0].mxu0 %v875_v46 }
 0x383   : > { %2122 = vmatprep.mubr.msk.bf16.mxu0 %vm2947_vm1, %v2946_v0  ;;  %p2818_p10 = pnand %p2817_p6, %p3734_p5 }
 0x384   : > { %1013 = vrot.lane.b32.xlu0 %v869_v45, %s2949_s27  ;;  %s2820_s27 = sshll.u32 %s2960_s21, 4  ;;  %s2821_s27 = int_to_ptr.vmem [resolvable:$false] %s2820_s27 }
 0x385   : > { %p2819_p1 = pneg %p2818_p10  ;;  %p2823_p2 = scmp.lt.s32.totalorder %s3618_s23, %s2821_s27 }
 0x3f2   : > { %v1009_v50 = vpop.permute.xlu0 %1008 }
 0x3f3   : > { %1012 = vst.msk [vmem:[#allocation7] sm:$0xff] %vm1011_vm5, %v1009_v50 }
 0x3f6   : > { %v1014_v51 = vpop.permute.xlu0 %1013 }
 0x3f7   : > { %1016 = vst.msk [vmem:[#allocation8] sm:$0xff] %vm1011_vm5, %v1014_v51 }
 0x3fa   : > { %v1136_v52 = vld [vmem:[#allocation7] sm:$0xff] }
 0x3fb   : > { %1137 = vxpose.xlu1.b32.start.end [1/1] (short) (narrow) %v1136_v52, 8 }
 0x3fe   : > { %v1169_v54 = vld [vmem:[#allocation8] sm:$0xff] }
 0x3ff   : > { %1170 = vxpose.xlu1.b32.start.end [1/1] (short) (narrow) %v1169_v54, 8 }
 0x41d   : > { %2338 = vset.pattern.permute.xlu1 %v2951_v55 }
 0x455   : > { %v981_v57 = vpop.f32.mrb[0].mxu0 }
 0x456   : > { %v982_v58 = vadd.f32 %v1987_v56, %v981_v57  ;;  %v2092_v59 = vpop.f32.mrb[1].mxu0 }
 0x457   : > { %v984_v60 = vpop.f32.mrb[2].mxu0 }
 0x458   : > { %v990_v61 = vand.u32 2147483647, %v982_v58  ;;  %v2093_v62 = vpop.f32.mrb[3].mxu0  ;;  %v987_v11 = vmax.f32 %v982_v58, 0.0  ;;  %vm988_vm7 = vcmp.ne.f32.partialorder %v982_v58, %v982_v58 }
 0x459   : > { %v3560_v62 = vld [vmem:[#allocation6] sm:$0xff] }
 0x45a   : > { %v991_v63 = vsub.f32 0.0, %v990_v61 }
 0x45c   : > { %v992_v1 = vmul.f32 1.442695, %v991_v63 }
 0x45e   : > { %2390 = vpow2.f32 %v992_v1 }
 0x468   : > { %v2391_v2 = vpop.eup %2390 }
 0x469   : > { %v994_v4 = vadd.f32 1.0, %v2391_v2  ;;  %v997_v5 = vmul.f32 -0.5, %v2391_v2  ;;  %v1000_v7 = vand.u32 2147483647, %v2391_v2 }
 0x46b   : > { %2392 = vlog2.f32 %v994_v4  ;;  %v998_v6 = vadd.f32 1.0, %v997_v5  ;;  %vm1001_vm6 = vcmp.lt.f32.partialorder %v1000_v7, 0.0004427343  ;;  %v1018_v7 = vld [vmem:[#allocation4] sm:$0xff] }
 0x46c   : > { %2394 = vpow2.f32 %v1997_v16 }
 0x46d   : > { %v999_v10 = vmul.f32 %v2391_v2, %v998_v6 }
 0x475   : > { %v2393_v8 = vpop.eup %2392 }
 0x476   : > { %v996_v9 = vmul.f32 0.6931472, %v2393_v8  ;;  %v2395_v23 = vpop.eup %2394 }
 0x477   : > { %v1418_v25 = vadd.f32 1.0, %v2395_v23 }
 0x478   : > { %v1002_v12 = vsel %vm1001_vm6, %v999_v10, %v996_v9 }
 0x479   : > { %v1003_v13 = vadd.f32 %v1002_v12, %v987_v11  ;;  %2396 = vrcp.f32 %v1418_v25 }
 0x47b   : > { %v1004_v14 = vsel %vm988_vm7, %v982_v58, %v1003_v13  ;;  %v1153_v15 = vpop.trf.xlu1 }
 0x47c   : > { %1005 = vst.msk [vmem:[#allocation5] sm:$0xff] %vm682_vm2, %v1004_v14  ;;  %1205 = vperm.xlu0 %2337, %v1153_v15   ;;  %1229 = vperm.xlu1 %2338, %v1153_v15  }
 0x47f   : > { %v1186_v20 = vpop.trf.xlu1 }
 0x480   : > { %2339 = vset.pattern.permute.xlu0 %v2952_v18  ;;  %2342 = vset.pattern.permute.xlu1 %v2953_v19 }
 0x481   : > { %1252 = vperm.xlu0 %2339, %v1153_v15   ;;  %1321 = vperm.xlu1 %2342, %v1153_v15  }
 0x483   : > { %v2397_v27 = vpop.eup %2396  ;;  %v1019_v38 = vld [vmem:[#allocation5] sm:$0xff] }
 0x484   : > { %v1421_v28 = vmul.f32 %v2397_v27, %v3531_v17  ;;  %v3551_v17 = vshrl.u32 %v1026_v33, 7  ;;  %v1022_v47 = vcombine.high %v1019_v38, %v1019_v38  ;;  %v3564_v4 = vmul.f32 %v3560_v62, %v1019_v38 }
 0x485   : > { %2340 = vset.pattern.permute.xlu0 %v2954_v21  ;;  %2344 = vset.pattern.permute.xlu1 %v2950_v53 }
 0x486   : > { %1275 = vperm.xlu0 %2340, %v1153_v15   ;;  %1216 = vperm.xlu1 %2344, %v1186_v20   ;;  %v1028_v37 = vsub.s32 %v1025_v36, %v3551_v17  ;;  %v1073_v41 = vsub.s32 0, %v3551_v17  ;;  %v1234_v11 = vsub.s32 1, %v3551_v17  ;;  %v1280_v35 = vsub.s32 3, %v3551_v17 }
 0x488   : > { %v1029_v39 = vrot.slane %v1019_v38, %v1028_v37  ;;  %v1036_v51 = vrot.slane %v1022_v47, %v1028_v37  ;;  %v1211_v12 = vrot.slane %v3564_v4, %v1073_v41 }
 0x48a   : > { %2341 = vset.pattern.permute.xlu0 %v2955_v22  ;;  %2345 = vset.pattern.permute.xlu1 %v2951_v55  ;;  %v1045_v40 = vrot.slane %v1029_v39, %v1028_v37  ;;  %v1037_v42 = vcombine.high %v1029_v39, %v1029_v39  ;;  %v1052_v56 = vrot.slane %v1036_v51, %v1028_v37 }
 0x48b   : > { %1298 = vperm.xlu0 %2341, %v1153_v15   ;;  %1239 = vperm.xlu1 %2345, %v1186_v20   ;;  %v1038_v60 = vcombine.high %v1036_v51, %v1036_v51 }
 0x48c   : > { %v1074_v43 = vrot.slane %v1045_v40, %v1073_v41  ;;  %v1059_v45 = vrot.slane %v1037_v42, %v1028_v37  ;;  %v1067_v49 = vcombine.high %v1045_v40, %v1045_v40  ;;  %v1090_v61 = vrot.slane %v1052_v56, %v1073_v41 }
 0x48d   : > { %v1066_v2 = vrot.slane %v1038_v60, %v1028_v37  ;;  %v1068_v5 = vcombine.high %v1052_v56, %v1052_v56  ;;  %v1303_v42 = vsub.s32 4, %v3551_v17 }
 0x48e   : > { %v1111_v46 = vmul.f32 %v1074_v43, %v3555_v44  ;;  %v1078_v48 = vrot.slane %v1059_v45, %v1073_v41  ;;  %v1082_v54 = vrot.slane %v1067_v49, %v1073_v41  ;;  %v1069_v55 = vcombine.high %v1059_v45, %v1059_v45 }
 0x48f   : > { %2343 = vset.pattern.permute.xlu0 %v2956_v24  ;;  %2347 = vset.pattern.permute.xlu1 %v2954_v21  ;;  %v1115_v9 = vmul.f32 %v1090_v61, %v3555_v44  ;;  %v1094_v10 = vrot.slane %v1066_v2, %v1073_v41  ;;  %v1070_v21 = vcombine.high %v1066_v2, %v1066_v2 }
 0x490   : > { %1344 = vperm.xlu0 %2343, %v1153_v15   ;;  %1285 = vperm.xlu1 %2347, %v1186_v20   ;;  %v1119_v50 = vmul.f32 1.442695, %v1111_v46  ;;  %v1112_v52 = vmul.f32 %v1078_v48, %v3555_v44  ;;  %v1113_v58 = vmul.f32 %v1082_v54, %v3555_v44  ;;  %v1086_v59 = vrot.slane %v1069_v55, %v1073_v41 }
 0x491   : > { %v1102_v32 = vrot.slane %v1070_v21, %v1073_v41  ;;  %v1304_v51 = vrot.slane %v3564_v4, %v1303_v42  ;;  %v1326_v54 = vsub.s32 5, %v3551_v17 }
 0x492   : > { %2398 = vpow2.f32 %v1119_v50  ;;  %v1121_v57 = vmul.f32 1.442695, %v1112_v52  ;;  %v1123_v63 = vmul.f32 1.442695, %v1113_v58  ;;  %v1114_v1 = vmul.f32 %v1086_v59, %v3555_v44 }
 0x493   : > { %v1118_v45 = vmul.f32 %v1102_v32, %v3555_v44  ;;  %v1327_v2 = vrot.slane %v3564_v4, %v1326_v54 }
 0x494   : > { %2346 = vset.pattern.permute.xlu0 %v2952_v18  ;;  %2348 = vset.pattern.permute.xlu1 %v2957_v26  ;;  %2400 = vpow2.f32 %v1121_v57  ;;  %v1125_v8 = vmul.f32 1.442695, %v1114_v1  ;;  %v1098_v18 = vrot.slane %v1068_v5, %v1073_v41  ;;  %v1281_v41 = vrot.slane %v3564_v4, %v1280_v35 }
 0x495   : > { %1262 = vperm.xlu0 %2346, %v1186_v20   ;;  %1367 = vperm.xlu1 %2348, %v1153_v15   ;;  %2402 = vpow2.f32 %v1123_v63  ;;  %v1133_v52 = vmul.f32 1.442695, %v1118_v45 }
 0x496   : > { %2404 = vpow2.f32 %v1125_v8  ;;  %v1117_v31 = vmul.f32 %v1098_v18, %v3555_v44 }
 0x498   : > { %v1131_v43 = vmul.f32 1.442695, %v1117_v31 }
 0x499   : > { %2349 = vset.pattern.permute.xlu0 %v2955_v22  ;;  %2350 = vset.pattern.permute.xlu1 %v2953_v19  ;;  %v1127_v19 = vmul.f32 1.442695, %v1115_v9  ;;  %v1235_v22 = vrot.slane %v3564_v4, %v1234_v11 }
 0x49a   : > { %1308 = vperm.xlu0 %2349, %v1186_v20   ;;  %1331 = vperm.xlu1 %2350, %v1186_v20  }
 0x49b   : > { %2406 = vpow2.f32 %v1127_v19 }
 0x49c   : > { %v2399_v6 = vpop.eup %2398 }
 0x49d   : > { %v1202_v15 = vmul.f32 %v2399_v6, %v1018_v7  ;;  %v1349_v7 = vsub.s32 6, %v3551_v17 }
 0x49e   : > { %2352 = vset.pattern.permute.xlu0 %v2957_v26  ;;  %2351 = vset.pattern.permute.xlu1 %v2956_v24  ;;  %v1257_v24 = vsub.s32 2, %v3551_v17  ;;  %v2401_v25 = vpop.eup %2400 }
 0x49f   : > { %1377 = vperm.xlu0 %2352, %v1186_v20   ;;  %1354 = vperm.xlu1 %2351, %v1186_v20   ;;  %v1116_v20 = vmul.f32 %v1094_v10, %v3555_v44  ;;  %v2403_v36 = vpop.eup %2402  ;;  %v1350_v18 = vrot.slane %v3564_v4, %v1349_v7 }
 0x4a0   : > { %v1258_v34 = vrot.slane %v3564_v4, %v1257_v24  ;;  %v2405_v48 = vpop.eup %2404 }
 0x4a1   : > { %v1129_v30 = vmul.f32 1.442695, %v1116_v20 }
 0x4a3   : > { %1423 = vrot.lane.b32.xlu1 %v1421_v28, %s2958_s24  ;;  %2408 = vpow2.f32 %v1129_v30  ;;  %s2822_s24 = scalar_lea.vmem %s2821_s27, 256 }
 0x4a4   : > { %2410 = vpow2.f32 %v1131_v43  ;;  %p2824_p4 = scmp.lt.s32.totalorder %s2822_s24, %s2816_s16 }
 0x4a5   : > { %v2407_v59 = vpop.eup %2406  ;;  %2412 = vpow2.f32 %v1133_v52 }
 0x4a6   : > { %p2825_p9 = por %p2824_p4, %p2823_p2 }
 0x4a8   : > { %p2826_p8 = pnand %p2825_p9, %p2819_p1 }
 0x4ad   : > { %v2409_v8 = vpop.eup %2408 }
 0x4ae   : > { %v2411_v20 = vpop.eup %2410 }
 0x4af   : > { %v2413_v32 = vpop.eup %2412 }
 0x4fb   : > { %v1230_v13 = vpop.permute.xlu1 %1229  ;;  %v1206_v14 = vpop.permute.xlu0 %1205 }
 0x4fc   : > { %v1212_v16 = vmul.f32 %v1211_v12, %v1206_v14  ;;  %v1236_v26 = vmul.f32 %v1235_v22, %v1230_v13  ;;  %v1372_v22 = vsub.s32 7, %v3551_v17 }
 0x4fe   : > { %v1213_v23 = vadd.f32 %v1212_v16, %v1202_v15 }
 0x500   : > { %v1227_v27 = vmul.f32 %v2401_v25, %v1213_v23  ;;  %v1322_v28 = vpop.permute.xlu1 %1321  ;;  %v1253_v29 = vpop.permute.xlu0 %1252 }
 0x501   : > { %v1259_v38 = vmul.f32 %v1258_v34, %v1253_v29  ;;  %v1328_v11 = vmul.f32 %v1327_v2, %v1322_v28 }
 0x502   : > { %v1237_v33 = vadd.f32 %v1236_v26, %v1227_v27 }
 0x504   : > { %v1250_v37 = vmul.f32 %v2403_v36, %v1237_v33 }
 0x505   : > { %v1217_v39 = vpop.permute.xlu1 %1216  ;;  %v1276_v40 = vpop.permute.xlu0 %1275 }
 0x506   : > { %v1260_v46 = vadd.f32 %v1259_v38, %v1250_v37  ;;  %v1219_v47 = vmul.f32 %v1217_v39, %v1213_v23  ;;  %v1282_v50 = vmul.f32 %v1281_v41, %v1276_v40 }
 0x508   : > { %v1273_v49 = vmul.f32 %v2405_v48, %v1260_v46  ;;  %v1220_v55 = vsel %vm682_vm2, %v1219_v47, 0.0 }
 0x509   : > { %v1221_v63 = vrot.slane %v1220_v55, 4 }
 0x50a   : > { %v1283_v56 = vadd.f32 %v1282_v50, %v1273_v49  ;;  %v1240_v57 = vpop.permute.xlu1 %1239  ;;  %v1299_v58 = vpop.permute.xlu0 %1298 }
 0x50b   : > { %v1242_v44 = vmul.f32 %v1240_v57, %v1237_v33  ;;  %v1305_v60 = vmul.f32 %v1304_v51, %v1299_v58  ;;  %v1222_v15 = vadd.f32 %v1221_v63, %v1220_v55  ;;  %v1373_v33 = vrot.slane %v3564_v4, %v1372_v22 }
 0x50c   : > { %v1296_v61 = vmul.f32 %v2407_v59, %v1283_v56 }
 0x50d   : > { %v1243_v1 = vsel %vm682_vm2, %v1242_v44, 0.0  ;;  %v1223_v29 = vrot.slane %v1222_v15, 2 }
 0x50e   : > { %v1244_v5 = vrot.slane %v1243_v1, 4  ;;  %v1306_v6 = vadd.f32 %v1305_v60, %v1296_v61 }
 0x50f   : > { %v1286_v9 = vpop.permute.xlu1 %1285  ;;  %v1345_v10 = vpop.permute.xlu0 %1344  ;;  %v1224_v38 = vadd.f32 %v1223_v29, %v1222_v15 }
 0x510   : > { %v1245_v12 = vadd.f32 %v1244_v5, %v1243_v1  ;;  %v1288_v13 = vmul.f32 %v1286_v9, %v1283_v56  ;;  %v1319_v14 = vmul.f32 %v2409_v8, %v1306_v6  ;;  %v1351_v24 = vmul.f32 %v1350_v18, %v1345_v10 }
 0x511   : > { %v1225_v52 = vrot.slane %v1224_v38, 1 }
 0x512   : > { %v1289_v16 = vsel %vm682_vm2, %v1288_v13, 0.0  ;;  %v1329_v19 = vadd.f32 %v1328_v11, %v1319_v14  ;;  %v1246_v23 = vrot.slane %v1245_v12, 2 }
 0x513   : > { %v1290_v21 = vrot.slane %v1289_v16, 4  ;;  %v1226_v10 = vadd.f32 %v1225_v52, %v1224_v38  ;;  %v2375_v52 = vld [vmem:[#allocation28 + $0x10] ss:$8 sps:$4 sm:$0xff]  }
 0x514   : > { %v1368_v25 = vpop.permute.xlu1 %1367  ;;  %v1263_v26 = vpop.permute.xlu0 %1262  ;;  %v1342_v27 = vmul.f32 %v2411_v20, %v1329_v19  ;;  %v1247_v35 = vadd.f32 %v1246_v23, %v1245_v12 }
 0x515   : > { %v1265_v28 = vmul.f32 %v1263_v26, %v1260_v46  ;;  %v1291_v30 = vadd.f32 %v1290_v21, %v1289_v16  ;;  %v1374_v39 = vmul.f32 %v1373_v33, %v1368_v25 }
 0x516   : > { %v1352_v31 = vadd.f32 %v1351_v24, %v1342_v27  ;;  %v1248_v46 = vrot.slane %v1247_v35, 1 }
 0x517   : > { %v1266_v34 = vsel %vm682_vm2, %v1265_v28, 0.0  ;;  %v1292_v42 = vrot.slane %v1291_v30, 2 }
 0x518   : > { %v1267_v36 = vrot.slane %v1266_v34, 4  ;;  %v1365_v37 = vmul.f32 %v2413_v32, %v1352_v31  ;;  %v1249_v61 = vadd.f32 %v1248_v46, %v1247_v35 }
 0x519   : > { %v1332_v17 = vpop.permute.xlu1 %1331  ;;  %v1309_v40 = vpop.permute.xlu0 %1308  ;;  %v1293_v54 = vadd.f32 %v1292_v42, %v1291_v30 }
 0x51a   : > { %v1268_v43 = vadd.f32 %v1267_v36, %v1266_v34  ;;  %v1334_v45 = vmul.f32 %v1332_v17, %v1329_v19  ;;  %v1311_v47 = vmul.f32 %v1309_v40, %v1306_v6  ;;  %v1375_v41 = vadd.f32 %v1374_v39, %v1365_v37  ;;  %v1996_v37 = vld [vmem:[#allocation24] ss:$0 sm:$0xff] }
 0x51b   : > { %v1294_v11 = vrot.slane %v1293_v54, 1  ;;  %v1389_v16 = vsel %vm1388_vm8, %v1226_v10, %v1249_v61  ;;  %v1413_v38 = vmul.f32 %v1996_v37, %v3560_v62  ;;  %v2374_v62 = vld [vmem:[#allocation28 + $0x4] ss:$8 sps:$4 sm:$0xff]   ;;  %v2380_v61 = vld [vmem:[#allocation30 + $0x10] sm:$0xff]  }
 0x51c   : > { %v1269_v48 = vrot.slane %v1268_v43, 2  ;;  %v1335_v49 = vsel %vm682_vm2, %v1334_v45, 0.0  ;;  %v1312_v4 = vsel %vm682_vm2, %v1311_v47, 0.0  ;;  %1403 = vst.msk [vmem:[#allocation4] sm:$0xff] %vm682_vm2, %v1375_v41  ;;  %1548 = vmatprep.subr.bf16.mxu1 %v2374_v62 }
 0x51d   : > { %v1336_v50 = vrot.slane %v1335_v49, 4  ;;  %v1313_v51 = vrot.slane %v1312_v4, 4  ;;  %v1295_v23 = vadd.f32 %v1294_v11, %v1293_v54 }
 0x51e   : > { %v1270_v55 = vadd.f32 %v1269_v48, %v1268_v43  ;;  %v1355_v56 = vpop.permute.xlu1 %1354  ;;  %v1378_v57 = vpop.permute.xlu0 %1377 }
 0x51f   : > { %v1337_v58 = vadd.f32 %v1336_v50, %v1335_v49  ;;  %v1314_v59 = vadd.f32 %v1313_v51, %v1312_v4  ;;  %v1357_v44 = vmul.f32 %v1355_v56, %v1352_v31  ;;  %v1380_v60 = vmul.f32 %v1378_v57, %v1375_v41  ;;  %v2372_v50 = vld [vmem:[#allocation28] ss:$8 sps:$4 sm:$0xff]   ;;  %v2377_v51 = vld [vmem:[#allocation28 + $0x14] ss:$8 sps:$4 sm:$0xff]  }
 0x520   : > { %v1271_v63 = vrot.slane %v1270_v55, 1  ;;  %v2003_v56 = vld [vmem:[#allocation27] ss:$0 sm:$0xff] }
 0x521   : > { %v1338_v1 = vrot.slane %v1337_v58, 2  ;;  %v1315_v2 = vrot.slane %v1314_v59, 2  ;;  %v1358_v5 = vsel %vm682_vm2, %v1357_v44, 0.0  ;;  %v1381_v6 = vsel %vm682_vm2, %v1380_v60, 0.0  ;;  %v2378_v44 = vld [vmem:[#allocation30] sm:$0xff]   ;;  %v2379_v60 = vld [vmem:[#allocation30 + $0x8] sm:$0xff]  }
 0x522   : > { %v1272_v7 = vadd.f32 %v1271_v63, %v1270_v55  ;;  %v1359_v8 = vrot.slane %v1358_v5, 4  ;;  %v1382_v9 = vrot.slane %v1381_v6, 4  ;;  %v1424_v40 = vpop.permute.xlu1 %1423  ;;  %2107 = vmatpush3.bf16.msra.mxu0 %v2378_v44  ;;  %v2381_v63 = vld [vmem:[#allocation30 + $0x18] sm:$0xff]  }
 0x523   : > { %v1339_v12 = vadd.f32 %v1338_v1, %v1337_v58  ;;  %v1316_v13 = vadd.f32 %v1315_v2, %v1314_v59  ;;  %2108 = vmatprep.subr.bf16.mxu0 %v2946_v0  ;;  %v2382_v1 = vld [vmem:[#allocation30 + $0x20] sm:$0xff]   ;;  %v2383_v2 = vld [vmem:[#allocation30 + $0x28] sm:$0xff]  }
 0x524   : > { %v1360_v14 = vadd.f32 %v1359_v8, %v1358_v5  ;;  %v1383_v15 = vadd.f32 %v1382_v9, %v1381_v6  ;;  %v1391_v20 = vsel %vm1390_vm9, %v1389_v16, %v1272_v7  ;;  %v2384_v5 = vld [vmem:[#allocation30 + $0x30] sm:$0xff]   ;;  %v2385_v6 = vld [vmem:[#allocation30 + $0x38] sm:$0xff]  }
 0x525   : > { %v1340_v18 = vrot.slane %v1339_v12, 1  ;;  %v1317_v19 = vrot.slane %v1316_v13, 1  ;;  %v1393_v29 = vsel %vm1392_vm10, %v1391_v20, %v1295_v23 }
 0x526   : > { %v1361_v21 = vrot.slane %v1360_v14, 2  ;;  %v1384_v22 = vrot.slane %v1383_v15, 2  ;;  %2109 = vmatpush3.bf16.msra.mxu0 %v2379_v60 }
 0x527   : > { %v1318_v24 = vadd.f32 %v1317_v19, %v1316_v13  ;;  %v1341_v27 = vadd.f32 %v1340_v18, %v1339_v12  ;;  %2110 = vmatprep.subr.bf16.mxu0 %v2946_v0 }
 0x528   : > { %v1362_v25 = vadd.f32 %v1361_v21, %v1360_v14  ;;  %v1385_v26 = vadd.f32 %v1384_v22, %v1383_v15 }
 0x529   : > { %v1395_v28 = vsel %vm1394_vm11, %v1393_v29, %v1318_v24 }
 0x52a   : > { %v1363_v30 = vrot.slane %v1362_v25, 1  ;;  %v1386_v31 = vrot.slane %v1385_v26, 1  ;;  %v1397_v34 = vsel %vm1396_vm12, %v1395_v28, %v1341_v27  ;;  %2111 = vmatpush3.bf16.msra.mxu0 %v2380_v61  ;;  %v2018_v28 = vld [vmem:[#allocation31] ss:$0 sm:$0xff] }
 0x52b   : > { %2112 = vmatprep.subr.bf16.mxu0 %v2946_v0 }
 0x52c   : > { %v1364_v32 = vadd.f32 %v1363_v30, %v1362_v25  ;;  %v1387_v33 = vadd.f32 %v1386_v31, %v1385_v26 }
 0x52e   : > { %v1399_v35 = vsel %vm1398_vm13, %v1397_v34, %v1364_v32  ;;  %2113 = vmatpush3.bf16.msra.mxu0 %v2381_v63 }
 0x52f   : > { %v1401_v36 = vsel %vm1400_vm14, %v1399_v35, %v1387_v33  ;;  %2114 = vmatprep.subr.bf16.mxu0 %v2946_v0 }
 0x530   : > { %1402 = vst.msk [vmem:[#allocation9] sm:$0xff] %vm682_vm2, %v1401_v36 }
 0x532   : > { %2115 = vmatpush3.bf16.msra.mxu0 %v2382_v1 }
 0x533   : > { %2116 = vmatprep.subr.bf16.mxu0 %v2946_v0 }
 0x536   : > { %2117 = vmatpush3.bf16.msra.mxu0 %v2383_v2 }
 0x537   : > { %v1404_v39 = vld [vmem:[#allocation9] sm:$0xff]  ;;  %2118 = vmatprep.subr.bf16.mxu0 %v2946_v0 }
 0x538   : > { %v1414_v17 = vadd.f32 %v1413_v38, %v1404_v39 }
 0x53a   : > { %v1426_v42 = vmul.f32 %v1424_v40, %v1414_v17  ;;  %2119 = vmatpush3.bf16.msra.mxu0 %v2384_v5 }
 0x53b   : > { %2120 = vmatprep.subr.bf16.mxu0 %v2946_v0 }
 0x53c   : > { %v1427_v43 = vpack.c.bf16 %v1426_v42, %v1426_v42 }
 0x53e   : > { %2103 = vmatmul.mubr.msk.bf16.vlgmr.msra.gmra.mrb[8].mxu1 %vm682_vm2, %v1427_v43  ;;  %2121 = vmatpush3.bf16.msra.mxu0 %v2385_v6 }
 0x53f   : > { %1580 = vmatprep.mubr.bf16.mxu1 %v2950_v53  ;;  %1549 = vmatpush1.bf16.msra.mxu1 %v2372_v50 }
 0x540   : > { %1550 = vmatprep.subr.bf16.mxu1 %v2377_v51 }
 0x543   : > { %1551 = vmatpush1.bf16.msra.mxu1 %v2375_v52 }
 0x611   : > { %v1497_v45 = vpop.f32.mrb[8].mxu1 }
 0x612   : > { %v1498_v47 = vadd.f32 %v1497_v45, %v3510_v3  ;;  %v2104_v41 = vpop.f32.mrb[9].mxu1 }
 0x613   : > { %v1500_v46 = vpop.f32.mrb[10].mxu1 }
 0x614   : > { %v2105_v48 = vpop.f32.mrb[11].mxu1  ;;  %v1504_v49 = vmul.f32 %v1498_v47, %v1498_v47 }
 0x616   : > { %v1505_v4 = vsel %vm702_vm3, %v1504_v49, 0.0 }
 0x617   : > { %1506 = vadd.xlane.f32.xlu1 %v1505_v4 }
 0x6a4   : > { %v1507_v54 = vpop.xlane.xlu1 %1506 }
 0x6a5   : > { %v1509_v53 = vmul.f32 0.03125, %v1507_v54 }
 0x6a7   : > { %v1510_v55 = vadd.f32 1e-05, %v1509_v53 }
 0x6a9   : > { %2414 = vrsqrt.f32 %v1510_v55 }
 0x6b3   : > { %v2415_v3 = vpop.eup %2414 }
 0x6b4   : > { %v1512_v57 = vmul.f32 %v2415_v3, %v1498_v47 }
 0x6b6   : > { %v1519_v58 = vmul.f32 %v2003_v56, %v1512_v57 }
 0x6b8   : > { %v1520_v59 = vpack.c.bf16 %v1519_v58, %v1519_v58 }
 0x6ba   : > { %2008 = vmatmul.mubr.msk.bf16.vlgmr.msra.gmra.mrb[12].mxu1 %vm702_vm3, %v1520_v59 }
 0x78d   : > { %v1582_v7 = vpop.f32.mrb[12].mxu1 }
 0x78e   : > { %v1584_v8 = vpop.f32.mrb[13].mxu1 }
 0x78f   : > { %v2009_v9 = vmul.f32 -1.442695, %v1584_v8  ;;  %v1586_v10 = vpop.f32.mrb[14].mxu1 }
 0x790   : > { %v1587_v11 = vpop.f32.mrb[15].mxu1 }
 0x791   : > { %2416 = vpow2.f32 %v2009_v9 }
 0x79b   : > { %v2417_v12 = vpop.eup %2416 }
 0x79c   : > { %v1592_v13 = vadd.f32 1.0, %v2417_v12 }
 0x79e   : > { %2418 = vrcp.f32 %v1592_v13 }
 0x7a8   : > { %v2419_v14 = vpop.eup %2418 }
 0x7a9   : > { %v1595_v15 = vmul.f32 %v2419_v14, %v1584_v8 }
 0x7ab   : > { %v1596_v16 = vmul.f32 %v1595_v15, %v1582_v7 }
 0x7ad   : > { %v1597_v18 = vpack.c.bf16 %v1596_v16, %v1596_v16 }
 0x7af   : > { %2123 = vmatmul.mubr.bf16.vlgmr.msra.gmra.mrb[4].mxu0 %v1597_v18 }
 0x882   : > { %v1696_v19 = vpop.f32.mrb[4].mxu0 }
 0x883   : > { %v1697_v0 = vadd.f32 %v1696_v19, %v1519_v58  ;;  %v2124_v20 = vpop.f32.mrb[5].mxu0 }
 0x884   : > { %v1699_v21 = vpop.f32.mrb[6].mxu0 }
 0x885   : > { %v2125_v22 = vpop.f32.mrb[7].mxu0  ;;  %v1703_v23 = vmul.f32 %v1697_v0, %v1697_v0 }
 0x887   : > { %v1704_v24 = vsel %vm702_vm3, %v1703_v23, 0.0 }
 0x888   : > { %1705 = vadd.xlane.f32.xlu0 %v1704_v24 }
 0x915   : > { %v1706_v25 = vpop.xlane.xlu0 %1705 }
 0x916   : > { %v1707_v26 = vmul.f32 0.03125, %v1706_v25 }
 0x918   : > { %v1708_v27 = vadd.f32 1e-05, %v1707_v26 }
 0x91a   : > { %2420 = vrsqrt.f32 %v1708_v27 }
 0x924   : > { %v2421_v29 = vpop.eup %2420 }
 0x925   : > { %v1710_v30 = vmul.f32 %v2421_v29, %v1697_v0 }
 0x927   : > { %v1717_v31 = vmul.f32 %v2018_v28, %v1710_v30 }
 0x929   : > { %1718 = vst.msk [vmem:[%s674_s29] sm:$0xff] %vm702_vm3, %v1717_v31 }
 0x92a   : > { %2829 = shalt.err (!%p2826_p8)
}
 0x92b   : > { %s2830_s19 = scalar_lea.hbm %s3616_s28, 128  ;;  %s2834_s29 = scalar_lea.hbm %s3733_s0, 256 }
 0x92c   : > { %p2831_p3 = scmp.ne.s32.totalorder %s3616_s28, %s2830_s19  ;;  %p2835_p0 = scmp.lt.u32.totalorder %s3616_s28, %s3733_s0 }
 0x92d   : > { %p2836_p11 = scmp.lt.u32.totalorder %s2834_s29, %s2830_s19  ;;  %p2838_p6 = scmp.lt.u32.totalorder %s2830_s19, %s3616_s28 }
 0x92e   : > { %p2832_p12 = pnand %p2831_p3, %p3734_p5 }
 0x92f   : > { %p2837_p7 = por %p2836_p11, %p2835_p0 }
 0x930   : > { %p2833_p13 = pneg %p2832_p12 }
 0x931   : > { %p2839_p10 = por %p2838_p6, %p2837_p7 }
 0x933   : > { %p2840_p1 = pnand %p2839_p10, %p2833_p13 }
 0x935   : > { %2843 = shalt.err (!%p2840_p1)
}
 0x936   : > { %2180 = dma.vmem_to_hbm [thread:$0]  (%p3734_p5), %s3618_s23, 128, %s3616_s28, %s1720_s20  }
 0x937 PF: > { %s3735_s16 = sld [smem:[#allocation43_spill]]  ;;  %p3736_p2 = scmp.ne.s32.totalorder %s3723_s14, 0 }
 0x938   : > { %p3737_p4 = scmp.ge.s32.totalorder %s2926_s18, 2 }
 0x93a   : > { %p2227_p9 = pnand %p3737_p4, %p3736_p2 }
 0x93d   : > { %s1746_s21 = sand.u32 1, %s3735_s16  }
 0x93e   : > { %s1747_s27 = scalar_lea.sflag [#allocation12], %s1746_s21 }
 0x93f   : > { %2901 = dma.done.wait (!%p2227_p9), %s1747_s27, 128  }
 0x940   : > { %2903 = vsyncadd (!%p2227_p9), %s1747_s27, 4294967168  ;;  %s37_s18 = sadd.s32 1, %s2926_s18   ;;  %s3738_s29 = sld [smem:[#allocation44_spill]] }
 0x941   : > { %p34_p8 = scmp.ge.s32.totalorder %s37_s18, 4   ;;  %s3739_s30 = sld [smem:[#allocation45_spill]] }
 0x942   : > { %s3740_s15 = smov %s3413_s1  ;;  %s3741_s16 = smov %s2922_s17 }
 0x943   : > { %s3742_s17 = smov %s3744_s22  ;;  %36 = sbr.rel (!%p34_p8) target bundleno = 19 (0x13), region = 177 }
 0x94a   :  { %1752 = vsyncpa [#allocation11], 1 }
 0x94b   :  { %1754 = vsyncpa [#allocation11 + $0x1], 1 }
 0x94c   :  { %1755 = vsyncpa [#allocation14], 1 }
 0x94d   :  { %1756 = vsyncpa [#allocation17], 1 }
 0x94e   :  { %1757 = vsyncpa [#allocation20], 1 }
 0x94f   :  { %1758 = vsyncpa [#allocation23], 1 }
 0x950   :  { %1759 = vsyncpa [#allocation26], 1 }
 0x951   :  { %1760 = vsyncpa [#allocation29], 1 }
 0x952   :  { %1761 = vsyncpa [#allocation32], 1 }
 0x953   :  { %1762 = vsyncpa [#allocation12], 1 }
 0x954   :  { %1764 = vsyncpa [#allocation12 + $0x1], 1 }

</bundles_post_ra>
